<compile_context>
chip_gen: v7x
topology: tpu7x:2x2x1
jax: 0.10.0
libtpu: 0.0.40
codegen_flags: <defaults>
</compile_context>

<pallas_src>
import jax
import jax.numpy as jnp
from jax import lax
from jax.experimental import pallas as pl
from jax.experimental.pallas import tpu as pltpu


TB = 8                 # batch tile (sublane aligned); batch padded to a multiple of TB
C1 = 16                # conv1 out-channels padded 10 -> 16
NKJ = 5                # conv2 horizontal taps folded into conv1's output lanes
C1W = NKJ * C1         # 80 widened conv1 output lanes, layout (kj, c)
C2 = 32                # conv2 out-channels padded 20 -> 32
F1 = 64                # fc1 out padded 50 -> 64
FO = 128               # final output lanes (26 -> 128, lane-dense)
KW = 65                # widened conv1 patch length: 5 rows x 13 cols
MT = 12 * 4 * 8 * TB   # patch rows per batch tile: (h1, pool-q, ow2, b) = 3072


# ------------------------------ Pallas kernel ------------------------------

def _red_kernel(p1_ref, w1w_ref, b1w_ref, w2p_ref, b2p_ref, vfc1_ref, lb1_ref,
                w2fc_ref, lb2_ref, o_ref, a1_ref, flat_ref):
    f32 = jnp.float32

    # ---- conv1 (+ 2x2 maxpool + relu), chunked over the 12 pooled rows ------
    # Patch rows are (h1, q=(di,dj), ow2, b).  The widened weight makes output
    # lane (kj*16 + c) equal conv1 channel c at column w1 = ow2 + kj, so the
    # pooled map needs no relayout for conv2's horizontal taps.
    w1w = w1w_ref[...]                                            # [65, 80] bf16
    bias1 = jnp.broadcast_to(b1w_ref[...], (8 * TB, C1W))
    for h1 in range(12):
        rows = p1_ref[pl.ds(h1 * 4 * 8 * TB, 4 * 8 * TB), :]      # [(q,ow2,b), 65]
        y = jnp.dot(rows, w1w, preferred_element_type=f32)        # [256, 80]
        y = jnp.max(y.reshape(4, 8 * TB, C1W), axis=0)            # pool over (di,dj)
        y = jnp.maximum(y + bias1, 0.0)                           # bias + relu
        a1_ref[h1] = y.reshape(8, TB, C1W)                        # [ow2, b, (kj,c)]

    # ---- conv2 (5 ki taps, K = 80) + 2x2 maxpool + relu + flatten -----------
    bias2 = jnp.broadcast_to(b2p_ref[...], (2 * 8 * TB, C2))
    for i2 in range(4):                     # pooled output row pair oh2 = 2*i2 + di2
        acc = bias2
        for ki in range(NKJ):
            lhs = a1_ref[pl.ds(2 * i2 + ki, 2)]                   # [2, 8, TB, 80]
            lhs = lhs.reshape(2 * 8 * TB, C1W)                    # rows (di2, ow2, b)
            acc = acc + jnp.dot(lhs, w2p_ref[ki], preferred_element_type=f32)
        z = acc.reshape(2, 4, 2, TB, C2)                          # (di2, j2, dj2, b, c)
        z = jnp.maximum(jnp.max(jnp.max(z, axis=2), axis=0), 0.0)  # [4(j2), TB, C2]
        # lane-pack the 4 pooled j2 slabs into one aligned 128-lane store
        zc = jnp.concatenate([z[0], z[1], z[2], z[3]], axis=-1)    # [TB, 128]
        flat_ref[:, pl.ds(i2 * 4 * C2, 4 * C2)] = zc

    # ---- fc1 (flatten folded into the packed weight) + relu -----------------
    h = jnp.dot(flat_ref[...], vfc1_ref[...], preferred_element_type=f32)  # [TB, 64]
    h = jnp.maximum(h + lb1_ref[...], 0.0)
    # ---- fc2 + relu (matches the module's F.relu(self.linear2(x))) ----------
    out = jnp.dot(h, w2fc_ref[...], preferred_element_type=f32)            # [TB, 128]
    o_ref[...] = jnp.maximum(out + lb2_ref[...], 0.0)


def _full_spec(shape):
    n = len(shape)
    return pl.BlockSpec(shape, lambda t, n=n: (0,) * n)


def _red_pallas(p1, weights, *, nbt):
    return pl.pallas_call(
        _red_kernel,
        out_shape=jax.ShapeDtypeStruct((nbt * TB, FO), jnp.float32),
        grid=(nbt,),
        in_specs=[pl.BlockSpec((MT, KW), lambda t: (t, 0))]
                 + [_full_spec(w.shape) for w in weights],
        out_specs=pl.BlockSpec((TB, FO), lambda t: (t, 0)),
        scratch_shapes=[
            pltpu.VMEM((12, 8, TB, C1W), jnp.float32),   # pooled conv1 map
            pltpu.VMEM((TB, 16 * C2), jnp.float32),      # pool2 + flatten, lane packed
        ],
        compiler_params=pltpu.CompilerParams(
            dimension_semantics=("parallel",)),
    )(p1, *weights)


# ------------------------------- host glue ---------------------------------

def pack_params(params):
    """One-time weight repack (call ONCE, outside the per-call jit)."""
    (w1, b1, w2, b2, lw1, lb1, lw2, lb2) = params
    f32 = jnp.float32

    # conv1 weight widened: column (kj*16 + c) of the patch matmul produces conv1
    # channel c at spatial column w1 = ow2 + kj (pre-pool).  Patch cols = (ki, m),
    # m in 0..12; contribution uses w1[c, 0, ki, m - 2*kj] when 0 <= m-2kj <= 4.
    w1w = jnp.zeros((KW, C1W), f32)
    for ki in range(5):
        for kj in range(5):
            blk = jnp.transpose(w1[:, 0, ki, :])               # [5(kjc), 10(c)]
            w1w = w1w.at[ki * 13 + 2 * kj: ki * 13 + 2 * kj + 5,
                         kj * C1: kj * C1 + 10].set(blk)
    b1w = jnp.zeros((1, C1W), f32)
    for kj in range(5):
        b1w = b1w.at[0, kj * C1: kj * C1 + 10].set(b1)

    # conv2: per-ki weight contracting over lanes (kj, ci)
    w2p = jnp.zeros((NKJ, C1W, C2), f32)
    for ki in range(5):
        for kj in range(5):
            blk = jnp.transpose(w2[:, :, ki, kj])              # [10(ci), 20(co)]
            w2p = w2p.at[ki, kj * C1: kj * C1 + 10, :20].set(blk)
    b2p = jnp.zeros((1, C2), f32).at[0, :20].set(b2)

    # fc1 with the PyTorch NCHW flatten folded in:
    # packed row (s*32 + co)  <->  lw1 column (co*16 + s),  s = i2*4 + j2
    lw1r = jnp.transpose(lw1.reshape(50, 20, 16), (2, 1, 0))   # [16(s), 20(co), 50(n)]
    vfc1 = jnp.zeros((16, C2, F1), f32).at[:, :20, :50].set(lw1r).reshape(16 * C2, F1)
    lb1p = jnp.zeros((1, F1), f32).at[0, :50].set(lb1)

    w2fc = jnp.zeros((F1, FO), f32).at[:50, :26].set(jnp.transpose(lw2))
    lb2p = jnp.zeros((1, FO), f32).at[0, :26].set(lb2)

    return (w1w.astype(jnp.bfloat16), b1w, w2p, b2p, vfc1, lb1p, w2fc, lb2p)


def _conv1_patches(x, nbt):
    """Widened conv1 im2col, rows (tile, h1, di, dj, ow2, b), cols (ki, m); m covers
    the 13 input columns needed for all 5 kj-shifted 5-wide windows.  bf16."""
    B = x.shape[0]
    Bp = nbt * TB
    xp = jnp.zeros((Bp, 28, 28), jnp.float32).at[:B].set(x[:, 0].astype(jnp.float32))

    def ax(n, i):
        return jnp.arange(n).reshape((1,) * i + (n,) + (1,) * (7 - i))

    bt, h1, di, dj, ow, bl, ki, m = (ax(nbt, 0), ax(12, 1), ax(2, 2), ax(2, 3),
                                     ax(8, 4), ax(TB, 5), ax(5, 6), ax(13, 7))
    p = xp[bt * TB + bl, 2 * h1 + di + ki, 2 * ow + dj + m]   # all indices in-range
    return p.reshape(nbt * MT, KW).astype(jnp.bfloat16)


def red_forward(x, packed):
    B = x.shape[0]
    nbt = max(1, -(-B // TB))
    p1 = _conv1_patches(x, nbt)
    out = _red_pallas(p1, packed, nbt=nbt)        # [nbt*TB, 128] lane-dense
    return out[:B, :26]


def init_params(key):
    """Deterministic PyTorch-like uniform(+-1/sqrt(fan_in)) init."""
    def u(k, shape, fan_in):
        bound = 1.0 / jnp.sqrt(jnp.float32(fan_in))
        return jax.random.uniform(k, shape, jnp.float32, -bound, bound)
    ks = jax.random.split(key, 8)
    w1 = u(ks[0], (10, 1, 5, 5), 1 * 5 * 5)
    b1 = u(ks[1], (10,), 1 * 5 * 5)
    w2 = u(ks[2], (20, 10, 5, 5), 10 * 5 * 5)
    b2 = u(ks[3], (20,), 10 * 5 * 5)
    lw1 = u(ks[4], (50, 320), 320)   # PyTorch Linear weight layout [out, in]
    lb1 = u(ks[5], (50,), 320)
    lw2 = u(ks[6], (26, 50), 50)
    lb2 = u(ks[7], (26,), 50)
    return (w1, b1, w2, b2, lw1, lb1, lw2, lb2)


def reference(x_nchw, params):
    """Pure JAX (XLA) reference of the same forward, for a correctness check."""
    (w1, b1, w2, b2, lw1, lb1, lw2, lb2) = params
    dn = ("NCHW", "OIHW", "NCHW")
    y = lax.conv_general_dilated(x_nchw, w1, (1, 1), "VALID",
                                 dimension_numbers=dn) + b1[None, :, None, None]
    y = jax.nn.relu(lax.reduce_window(y, -jnp.inf, lax.max,
                                      (1, 1, 2, 2), (1, 1, 2, 2), "VALID"))
    y = lax.conv_general_dilated(y, w2, (1, 1), "VALID",
                                 dimension_numbers=dn) + b2[None, :, None, None]
    y = jax.nn.relu(lax.reduce_window(y, -jnp.inf, lax.max,
                                      (1, 1, 2, 2), (1, 1, 2, 2), "VALID"))
    y = y.reshape(-1, 320)
    y = jax.nn.relu(y @ lw1.T + lb1)
    y = jax.nn.relu(y @ lw2.T + lb2)
    return y


if __name__ == "__main__":
    key = jax.random.PRNGKey(0)
    kx, kp = jax.random.split(key)
    x = jax.random.normal(kx, (2, 1, 28, 28), jnp.float32)   # NCHW, 28x28 -> 320 flat
    params = init_params(kp)

    packed = pack_params(params)          # one-time weight repack (cached on device)
    fwd = jax.jit(red_forward)
    out = jax.block_until_ready(fwd(x, packed))

    ref = reference(x, params)
    assert out.shape == (2, 26), out.shape
    # bf16 patches/conv1-weights with f32 accumulation -> loosened tolerance.
    assert jnp.allclose(out, ref, rtol=2e-2, atol=2e-2), (
        "mismatch vs XLA reference, max abs diff "
        + str(float(jnp.max(jnp.abs(out - ref)))))
    print("KERNEL_OK")
</pallas_src>

<mosaic_0001>
module attributes {stable_mosaic.version = 11 : i64} {
  func.func @_red_kernel(%arg0: i32, %arg1: memref<3072x65xbf16, #tpu.memory_space<vmem>>, %arg2: memref<65x80xbf16, #tpu.memory_space<vmem>>, %arg3: memref<1x80xf32, #tpu.memory_space<vmem>>, %arg4: memref<5x80x32xf32, #tpu.memory_space<vmem>>, %arg5: memref<1x32xf32, #tpu.memory_space<vmem>>, %arg6: memref<512x64xf32, #tpu.memory_space<vmem>>, %arg7: memref<1x64xf32, #tpu.memory_space<vmem>>, %arg8: memref<64x128xf32, #tpu.memory_space<vmem>>, %arg9: memref<1x128xf32, #tpu.memory_space<vmem>>, %arg10: memref<8x128xf32, #tpu.memory_space<vmem>>, %arg11: memref<12x8x8x80xf32, #tpu.memory_space<vmem>>, %arg12: memref<8x512xf32, #tpu.memory_space<vmem>>) attributes {dimension_semantics = [#tpu.dimension_semantics<parallel>], iteration_bounds = array<i64: 1>, scalar_prefetch = 0 : i64, scratch_operands = 2 : i64, tpu.core_type = #tpu.core_type<tc>, window_params = [{transform_indices = @transform_0, window_bounds = array<i64: 3072, 65>}, {pipeline_mode = #tpu.pipeline_mode<synchronous>, transform_indices = @transform_1, window_bounds = array<i64: 65, 80>}, {pipeline_mode = #tpu.pipeline_mode<synchronous>, transform_indices = @transform_2, window_bounds = array<i64: 1, 80>}, {pipeline_mode = #tpu.pipeline_mode<synchronous>, transform_indices = @transform_3, window_bounds = array<i64: 5, 80, 32>}, {pipeline_mode = #tpu.pipeline_mode<synchronous>, transform_indices = @transform_4, window_bounds = array<i64: 1, 32>}, {pipeline_mode = #tpu.pipeline_mode<synchronous>, transform_indices = @transform_5, window_bounds = array<i64: 512, 64>}, {pipeline_mode = #tpu.pipeline_mode<synchronous>, transform_indices = @transform_6, window_bounds = array<i64: 1, 64>}, {pipeline_mode = #tpu.pipeline_mode<synchronous>, transform_indices = @transform_7, window_bounds = array<i64: 64, 128>}, {pipeline_mode = #tpu.pipeline_mode<synchronous>, transform_indices = @transform_8, window_bounds = array<i64: 1, 128>}, {transform_indices = @transform_9, window_bounds = array<i64: 8, 128>}]} {
    %c0 = arith.constant 0 : index
    %c0_0 = arith.constant 0 : index
    %0 = vector.load %arg2[%c0, %c0_0] : memref<65x80xbf16, #tpu.memory_space<vmem>>, vector<65x80xbf16>
    %c0_1 = arith.constant 0 : index
    %c0_2 = arith.constant 0 : index
    %1 = vector.load %arg3[%c0_1, %c0_2] : memref<1x80xf32, #tpu.memory_space<vmem>>, vector<1x80xf32>
    %2 = vector.shape_cast %1 : vector<1x80xf32> to vector<1x80xf32>
    %3 = vector.broadcast %2 : vector<1x80xf32> to vector<64x80xf32>
    %c0_3 = arith.constant 0 : index
    %c0_4 = arith.constant 0 : index
    %4 = vector.load %arg1[%c0_3, %c0_4] : memref<3072x65xbf16, #tpu.memory_space<vmem>>, vector<256x65xbf16>
    %cst = arith.constant dense<0.000000e+00> : vector<256x80xf32>
    %5 = tpu.matmul %4, %0, %cst {dimension_numbers = #tpu.dot_dimension_numbers<[1], [0], [0], [1], [0, 0, 1, 1], [], []>} : vector<256x65xbf16>, vector<65x80xbf16>, vector<256x80xf32> -> vector<256x80xf32>
    %6 = vector.shape_cast %5 : vector<256x80xf32> to vector<4x64x80xf32>
    %cst_5 = arith.constant dense<0xFF800000> : vector<64x80xf32>
    %7 = vector.multi_reduction <maximumf>, %6, %cst_5 [0] : vector<4x64x80xf32> to vector<64x80xf32>
    %8 = arith.addf %7, %3 : vector<64x80xf32>
    %cst_6 = arith.constant 0.000000e+00 : f32
    %9 = vector.broadcast %cst_6 : f32 to vector<64x80xf32>
    %10 = arith.maximumf %8, %9 : vector<64x80xf32>
    %11 = vector.shape_cast %10 : vector<64x80xf32> to vector<8x8x80xf32>
    %c0_7 = arith.constant 0 : index
    %c0_8 = arith.constant 0 : index
    %c0_9 = arith.constant 0 : index
    %c0_10 = arith.constant 0 : index
    %12 = vector.load %arg11[%c0_7, %c0_8, %c0_9, %c0_10] : memref<12x8x8x80xf32, #tpu.memory_space<vmem>>, vector<1x8x8x80xf32>
    %13 = vector.shape_cast %12 : vector<1x8x8x80xf32> to vector<8x8x80xf32>
    %14 = vector.shape_cast %11 : vector<8x8x80xf32> to vector<1x8x8x80xf32>
    tpu.vector_store %arg11[%c0_7, %c0_8, %c0_9, %c0_10], %14 {strides = array<i32>} : memref<12x8x8x80xf32, #tpu.memory_space<vmem>>, vector<1x8x8x80xf32>,
    %c256 = arith.constant 256 : index
    %c0_11 = arith.constant 0 : index
    %15 = vector.load %arg1[%c256, %c0_11] : memref<3072x65xbf16, #tpu.memory_space<vmem>>, vector<256x65xbf16>
    %cst_12 = arith.constant dense<0.000000e+00> : vector<256x80xf32>
    %16 = tpu.matmul %15, %0, %cst_12 {dimension_numbers = #tpu.dot_dimension_numbers<[1], [0], [0], [1], [0, 0, 1, 1], [], []>} : vector<256x65xbf16>, vector<65x80xbf16>, vector<256x80xf32> -> vector<256x80xf32>
    %17 = vector.shape_cast %16 : vector<256x80xf32> to vector<4x64x80xf32>
    %cst_13 = arith.constant dense<0xFF800000> : vector<64x80xf32>
    %18 = vector.multi_reduction <maximumf>, %17, %cst_13 [0] : vector<4x64x80xf32> to vector<64x80xf32>
    %19 = arith.addf %18, %3 : vector<64x80xf32>
    %cst_14 = arith.constant 0.000000e+00 : f32
    %20 = vector.broadcast %cst_14 : f32 to vector<64x80xf32>
    %21 = arith.maximumf %19, %20 : vector<64x80xf32>
    %22 = vector.shape_cast %21 : vector<64x80xf32> to vector<8x8x80xf32>
    %c1 = arith.constant 1 : index
    %c0_15 = arith.constant 0 : index
    %c0_16 = arith.constant 0 : index
    %c0_17 = arith.constant 0 : index
    %23 = vector.load %arg11[%c1, %c0_15, %c0_16, %c0_17] : memref<12x8x8x80xf32, #tpu.memory_space<vmem>>, vector<1x8x8x80xf32>
    %24 = vector.shape_cast %23 : vector<1x8x8x80xf32> to vector<8x8x80xf32>
    %25 = vector.shape_cast %22 : vector<8x8x80xf32> to vector<1x8x8x80xf32>
    tpu.vector_store %arg11[%c1, %c0_15, %c0_16, %c0_17], %25 {strides = array<i32>} : memref<12x8x8x80xf32, #tpu.memory_space<vmem>>, vector<1x8x8x80xf32>,
    %c512 = arith.constant 512 : index
    %c0_18 = arith.constant 0 : index
    %26 = vector.load %arg1[%c512, %c0_18] : memref<3072x65xbf16, #tpu.memory_space<vmem>>, vector<256x65xbf16>
    %cst_19 = arith.constant dense<0.000000e+00> : vector<256x80xf32>
    %27 = tpu.matmul %26, %0, %cst_19 {dimension_numbers = #tpu.dot_dimension_numbers<[1], [0], [0], [1], [0, 0, 1, 1], [], []>} : vector<256x65xbf16>, vector<65x80xbf16>, vector<256x80xf32> -> vector<256x80xf32>
    %28 = vector.shape_cast %27 : vector<256x80xf32> to vector<4x64x80xf32>
    %cst_20 = arith.constant dense<0xFF800000> : vector<64x80xf32>
    %29 = vector.multi_reduction <maximumf>, %28, %cst_20 [0] : vector<4x64x80xf32> to vector<64x80xf32>
    %30 = arith.addf %29, %3 : vector<64x80xf32>
    %cst_21 = arith.constant 0.000000e+00 : f32
    %31 = vector.broadcast %cst_21 : f32 to vector<64x80xf32>
    %32 = arith.maximumf %30, %31 : vector<64x80xf32>
    %33 = vector.shape_cast %32 : vector<64x80xf32> to vector<8x8x80xf32>
    %c2 = arith.constant 2 : index
    %c0_22 = arith.constant 0 : index
    %c0_23 = arith.constant 0 : index
    %c0_24 = arith.constant 0 : index
    %34 = vector.load %arg11[%c2, %c0_22, %c0_23, %c0_24] : memref<12x8x8x80xf32, #tpu.memory_space<vmem>>, vector<1x8x8x80xf32>
    %35 = vector.shape_cast %34 : vector<1x8x8x80xf32> to vector<8x8x80xf32>
    %36 = vector.shape_cast %33 : vector<8x8x80xf32> to vector<1x8x8x80xf32>
    tpu.vector_store %arg11[%c2, %c0_22, %c0_23, %c0_24], %36 {strides = array<i32>} : memref<12x8x8x80xf32, #tpu.memory_space<vmem>>, vector<1x8x8x80xf32>,
    %c768 = arith.constant 768 : index
    %c0_25 = arith.constant 0 : index
    %37 = vector.load %arg1[%c768, %c0_25] : memref<3072x65xbf16, #tpu.memory_space<vmem>>, vector<256x65xbf16>
    %cst_26 = arith.constant dense<0.000000e+00> : vector<256x80xf32>
    %38 = tpu.matmul %37, %0, %cst_26 {dimension_numbers = #tpu.dot_dimension_numbers<[1], [0], [0], [1], [0, 0, 1, 1], [], []>} : vector<256x65xbf16>, vector<65x80xbf16>, vector<256x80xf32> -> vector<256x80xf32>
    %39 = vector.shape_cast %38 : vector<256x80xf32> to vector<4x64x80xf32>
    %cst_27 = arith.constant dense<0xFF800000> : vector<64x80xf32>
    %40 = vector.multi_reduction <maximumf>, %39, %cst_27 [0] : vector<4x64x80xf32> to vector<64x80xf32>
    %41 = arith.addf %40, %3 : vector<64x80xf32>
    %cst_28 = arith.constant 0.000000e+00 : f32
    %42 = vector.broadcast %cst_28 : f32 to vector<64x80xf32>
    %43 = arith.maximumf %41, %42 : vector<64x80xf32>
    %44 = vector.shape_cast %43 : vector<64x80xf32> to vector<8x8x80xf32>
    %c3 = arith.constant 3 : index
    %c0_29 = arith.constant 0 : index
    %c0_30 = arith.constant 0 : index
    %c0_31 = arith.constant 0 : index
    %45 = vector.load %arg11[%c3, %c0_29, %c0_30, %c0_31] : memref<12x8x8x80xf32, #tpu.memory_space<vmem>>, vector<1x8x8x80xf32>
    %46 = vector.shape_cast %45 : vector<1x8x8x80xf32> to vector<8x8x80xf32>
    %47 = vector.shape_cast %44 : vector<8x8x80xf32> to vector<1x8x8x80xf32>
    tpu.vector_store %arg11[%c3, %c0_29, %c0_30, %c0_31], %47 {strides = array<i32>} : memref<12x8x8x80xf32, #tpu.memory_space<vmem>>, vector<1x8x8x80xf32>,
    %c1024 = arith.constant 1024 : index
    %c0_32 = arith.constant 0 : index
    %48 = vector.load %arg1[%c1024, %c0_32] : memref<3072x65xbf16, #tpu.memory_space<vmem>>, vector<256x65xbf16>
    %cst_33 = arith.constant dense<0.000000e+00> : vector<256x80xf32>
    %49 = tpu.matmul %48, %0, %cst_33 {dimension_numbers = #tpu.dot_dimension_numbers<[1], [0], [0], [1], [0, 0, 1, 1], [], []>} : vector<256x65xbf16>, vector<65x80xbf16>, vector<256x80xf32> -> vector<256x80xf32>
    %50 = vector.shape_cast %49 : vector<256x80xf32> to vector<4x64x80xf32>
    %cst_34 = arith.constant dense<0xFF800000> : vector<64x80xf32>
    %51 = vector.multi_reduction <maximumf>, %50, %cst_34 [0] : vector<4x64x80xf32> to vector<64x80xf32>
    %52 = arith.addf %51, %3 : vector<64x80xf32>
    %cst_35 = arith.constant 0.000000e+00 : f32
    %53 = vector.broadcast %cst_35 : f32 to vector<64x80xf32>
    %54 = arith.maximumf %52, %53 : vector<64x80xf32>
    %55 = vector.shape_cast %54 : vector<64x80xf32> to vector<8x8x80xf32>
    %c4 = arith.constant 4 : index
    %c0_36 = arith.constant 0 : index
    %c0_37 = arith.constant 0 : index
    %c0_38 = arith.constant 0 : index
    %56 = vector.load %arg11[%c4, %c0_36, %c0_37, %c0_38] : memref<12x8x8x80xf32, #tpu.memory_space<vmem>>, vector<1x8x8x80xf32>
    %57 = vector.shape_cast %56 : vector<1x8x8x80xf32> to vector<8x8x80xf32>
    %58 = vector.shape_cast %55 : vector<8x8x80xf32> to vector<1x8x8x80xf32>
    tpu.vector_store %arg11[%c4, %c0_36, %c0_37, %c0_38], %58 {strides = array<i32>} : memref<12x8x8x80xf32, #tpu.memory_space<vmem>>, vector<1x8x8x80xf32>,
    %c1280 = arith.constant 1280 : index
    %c0_39 = arith.constant 0 : index
    %59 = vector.load %arg1[%c1280, %c0_39] : memref<3072x65xbf16, #tpu.memory_space<vmem>>, vector<256x65xbf16>
    %cst_40 = arith.constant dense<0.000000e+00> : vector<256x80xf32>
    %60 = tpu.matmul %59, %0, %cst_40 {dimension_numbers = #tpu.dot_dimension_numbers<[1], [0], [0], [1], [0, 0, 1, 1], [], []>} : vector<256x65xbf16>, vector<65x80xbf16>, vector<256x80xf32> -> vector<256x80xf32>
    %61 = vector.shape_cast %60 : vector<256x80xf32> to vector<4x64x80xf32>
    %cst_41 = arith.constant dense<0xFF800000> : vector<64x80xf32>
    %62 = vector.multi_reduction <maximumf>, %61, %cst_41 [0] : vector<4x64x80xf32> to vector<64x80xf32>
    %63 = arith.addf %62, %3 : vector<64x80xf32>
    %cst_42 = arith.constant 0.000000e+00 : f32
    %64 = vector.broadcast %cst_42 : f32 to vector<64x80xf32>
    %65 = arith.maximumf %63, %64 : vector<64x80xf32>
    %66 = vector.shape_cast %65 : vector<64x80xf32> to vector<8x8x80xf32>
    %c5 = arith.constant 5 : index
    %c0_43 = arith.constant 0 : index
    %c0_44 = arith.constant 0 : index
    %c0_45 = arith.constant 0 : index
    %67 = vector.load %arg11[%c5, %c0_43, %c0_44, %c0_45] : memref<12x8x8x80xf32, #tpu.memory_space<vmem>>, vector<1x8x8x80xf32>
    %68 = vector.shape_cast %67 : vector<1x8x8x80xf32> to vector<8x8x80xf32>
    %69 = vector.shape_cast %66 : vector<8x8x80xf32> to vector<1x8x8x80xf32>
    tpu.vector_store %arg11[%c5, %c0_43, %c0_44, %c0_45], %69 {strides = array<i32>} : memref<12x8x8x80xf32, #tpu.memory_space<vmem>>, vector<1x8x8x80xf32>,
    %c1536 = arith.constant 1536 : index
    %c0_46 = arith.constant 0 : index
    %70 = vector.load %arg1[%c1536, %c0_46] : memref<3072x65xbf16, #tpu.memory_space<vmem>>, vector<256x65xbf16>
    %cst_47 = arith.constant dense<0.000000e+00> : vector<256x80xf32>
    %71 = tpu.matmul %70, %0, %cst_47 {dimension_numbers = #tpu.dot_dimension_numbers<[1], [0], [0], [1], [0, 0, 1, 1], [], []>} : vector<256x65xbf16>, vector<65x80xbf16>, vector<256x80xf32> -> vector<256x80xf32>
    %72 = vector.shape_cast %71 : vector<256x80xf32> to vector<4x64x80xf32>
    %cst_48 = arith.constant dense<0xFF800000> : vector<64x80xf32>
    %73 = vector.multi_reduction <maximumf>, %72, %cst_48 [0] : vector<4x64x80xf32> to vector<64x80xf32>
    %74 = arith.addf %73, %3 : vector<64x80xf32>
    %cst_49 = arith.constant 0.000000e+00 : f32
    %75 = vector.broadcast %cst_49 : f32 to vector<64x80xf32>
    %76 = arith.maximumf %74, %75 : vector<64x80xf32>
    %77 = vector.shape_cast %76 : vector<64x80xf32> to vector<8x8x80xf32>
    %c6 = arith.constant 6 : index
    %c0_50 = arith.constant 0 : index
    %c0_51 = arith.constant 0 : index
    %c0_52 = arith.constant 0 : index
    %78 = vector.load %arg11[%c6, %c0_50, %c0_51, %c0_52] : memref<12x8x8x80xf32, #tpu.memory_space<vmem>>, vector<1x8x8x80xf32>
    %79 = vector.shape_cast %78 : vector<1x8x8x80xf32> to vector<8x8x80xf32>
    %80 = vector.shape_cast %77 : vector<8x8x80xf32> to vector<1x8x8x80xf32>
    tpu.vector_store %arg11[%c6, %c0_50, %c0_51, %c0_52], %80 {strides = array<i32>} : memref<12x8x8x80xf32, #tpu.memory_space<vmem>>, vector<1x8x8x80xf32>,
    %c1792 = arith.constant 1792 : index
    %c0_53 = arith.constant 0 : index
    %81 = vector.load %arg1[%c1792, %c0_53] : memref<3072x65xbf16, #tpu.memory_space<vmem>>, vector<256x65xbf16>
    %cst_54 = arith.constant dense<0.000000e+00> : vector<256x80xf32>
    %82 = tpu.matmul %81, %0, %cst_54 {dimension_numbers = #tpu.dot_dimension_numbers<[1], [0], [0], [1], [0, 0, 1, 1], [], []>} : vector<256x65xbf16>, vector<65x80xbf16>, vector<256x80xf32> -> vector<256x80xf32>
    %83 = vector.shape_cast %82 : vector<256x80xf32> to vector<4x64x80xf32>
    %cst_55 = arith.constant dense<0xFF800000> : vector<64x80xf32>
    %84 = vector.multi_reduction <maximumf>, %83, %cst_55 [0] : vector<4x64x80xf32> to vector<64x80xf32>
    %85 = arith.addf %84, %3 : vector<64x80xf32>
    %cst_56 = arith.constant 0.000000e+00 : f32
    %86 = vector.broadcast %cst_56 : f32 to vector<64x80xf32>
    %87 = arith.maximumf %85, %86 : vector<64x80xf32>
    %88 = vector.shape_cast %87 : vector<64x80xf32> to vector<8x8x80xf32>
    %c7 = arith.constant 7 : index
    %c0_57 = arith.constant 0 : index
    %c0_58 = arith.constant 0 : index
    %c0_59 = arith.constant 0 : index
    %89 = vector.load %arg11[%c7, %c0_57, %c0_58, %c0_59] : memref<12x8x8x80xf32, #tpu.memory_space<vmem>>, vector<1x8x8x80xf32>
    %90 = vector.shape_cast %89 : vector<1x8x8x80xf32> to vector<8x8x80xf32>
    %91 = vector.shape_cast %88 : vector<8x8x80xf32> to vector<1x8x8x80xf32>
    tpu.vector_store %arg11[%c7, %c0_57, %c0_58, %c0_59], %91 {strides = array<i32>} : memref<12x8x8x80xf32, #tpu.memory_space<vmem>>, vector<1x8x8x80xf32>,
    %c2048 = arith.constant 2048 : index
    %c0_60 = arith.constant 0 : index
    %92 = vector.load %arg1[%c2048, %c0_60] : memref<3072x65xbf16, #tpu.memory_space<vmem>>, vector<256x65xbf16>
    %cst_61 = arith.constant dense<0.000000e+00> : vector<256x80xf32>
    %93 = tpu.matmul %92, %0, %cst_61 {dimension_numbers = #tpu.dot_dimension_numbers<[1], [0], [0], [1], [0, 0, 1, 1], [], []>} : vector<256x65xbf16>, vector<65x80xbf16>, vector<256x80xf32> -> vector<256x80xf32>
    %94 = vector.shape_cast %93 : vector<256x80xf32> to vector<4x64x80xf32>
    %cst_62 = arith.constant dense<0xFF800000> : vector<64x80xf32>
    %95 = vector.multi_reduction <maximumf>, %94, %cst_62 [0] : vector<4x64x80xf32> to vector<64x80xf32>
    %96 = arith.addf %95, %3 : vector<64x80xf32>
    %cst_63 = arith.constant 0.000000e+00 : f32
    %97 = vector.broadcast %cst_63 : f32 to vector<64x80xf32>
    %98 = arith.maximumf %96, %97 : vector<64x80xf32>
    %99 = vector.shape_cast %98 : vector<64x80xf32> to vector<8x8x80xf32>
    %c8 = arith.constant 8 : index
    %c0_64 = arith.constant 0 : index
    %c0_65 = arith.constant 0 : index
    %c0_66 = arith.constant 0 : index
    %100 = vector.load %arg11[%c8, %c0_64, %c0_65, %c0_66] : memref<12x8x8x80xf32, #tpu.memory_space<vmem>>, vector<1x8x8x80xf32>
    %101 = vector.shape_cast %100 : vector<1x8x8x80xf32> to vector<8x8x80xf32>
    %102 = vector.shape_cast %99 : vector<8x8x80xf32> to vector<1x8x8x80xf32>
    tpu.vector_store %arg11[%c8, %c0_64, %c0_65, %c0_66], %102 {strides = array<i32>} : memref<12x8x8x80xf32, #tpu.memory_space<vmem>>, vector<1x8x8x80xf32>,
    %c2304 = arith.constant 2304 : index
    %c0_67 = arith.constant 0 : index
    %103 = vector.load %arg1[%c2304, %c0_67] : memref<3072x65xbf16, #tpu.memory_space<vmem>>, vector<256x65xbf16>
    %cst_68 = arith.constant dense<0.000000e+00> : vector<256x80xf32>
    %104 = tpu.matmul %103, %0, %cst_68 {dimension_numbers = #tpu.dot_dimension_numbers<[1], [0], [0], [1], [0, 0, 1, 1], [], []>} : vector<256x65xbf16>, vector<65x80xbf16>, vector<256x80xf32> -> vector<256x80xf32>
    %105 = vector.shape_cast %104 : vector<256x80xf32> to vector<4x64x80xf32>
    %cst_69 = arith.constant dense<0xFF800000> : vector<64x80xf32>
    %106 = vector.multi_reduction <maximumf>, %105, %cst_69 [0] : vector<4x64x80xf32> to vector<64x80xf32>
    %107 = arith.addf %106, %3 : vector<64x80xf32>
    %cst_70 = arith.constant 0.000000e+00 : f32
    %108 = vector.broadcast %cst_70 : f32 to vector<64x80xf32>
    %109 = arith.maximumf %107, %108 : vector<64x80xf32>
    %110 = vector.shape_cast %109 : vector<64x80xf32> to vector<8x8x80xf32>
    %c9 = arith.constant 9 : index
    %c0_71 = arith.constant 0 : index
    %c0_72 = arith.constant 0 : index
    %c0_73 = arith.constant 0 : index
    %111 = vector.load %arg11[%c9, %c0_71, %c0_72, %c0_73] : memref<12x8x8x80xf32, #tpu.memory_space<vmem>>, vector<1x8x8x80xf32>
    %112 = vector.shape_cast %111 : vector<1x8x8x80xf32> to vector<8x8x80xf32>
    %113 = vector.shape_cast %110 : vector<8x8x80xf32> to vector<1x8x8x80xf32>
    tpu.vector_store %arg11[%c9, %c0_71, %c0_72, %c0_73], %113 {strides = array<i32>} : memref<12x8x8x80xf32, #tpu.memory_space<vmem>>, vector<1x8x8x80xf32>,
    %c2560 = arith.constant 2560 : index
    %c0_74 = arith.constant 0 : index
    %114 = vector.load %arg1[%c2560, %c0_74] : memref<3072x65xbf16, #tpu.memory_space<vmem>>, vector<256x65xbf16>
    %cst_75 = arith.constant dense<0.000000e+00> : vector<256x80xf32>
    %115 = tpu.matmul %114, %0, %cst_75 {dimension_numbers = #tpu.dot_dimension_numbers<[1], [0], [0], [1], [0, 0, 1, 1], [], []>} : vector<256x65xbf16>, vector<65x80xbf16>, vector<256x80xf32> -> vector<256x80xf32>
    %116 = vector.shape_cast %115 : vector<256x80xf32> to vector<4x64x80xf32>
    %cst_76 = arith.constant dense<0xFF800000> : vector<64x80xf32>
    %117 = vector.multi_reduction <maximumf>, %116, %cst_76 [0] : vector<4x64x80xf32> to vector<64x80xf32>
    %118 = arith.addf %117, %3 : vector<64x80xf32>
    %cst_77 = arith.constant 0.000000e+00 : f32
    %119 = vector.broadcast %cst_77 : f32 to vector<64x80xf32>
    %120 = arith.maximumf %118, %119 : vector<64x80xf32>
    %121 = vector.shape_cast %120 : vector<64x80xf32> to vector<8x8x80xf32>
    %c10 = arith.constant 10 : index
    %c0_78 = arith.constant 0 : index
    %c0_79 = arith.constant 0 : index
    %c0_80 = arith.constant 0 : index
    %122 = vector.load %arg11[%c10, %c0_78, %c0_79, %c0_80] : memref<12x8x8x80xf32, #tpu.memory_space<vmem>>, vector<1x8x8x80xf32>
    %123 = vector.shape_cast %122 : vector<1x8x8x80xf32> to vector<8x8x80xf32>
    %124 = vector.shape_cast %121 : vector<8x8x80xf32> to vector<1x8x8x80xf32>
    tpu.vector_store %arg11[%c10, %c0_78, %c0_79, %c0_80], %124 {strides = array<i32>} : memref<12x8x8x80xf32, #tpu.memory_space<vmem>>, vector<1x8x8x80xf32>,
    %c2816 = arith.constant 2816 : index
    %c0_81 = arith.constant 0 : index
    %125 = vector.load %arg1[%c2816, %c0_81] : memref<3072x65xbf16, #tpu.memory_space<vmem>>, vector<256x65xbf16>
    %cst_82 = arith.constant dense<0.000000e+00> : vector<256x80xf32>
    %126 = tpu.matmul %125, %0, %cst_82 {dimension_numbers = #tpu.dot_dimension_numbers<[1], [0], [0], [1], [0, 0, 1, 1], [], []>} : vector<256x65xbf16>, vector<65x80xbf16>, vector<256x80xf32> -> vector<256x80xf32>
    %127 = vector.shape_cast %126 : vector<256x80xf32> to vector<4x64x80xf32>
    %cst_83 = arith.constant dense<0xFF800000> : vector<64x80xf32>
    %128 = vector.multi_reduction <maximumf>, %127, %cst_83 [0] : vector<4x64x80xf32> to vector<64x80xf32>
    %129 = arith.addf %128, %3 : vector<64x80xf32>
    %cst_84 = arith.constant 0.000000e+00 : f32
    %130 = vector.broadcast %cst_84 : f32 to vector<64x80xf32>
    %131 = arith.maximumf %129, %130 : vector<64x80xf32>
    %132 = vector.shape_cast %131 : vector<64x80xf32> to vector<8x8x80xf32>
    %c11 = arith.constant 11 : index
    %c0_85 = arith.constant 0 : index
    %c0_86 = arith.constant 0 : index
    %c0_87 = arith.constant 0 : index
    %133 = vector.load %arg11[%c11, %c0_85, %c0_86, %c0_87] : memref<12x8x8x80xf32, #tpu.memory_space<vmem>>, vector<1x8x8x80xf32>
    %134 = vector.shape_cast %133 : vector<1x8x8x80xf32> to vector<8x8x80xf32>
    %135 = vector.shape_cast %132 : vector<8x8x80xf32> to vector<1x8x8x80xf32>
    tpu.vector_store %arg11[%c11, %c0_85, %c0_86, %c0_87], %135 {strides = array<i32>} : memref<12x8x8x80xf32, #tpu.memory_space<vmem>>, vector<1x8x8x80xf32>,
    %c0_88 = arith.constant 0 : index
    %c0_89 = arith.constant 0 : index
    %136 = vector.load %arg5[%c0_88, %c0_89] : memref<1x32xf32, #tpu.memory_space<vmem>>, vector<1x32xf32>
    %137 = vector.shape_cast %136 : vector<1x32xf32> to vector<1x32xf32>
    %138 = vector.broadcast %137 : vector<1x32xf32> to vector<128x32xf32>
    %c0_90 = arith.constant 0 : index
    %c0_91 = arith.constant 0 : index
    %c0_92 = arith.constant 0 : index
    %c0_93 = arith.constant 0 : index
    %139 = vector.load %arg11[%c0_90, %c0_91, %c0_92, %c0_93] : memref<12x8x8x80xf32, #tpu.memory_space<vmem>>, vector<2x8x8x80xf32>
    %140 = vector.shape_cast %139 : vector<2x8x8x80xf32> to vector<128x80xf32>
    %c0_94 = arith.constant 0 : index
    %c0_95 = arith.constant 0 : index
    %c0_96 = arith.constant 0 : index
    %141 = vector.load %arg4[%c0_94, %c0_95, %c0_96] : memref<5x80x32xf32, #tpu.memory_space<vmem>>, vector<1x80x32xf32>
    %142 = vector.shape_cast %141 : vector<1x80x32xf32> to vector<80x32xf32>
    %cst_97 = arith.constant dense<0.000000e+00> : vector<128x32xf32>
    %143 = tpu.matmul %140, %142, %cst_97 {dimension_numbers = #tpu.dot_dimension_numbers<[1], [0], [0], [1], [0, 0, 1, 1], [], []>} : vector<128x80xf32>, vector<80x32xf32>, vector<128x32xf32> -> vector<128x32xf32>
    %144 = arith.addf %138, %143 : vector<128x32xf32>
    %c1_98 = arith.constant 1 : index
    %c0_99 = arith.constant 0 : index
    %c0_100 = arith.constant 0 : index
    %c0_101 = arith.constant 0 : index
    %145 = vector.load %arg11[%c1_98, %c0_99, %c0_100, %c0_101] : memref<12x8x8x80xf32, #tpu.memory_space<vmem>>, vector<2x8x8x80xf32>
    %146 = vector.shape_cast %145 : vector<2x8x8x80xf32> to vector<128x80xf32>
    %c1_102 = arith.constant 1 : index
    %c0_103 = arith.constant 0 : index
    %c0_104 = arith.constant 0 : index
    %147 = vector.load %arg4[%c1_102, %c0_103, %c0_104] : memref<5x80x32xf32, #tpu.memory_space<vmem>>, vector<1x80x32xf32>
    %148 = vector.shape_cast %147 : vector<1x80x32xf32> to vector<80x32xf32>
    %cst_105 = arith.constant dense<0.000000e+00> : vector<128x32xf32>
    %149 = tpu.matmul %146, %148, %cst_105 {dimension_numbers = #tpu.dot_dimension_numbers<[1], [0], [0], [1], [0, 0, 1, 1], [], []>} : vector<128x80xf32>, vector<80x32xf32>, vector<128x32xf32> -> vector<128x32xf32>
    %150 = arith.addf %144, %149 : vector<128x32xf32>
    %c2_106 = arith.constant 2 : index
    %c0_107 = arith.constant 0 : index
    %c0_108 = arith.constant 0 : index
    %c0_109 = arith.constant 0 : index
    %151 = vector.load %arg11[%c2_106, %c0_107, %c0_108, %c0_109] : memref<12x8x8x80xf32, #tpu.memory_space<vmem>>, vector<2x8x8x80xf32>
    %152 = vector.shape_cast %151 : vector<2x8x8x80xf32> to vector<128x80xf32>
    %c2_110 = arith.constant 2 : index
    %c0_111 = arith.constant 0 : index
    %c0_112 = arith.constant 0 : index
    %153 = vector.load %arg4[%c2_110, %c0_111, %c0_112] : memref<5x80x32xf32, #tpu.memory_space<vmem>>, vector<1x80x32xf32>
    %154 = vector.shape_cast %153 : vector<1x80x32xf32> to vector<80x32xf32>
    %cst_113 = arith.constant dense<0.000000e+00> : vector<128x32xf32>
    %155 = tpu.matmul %152, %154, %cst_113 {dimension_numbers = #tpu.dot_dimension_numbers<[1], [0], [0], [1], [0, 0, 1, 1], [], []>} : vector<128x80xf32>, vector<80x32xf32>, vector<128x32xf32> -> vector<128x32xf32>
    %156 = arith.addf %150, %155 : vector<128x32xf32>
    %c3_114 = arith.constant 3 : index
    %c0_115 = arith.constant 0 : index
    %c0_116 = arith.constant 0 : index
    %c0_117 = arith.constant 0 : index
    %157 = vector.load %arg11[%c3_114, %c0_115, %c0_116, %c0_117] : memref<12x8x8x80xf32, #tpu.memory_space<vmem>>, vector<2x8x8x80xf32>
    %158 = vector.shape_cast %157 : vector<2x8x8x80xf32> to vector<128x80xf32>
    %c3_118 = arith.constant 3 : index
    %c0_119 = arith.constant 0 : index
    %c0_120 = arith.constant 0 : index
    %159 = vector.load %arg4[%c3_118, %c0_119, %c0_120] : memref<5x80x32xf32, #tpu.memory_space<vmem>>, vector<1x80x32xf32>
    %160 = vector.shape_cast %159 : vector<1x80x32xf32> to vector<80x32xf32>
    %cst_121 = arith.constant dense<0.000000e+00> : vector<128x32xf32>
    %161 = tpu.matmul %158, %160, %cst_121 {dimension_numbers = #tpu.dot_dimension_numbers<[1], [0], [0], [1], [0, 0, 1, 1], [], []>} : vector<128x80xf32>, vector<80x32xf32>, vector<128x32xf32> -> vector<128x32xf32>
    %162 = arith.addf %156, %161 : vector<128x32xf32>
    %c4_122 = arith.constant 4 : index
    %c0_123 = arith.constant 0 : index
    %c0_124 = arith.constant 0 : index
    %c0_125 = arith.constant 0 : index
    %163 = vector.load %arg11[%c4_122, %c0_123, %c0_124, %c0_125] : memref<12x8x8x80xf32, #tpu.memory_space<vmem>>, vector<2x8x8x80xf32>
    %164 = vector.shape_cast %163 : vector<2x8x8x80xf32> to vector<128x80xf32>
    %c4_126 = arith.constant 4 : index
    %c0_127 = arith.constant 0 : index
    %c0_128 = arith.constant 0 : index
    %165 = vector.load %arg4[%c4_126, %c0_127, %c0_128] : memref<5x80x32xf32, #tpu.memory_space<vmem>>, vector<1x80x32xf32>
    %166 = vector.shape_cast %165 : vector<1x80x32xf32> to vector<80x32xf32>
    %cst_129 = arith.constant dense<0.000000e+00> : vector<128x32xf32>
    %167 = tpu.matmul %164, %166, %cst_129 {dimension_numbers = #tpu.dot_dimension_numbers<[1], [0], [0], [1], [0, 0, 1, 1], [], []>} : vector<128x80xf32>, vector<80x32xf32>, vector<128x32xf32> -> vector<128x32xf32>
    %168 = arith.addf %162, %167 : vector<128x32xf32>
    %169 = vector.shape_cast %168 : vector<128x32xf32> to vector<2x4x2x8x32xf32>
    %cst_130 = arith.constant dense<0xFF800000> : vector<2x4x8x32xf32>
    %170 = vector.multi_reduction <maximumf>, %169, %cst_130 [2] : vector<2x4x2x8x32xf32> to vector<2x4x8x32xf32>
    %cst_131 = arith.constant dense<0xFF800000> : vector<4x8x32xf32>
    %171 = vector.multi_reduction <maximumf>, %170, %cst_131 [0] : vector<2x4x8x32xf32> to vector<4x8x32xf32>
    %cst_132 = arith.constant 0.000000e+00 : f32
    %172 = vector.broadcast %cst_132 : f32 to vector<4x8x32xf32>
    %173 = arith.maximumf %171, %172 : vector<4x8x32xf32>
    %174 = vector.extract_strided_slice %173 {offsets = [0, 0, 0], sizes = [1, 8, 32], strides = [1, 1, 1]} : vector<4x8x32xf32> to vector<1x8x32xf32>
    %175 = vector.shape_cast %174 : vector<1x8x32xf32> to vector<8x32xf32>
    %176 = vector.extract_strided_slice %173 {offsets = [1, 0, 0], sizes = [1, 8, 32], strides = [1, 1, 1]} : vector<4x8x32xf32> to vector<1x8x32xf32>
    %177 = vector.shape_cast %176 : vector<1x8x32xf32> to vector<8x32xf32>
    %178 = vector.extract_strided_slice %173 {offsets = [2, 0, 0], sizes = [1, 8, 32], strides = [1, 1, 1]} : vector<4x8x32xf32> to vector<1x8x32xf32>
    %179 = vector.shape_cast %178 : vector<1x8x32xf32> to vector<8x32xf32>
    %180 = vector.extract_strided_slice %173 {offsets = [3, 0, 0], sizes = [1, 8, 32], strides = [1, 1, 1]} : vector<4x8x32xf32> to vector<1x8x32xf32>
    %181 = vector.shape_cast %180 : vector<1x8x32xf32> to vector<8x32xf32>
    %182 = tpu.concatenate %175, %177, %179, %181 in 1 : vector<8x32xf32>, vector<8x32xf32>, vector<8x32xf32>, vector<8x32xf32> -> vector<8x128xf32>
    %c0_133 = arith.constant 0 : index
    %c0_134 = arith.constant 0 : index
    %183 = vector.load %arg12[%c0_133, %c0_134] : memref<8x512xf32, #tpu.memory_space<vmem>>, vector<8x128xf32>
    tpu.vector_store %arg12[%c0_133, %c0_134], %182 {strides = array<i32>} : memref<8x512xf32, #tpu.memory_space<vmem>>, vector<8x128xf32>,
    %c2_135 = arith.constant 2 : index
    %c0_136 = arith.constant 0 : index
    %c0_137 = arith.constant 0 : index
    %c0_138 = arith.constant 0 : index
    %184 = vector.load %arg11[%c2_135, %c0_136, %c0_137, %c0_138] : memref<12x8x8x80xf32, #tpu.memory_space<vmem>>, vector<2x8x8x80xf32>
    %185 = vector.shape_cast %184 : vector<2x8x8x80xf32> to vector<128x80xf32>
    %c0_139 = arith.constant 0 : index
    %c0_140 = arith.constant 0 : index
    %c0_141 = arith.constant 0 : index
    %186 = vector.load %arg4[%c0_139, %c0_140, %c0_141] : memref<5x80x32xf32, #tpu.memory_space<vmem>>, vector<1x80x32xf32>
    %187 = vector.shape_cast %186 : vector<1x80x32xf32> to vector<80x32xf32>
    %cst_142 = arith.constant dense<0.000000e+00> : vector<128x32xf32>
    %188 = tpu.matmul %185, %187, %cst_142 {dimension_numbers = #tpu.dot_dimension_numbers<[1], [0], [0], [1], [0, 0, 1, 1], [], []>} : vector<128x80xf32>, vector<80x32xf32>, vector<128x32xf32> -> vector<128x32xf32>
    %189 = arith.addf %138, %188 : vector<128x32xf32>
    %c3_143 = arith.constant 3 : index
    %c0_144 = arith.constant 0 : index
    %c0_145 = arith.constant 0 : index
    %c0_146 = arith.constant 0 : index
    %190 = vector.load %arg11[%c3_143, %c0_144, %c0_145, %c0_146] : memref<12x8x8x80xf32, #tpu.memory_space<vmem>>, vector<2x8x8x80xf32>
    %191 = vector.shape_cast %190 : vector<2x8x8x80xf32> to vector<128x80xf32>
    %c1_147 = arith.constant 1 : index
    %c0_148 = arith.constant 0 : index
    %c0_149 = arith.constant 0 : index
    %192 = vector.load %arg4[%c1_147, %c0_148, %c0_149] : memref<5x80x32xf32, #tpu.memory_space<vmem>>, vector<1x80x32xf32>
    %193 = vector.shape_cast %192 : vector<1x80x32xf32> to vector<80x32xf32>
    %cst_150 = arith.constant dense<0.000000e+00> : vector<128x32xf32>
    %194 = tpu.matmul %191, %193, %cst_150 {dimension_numbers = #tpu.dot_dimension_numbers<[1], [0], [0], [1], [0, 0, 1, 1], [], []>} : vector<128x80xf32>, vector<80x32xf32>, vector<128x32xf32> -> vector<128x32xf32>
    %195 = arith.addf %189, %194 : vector<128x32xf32>
    %c4_151 = arith.constant 4 : index
    %c0_152 = arith.constant 0 : index
    %c0_153 = arith.constant 0 : index
    %c0_154 = arith.constant 0 : index
    %196 = vector.load %arg11[%c4_151, %c0_152, %c0_153, %c0_154] : memref<12x8x8x80xf32, #tpu.memory_space<vmem>>, vector<2x8x8x80xf32>
    %197 = vector.shape_cast %196 : vector<2x8x8x80xf32> to vector<128x80xf32>
    %c2_155 = arith.constant 2 : index
    %c0_156 = arith.constant 0 : index
    %c0_157 = arith.constant 0 : index
    %198 = vector.load %arg4[%c2_155, %c0_156, %c0_157] : memref<5x80x32xf32, #tpu.memory_space<vmem>>, vector<1x80x32xf32>
    %199 = vector.shape_cast %198 : vector<1x80x32xf32> to vector<80x32xf32>
    %cst_158 = arith.constant dense<0.000000e+00> : vector<128x32xf32>
    %200 = tpu.matmul %197, %199, %cst_158 {dimension_numbers = #tpu.dot_dimension_numbers<[1], [0], [0], [1], [0, 0, 1, 1], [], []>} : vector<128x80xf32>, vector<80x32xf32>, vector<128x32xf32> -> vector<128x32xf32>
    %201 = arith.addf %195, %200 : vector<128x32xf32>
    %c5_159 = arith.constant 5 : index
    %c0_160 = arith.constant 0 : index
    %c0_161 = arith.constant 0 : index
    %c0_162 = arith.constant 0 : index
    %202 = vector.load %arg11[%c5_159, %c0_160, %c0_161, %c0_162] : memref<12x8x8x80xf32, #tpu.memory_space<vmem>>, vector<2x8x8x80xf32>
    %203 = vector.shape_cast %202 : vector<2x8x8x80xf32> to vector<128x80xf32>
    %c3_163 = arith.constant 3 : index
    %c0_164 = arith.constant 0 : index
    %c0_165 = arith.constant 0 : index
    %204 = vector.load %arg4[%c3_163, %c0_164, %c0_165] : memref<5x80x32xf32, #tpu.memory_space<vmem>>, vector<1x80x32xf32>
    %205 = vector.shape_cast %204 : vector<1x80x32xf32> to vector<80x32xf32>
    %cst_166 = arith.constant dense<0.000000e+00> : vector<128x32xf32>
    %206 = tpu.matmul %203, %205, %cst_166 {dimension_numbers = #tpu.dot_dimension_numbers<[1], [0], [0], [1], [0, 0, 1, 1], [], []>} : vector<128x80xf32>, vector<80x32xf32>, vector<128x32xf32> -> vector<128x32xf32>
    %207 = arith.addf %201, %206 : vector<128x32xf32>
    %c6_167 = arith.constant 6 : index
    %c0_168 = arith.constant 0 : index
    %c0_169 = arith.constant 0 : index
    %c0_170 = arith.constant 0 : index
    %208 = vector.load %arg11[%c6_167, %c0_168, %c0_169, %c0_170] : memref<12x8x8x80xf32, #tpu.memory_space<vmem>>, vector<2x8x8x80xf32>
    %209 = vector.shape_cast %208 : vector<2x8x8x80xf32> to vector<128x80xf32>
    %c4_171 = arith.constant 4 : index
    %c0_172 = arith.constant 0 : index
    %c0_173 = arith.constant 0 : index
    %210 = vector.load %arg4[%c4_171, %c0_172, %c0_173] : memref<5x80x32xf32, #tpu.memory_space<vmem>>, vector<1x80x32xf32>
    %211 = vector.shape_cast %210 : vector<1x80x32xf32> to vector<80x32xf32>
    %cst_174 = arith.constant dense<0.000000e+00> : vector<128x32xf32>
    %212 = tpu.matmul %209, %211, %cst_174 {dimension_numbers = #tpu.dot_dimension_numbers<[1], [0], [0], [1], [0, 0, 1, 1], [], []>} : vector<128x80xf32>, vector<80x32xf32>, vector<128x32xf32> -> vector<128x32xf32>
    %213 = arith.addf %207, %212 : vector<128x32xf32>
    %214 = vector.shape_cast %213 : vector<128x32xf32> to vector<2x4x2x8x32xf32>
    %cst_175 = arith.constant dense<0xFF800000> : vector<2x4x8x32xf32>
    %215 = vector.multi_reduction <maximumf>, %214, %cst_175 [2] : vector<2x4x2x8x32xf32> to vector<2x4x8x32xf32>
    %cst_176 = arith.constant dense<0xFF800000> : vector<4x8x32xf32>
    %216 = vector.multi_reduction <maximumf>, %215, %cst_176 [0] : vector<2x4x8x32xf32> to vector<4x8x32xf32>
    %cst_177 = arith.constant 0.000000e+00 : f32
    %217 = vector.broadcast %cst_177 : f32 to vector<4x8x32xf32>
    %218 = arith.maximumf %216, %217 : vector<4x8x32xf32>
    %219 = vector.extract_strided_slice %218 {offsets = [0, 0, 0], sizes = [1, 8, 32], strides = [1, 1, 1]} : vector<4x8x32xf32> to vector<1x8x32xf32>
    %220 = vector.shape_cast %219 : vector<1x8x32xf32> to vector<8x32xf32>
    %221 = vector.extract_strided_slice %218 {offsets = [1, 0, 0], sizes = [1, 8, 32], strides = [1, 1, 1]} : vector<4x8x32xf32> to vector<1x8x32xf32>
    %222 = vector.shape_cast %221 : vector<1x8x32xf32> to vector<8x32xf32>
    %223 = vector.extract_strided_slice %218 {offsets = [2, 0, 0], sizes = [1, 8, 32], strides = [1, 1, 1]} : vector<4x8x32xf32> to vector<1x8x32xf32>
    %224 = vector.shape_cast %223 : vector<1x8x32xf32> to vector<8x32xf32>
    %225 = vector.extract_strided_slice %218 {offsets = [3, 0, 0], sizes = [1, 8, 32], strides = [1, 1, 1]} : vector<4x8x32xf32> to vector<1x8x32xf32>
    %226 = vector.shape_cast %225 : vector<1x8x32xf32> to vector<8x32xf32>
    %227 = tpu.concatenate %220, %222, %224, %226 in 1 : vector<8x32xf32>, vector<8x32xf32>, vector<8x32xf32>, vector<8x32xf32> -> vector<8x128xf32>
    %c0_178 = arith.constant 0 : index
    %c128 = arith.constant 128 : index
    %228 = vector.load %arg12[%c0_178, %c128] : memref<8x512xf32, #tpu.memory_space<vmem>>, vector<8x128xf32>
    tpu.vector_store %arg12[%c0_178, %c128], %227 {strides = array<i32>} : memref<8x512xf32, #tpu.memory_space<vmem>>, vector<8x128xf32>,
    %c4_179 = arith.constant 4 : index
    %c0_180 = arith.constant 0 : index
    %c0_181 = arith.constant 0 : index
    %c0_182 = arith.constant 0 : index
    %229 = vector.load %arg11[%c4_179, %c0_180, %c0_181, %c0_182] : memref<12x8x8x80xf32, #tpu.memory_space<vmem>>, vector<2x8x8x80xf32>
    %230 = vector.shape_cast %229 : vector<2x8x8x80xf32> to vector<128x80xf32>
    %c0_183 = arith.constant 0 : index
    %c0_184 = arith.constant 0 : index
    %c0_185 = arith.constant 0 : index
    %231 = vector.load %arg4[%c0_183, %c0_184, %c0_185] : memref<5x80x32xf32, #tpu.memory_space<vmem>>, vector<1x80x32xf32>
    %232 = vector.shape_cast %231 : vector<1x80x32xf32> to vector<80x32xf32>
    %cst_186 = arith.constant dense<0.000000e+00> : vector<128x32xf32>
    %233 = tpu.matmul %230, %232, %cst_186 {dimension_numbers = #tpu.dot_dimension_numbers<[1], [0], [0], [1], [0, 0, 1, 1], [], []>} : vector<128x80xf32>, vector<80x32xf32>, vector<128x32xf32> -> vector<128x32xf32>
    %234 = arith.addf %138, %233 : vector<128x32xf32>
    %c5_187 = arith.constant 5 : index
    %c0_188 = arith.constant 0 : index
    %c0_189 = arith.constant 0 : index
    %c0_190 = arith.constant 0 : index
    %235 = vector.load %arg11[%c5_187, %c0_188, %c0_189, %c0_190] : memref<12x8x8x80xf32, #tpu.memory_space<vmem>>, vector<2x8x8x80xf32>
    %236 = vector.shape_cast %235 : vector<2x8x8x80xf32> to vector<128x80xf32>
    %c1_191 = arith.constant 1 : index
    %c0_192 = arith.constant 0 : index
    %c0_193 = arith.constant 0 : index
    %237 = vector.load %arg4[%c1_191, %c0_192, %c0_193] : memref<5x80x32xf32, #tpu.memory_space<vmem>>, vector<1x80x32xf32>
    %238 = vector.shape_cast %237 : vector<1x80x32xf32> to vector<80x32xf32>
    %cst_194 = arith.constant dense<0.000000e+00> : vector<128x32xf32>
    %239 = tpu.matmul %236, %238, %cst_194 {dimension_numbers = #tpu.dot_dimension_numbers<[1], [0], [0], [1], [0, 0, 1, 1], [], []>} : vector<128x80xf32>, vector<80x32xf32>, vector<128x32xf32> -> vector<128x32xf32>
    %240 = arith.addf %234, %239 : vector<128x32xf32>
    %c6_195 = arith.constant 6 : index
    %c0_196 = arith.constant 0 : index
    %c0_197 = arith.constant 0 : index
    %c0_198 = arith.constant 0 : index
    %241 = vector.load %arg11[%c6_195, %c0_196, %c0_197, %c0_198] : memref<12x8x8x80xf32, #tpu.memory_space<vmem>>, vector<2x8x8x80xf32>
    %242 = vector.shape_cast %241 : vector<2x8x8x80xf32> to vector<128x80xf32>
    %c2_199 = arith.constant 2 : index
    %c0_200 = arith.constant 0 : index
    %c0_201 = arith.constant 0 : index
    %243 = vector.load %arg4[%c2_199, %c0_200, %c0_201] : memref<5x80x32xf32, #tpu.memory_space<vmem>>, vector<1x80x32xf32>
    %244 = vector.shape_cast %243 : vector<1x80x32xf32> to vector<80x32xf32>
    %cst_202 = arith.constant dense<0.000000e+00> : vector<128x32xf32>
    %245 = tpu.matmul %242, %244, %cst_202 {dimension_numbers = #tpu.dot_dimension_numbers<[1], [0], [0], [1], [0, 0, 1, 1], [], []>} : vector<128x80xf32>, vector<80x32xf32>, vector<128x32xf32> -> vector<128x32xf32>
    %246 = arith.addf %240, %245 : vector<128x32xf32>
    %c7_203 = arith.constant 7 : index
    %c0_204 = arith.constant 0 : index
    %c0_205 = arith.constant 0 : index
    %c0_206 = arith.constant 0 : index
    %247 = vector.load %arg11[%c7_203, %c0_204, %c0_205, %c0_206] : memref<12x8x8x80xf32, #tpu.memory_space<vmem>>, vector<2x8x8x80xf32>
    %248 = vector.shape_cast %247 : vector<2x8x8x80xf32> to vector<128x80xf32>
    %c3_207 = arith.constant 3 : index
    %c0_208 = arith.constant 0 : index
    %c0_209 = arith.constant 0 : index
    %249 = vector.load %arg4[%c3_207, %c0_208, %c0_209] : memref<5x80x32xf32, #tpu.memory_space<vmem>>, vector<1x80x32xf32>
    %250 = vector.shape_cast %249 : vector<1x80x32xf32> to vector<80x32xf32>
    %cst_210 = arith.constant dense<0.000000e+00> : vector<128x32xf32>
    %251 = tpu.matmul %248, %250, %cst_210 {dimension_numbers = #tpu.dot_dimension_numbers<[1], [0], [0], [1], [0, 0, 1, 1], [], []>} : vector<128x80xf32>, vector<80x32xf32>, vector<128x32xf32> -> vector<128x32xf32>
    %252 = arith.addf %246, %251 : vector<128x32xf32>
    %c8_211 = arith.constant 8 : index
    %c0_212 = arith.constant 0 : index
    %c0_213 = arith.constant 0 : index
    %c0_214 = arith.constant 0 : index
    %253 = vector.load %arg11[%c8_211, %c0_212, %c0_213, %c0_214] : memref<12x8x8x80xf32, #tpu.memory_space<vmem>>, vector<2x8x8x80xf32>
    %254 = vector.shape_cast %253 : vector<2x8x8x80xf32> to vector<128x80xf32>
    %c4_215 = arith.constant 4 : index
    %c0_216 = arith.constant 0 : index
    %c0_217 = arith.constant 0 : index
    %255 = vector.load %arg4[%c4_215, %c0_216, %c0_217] : memref<5x80x32xf32, #tpu.memory_space<vmem>>, vector<1x80x32xf32>
    %256 = vector.shape_cast %255 : vector<1x80x32xf32> to vector<80x32xf32>
    %cst_218 = arith.constant dense<0.000000e+00> : vector<128x32xf32>
    %257 = tpu.matmul %254, %256, %cst_218 {dimension_numbers = #tpu.dot_dimension_numbers<[1], [0], [0], [1], [0, 0, 1, 1], [], []>} : vector<128x80xf32>, vector<80x32xf32>, vector<128x32xf32> -> vector<128x32xf32>
    %258 = arith.addf %252, %257 : vector<128x32xf32>
    %259 = vector.shape_cast %258 : vector<128x32xf32> to vector<2x4x2x8x32xf32>
    %cst_219 = arith.constant dense<0xFF800000> : vector<2x4x8x32xf32>
    %260 = vector.multi_reduction <maximumf>, %259, %cst_219 [2] : vector<2x4x2x8x32xf32> to vector<2x4x8x32xf32>
    %cst_220 = arith.constant dense<0xFF800000> : vector<4x8x32xf32>
    %261 = vector.multi_reduction <maximumf>, %260, %cst_220 [0] : vector<2x4x8x32xf32> to vector<4x8x32xf32>
    %cst_221 = arith.constant 0.000000e+00 : f32
    %262 = vector.broadcast %cst_221 : f32 to vector<4x8x32xf32>
    %263 = arith.maximumf %261, %262 : vector<4x8x32xf32>
    %264 = vector.extract_strided_slice %263 {offsets = [0, 0, 0], sizes = [1, 8, 32], strides = [1, 1, 1]} : vector<4x8x32xf32> to vector<1x8x32xf32>
    %265 = vector.shape_cast %264 : vector<1x8x32xf32> to vector<8x32xf32>
    %266 = vector.extract_strided_slice %263 {offsets = [1, 0, 0], sizes = [1, 8, 32], strides = [1, 1, 1]} : vector<4x8x32xf32> to vector<1x8x32xf32>
    %267 = vector.shape_cast %266 : vector<1x8x32xf32> to vector<8x32xf32>
    %268 = vector.extract_strided_slice %263 {offsets = [2, 0, 0], sizes = [1, 8, 32], strides = [1, 1, 1]} : vector<4x8x32xf32> to vector<1x8x32xf32>
    %269 = vector.shape_cast %268 : vector<1x8x32xf32> to vector<8x32xf32>
    %270 = vector.extract_strided_slice %263 {offsets = [3, 0, 0], sizes = [1, 8, 32], strides = [1, 1, 1]} : vector<4x8x32xf32> to vector<1x8x32xf32>
    %271 = vector.shape_cast %270 : vector<1x8x32xf32> to vector<8x32xf32>
    %272 = tpu.concatenate %265, %267, %269, %271 in 1 : vector<8x32xf32>, vector<8x32xf32>, vector<8x32xf32>, vector<8x32xf32> -> vector<8x128xf32>
    %c0_222 = arith.constant 0 : index
    %c256_223 = arith.constant 256 : index
    %273 = vector.load %arg12[%c0_222, %c256_223] : memref<8x512xf32, #tpu.memory_space<vmem>>, vector<8x128xf32>
    tpu.vector_store %arg12[%c0_222, %c256_223], %272 {strides = array<i32>} : memref<8x512xf32, #tpu.memory_space<vmem>>, vector<8x128xf32>,
    %c6_224 = arith.constant 6 : index
    %c0_225 = arith.constant 0 : index
    %c0_226 = arith.constant 0 : index
    %c0_227 = arith.constant 0 : index
    %274 = vector.load %arg11[%c6_224, %c0_225, %c0_226, %c0_227] : memref<12x8x8x80xf32, #tpu.memory_space<vmem>>, vector<2x8x8x80xf32>
    %275 = vector.shape_cast %274 : vector<2x8x8x80xf32> to vector<128x80xf32>
    %c0_228 = arith.constant 0 : index
    %c0_229 = arith.constant 0 : index
    %c0_230 = arith.constant 0 : index
    %276 = vector.load %arg4[%c0_228, %c0_229, %c0_230] : memref<5x80x32xf32, #tpu.memory_space<vmem>>, vector<1x80x32xf32>
    %277 = vector.shape_cast %276 : vector<1x80x32xf32> to vector<80x32xf32>
    %cst_231 = arith.constant dense<0.000000e+00> : vector<128x32xf32>
    %278 = tpu.matmul %275, %277, %cst_231 {dimension_numbers = #tpu.dot_dimension_numbers<[1], [0], [0], [1], [0, 0, 1, 1], [], []>} : vector<128x80xf32>, vector<80x32xf32>, vector<128x32xf32> -> vector<128x32xf32>
    %279 = arith.addf %138, %278 : vector<128x32xf32>
    %c7_232 = arith.constant 7 : index
    %c0_233 = arith.constant 0 : index
    %c0_234 = arith.constant 0 : index
    %c0_235 = arith.constant 0 : index
    %280 = vector.load %arg11[%c7_232, %c0_233, %c0_234, %c0_235] : memref<12x8x8x80xf32, #tpu.memory_space<vmem>>, vector<2x8x8x80xf32>
    %281 = vector.shape_cast %280 : vector<2x8x8x80xf32> to vector<128x80xf32>
    %c1_236 = arith.constant 1 : index
    %c0_237 = arith.constant 0 : index
    %c0_238 = arith.constant 0 : index
    %282 = vector.load %arg4[%c1_236, %c0_237, %c0_238] : memref<5x80x32xf32, #tpu.memory_space<vmem>>, vector<1x80x32xf32>
    %283 = vector.shape_cast %282 : vector<1x80x32xf32> to vector<80x32xf32>
    %cst_239 = arith.constant dense<0.000000e+00> : vector<128x32xf32>
    %284 = tpu.matmul %281, %283, %cst_239 {dimension_numbers = #tpu.dot_dimension_numbers<[1], [0], [0], [1], [0, 0, 1, 1], [], []>} : vector<128x80xf32>, vector<80x32xf32>, vector<128x32xf32> -> vector<128x32xf32>
    %285 = arith.addf %279, %284 : vector<128x32xf32>
    %c8_240 = arith.constant 8 : index
    %c0_241 = arith.constant 0 : index
    %c0_242 = arith.constant 0 : index
    %c0_243 = arith.constant 0 : index
    %286 = vector.load %arg11[%c8_240, %c0_241, %c0_242, %c0_243] : memref<12x8x8x80xf32, #tpu.memory_space<vmem>>, vector<2x8x8x80xf32>
    %287 = vector.shape_cast %286 : vector<2x8x8x80xf32> to vector<128x80xf32>
    %c2_244 = arith.constant 2 : index
    %c0_245 = arith.constant 0 : index
    %c0_246 = arith.constant 0 : index
    %288 = vector.load %arg4[%c2_244, %c0_245, %c0_246] : memref<5x80x32xf32, #tpu.memory_space<vmem>>, vector<1x80x32xf32>
    %289 = vector.shape_cast %288 : vector<1x80x32xf32> to vector<80x32xf32>
    %cst_247 = arith.constant dense<0.000000e+00> : vector<128x32xf32>
    %290 = tpu.matmul %287, %289, %cst_247 {dimension_numbers = #tpu.dot_dimension_numbers<[1], [0], [0], [1], [0, 0, 1, 1], [], []>} : vector<128x80xf32>, vector<80x32xf32>, vector<128x32xf32> -> vector<128x32xf32>
    %291 = arith.addf %285, %290 : vector<128x32xf32>
    %c9_248 = arith.constant 9 : index
    %c0_249 = arith.constant 0 : index
    %c0_250 = arith.constant 0 : index
    %c0_251 = arith.constant 0 : index
    %292 = vector.load %arg11[%c9_248, %c0_249, %c0_250, %c0_251] : memref<12x8x8x80xf32, #tpu.memory_space<vmem>>, vector<2x8x8x80xf32>
    %293 = vector.shape_cast %292 : vector<2x8x8x80xf32> to vector<128x80xf32>
    %c3_252 = arith.constant 3 : index
    %c0_253 = arith.constant 0 : index
    %c0_254 = arith.constant 0 : index
    %294 = vector.load %arg4[%c3_252, %c0_253, %c0_254] : memref<5x80x32xf32, #tpu.memory_space<vmem>>, vector<1x80x32xf32>
    %295 = vector.shape_cast %294 : vector<1x80x32xf32> to vector<80x32xf32>
    %cst_255 = arith.constant dense<0.000000e+00> : vector<128x32xf32>
    %296 = tpu.matmul %293, %295, %cst_255 {dimension_numbers = #tpu.dot_dimension_numbers<[1], [0], [0], [1], [0, 0, 1, 1], [], []>} : vector<128x80xf32>, vector<80x32xf32>, vector<128x32xf32> -> vector<128x32xf32>
    %297 = arith.addf %291, %296 : vector<128x32xf32>
    %c10_256 = arith.constant 10 : index
    %c0_257 = arith.constant 0 : index
    %c0_258 = arith.constant 0 : index
    %c0_259 = arith.constant 0 : index
    %298 = vector.load %arg11[%c10_256, %c0_257, %c0_258, %c0_259] : memref<12x8x8x80xf32, #tpu.memory_space<vmem>>, vector<2x8x8x80xf32>
    %299 = vector.shape_cast %298 : vector<2x8x8x80xf32> to vector<128x80xf32>
    %c4_260 = arith.constant 4 : index
    %c0_261 = arith.constant 0 : index
    %c0_262 = arith.constant 0 : index
    %300 = vector.load %arg4[%c4_260, %c0_261, %c0_262] : memref<5x80x32xf32, #tpu.memory_space<vmem>>, vector<1x80x32xf32>
    %301 = vector.shape_cast %300 : vector<1x80x32xf32> to vector<80x32xf32>
    %cst_263 = arith.constant dense<0.000000e+00> : vector<128x32xf32>
    %302 = tpu.matmul %299, %301, %cst_263 {dimension_numbers = #tpu.dot_dimension_numbers<[1], [0], [0], [1], [0, 0, 1, 1], [], []>} : vector<128x80xf32>, vector<80x32xf32>, vector<128x32xf32> -> vector<128x32xf32>
    %303 = arith.addf %297, %302 : vector<128x32xf32>
    %304 = vector.shape_cast %303 : vector<128x32xf32> to vector<2x4x2x8x32xf32>
    %cst_264 = arith.constant dense<0xFF800000> : vector<2x4x8x32xf32>
    %305 = vector.multi_reduction <maximumf>, %304, %cst_264 [2] : vector<2x4x2x8x32xf32> to vector<2x4x8x32xf32>
    %cst_265 = arith.constant dense<0xFF800000> : vector<4x8x32xf32>
    %306 = vector.multi_reduction <maximumf>, %305, %cst_265 [0] : vector<2x4x8x32xf32> to vector<4x8x32xf32>
    %cst_266 = arith.constant 0.000000e+00 : f32
    %307 = vector.broadcast %cst_266 : f32 to vector<4x8x32xf32>
    %308 = arith.maximumf %306, %307 : vector<4x8x32xf32>
    %309 = vector.extract_strided_slice %308 {offsets = [0, 0, 0], sizes = [1, 8, 32], strides = [1, 1, 1]} : vector<4x8x32xf32> to vector<1x8x32xf32>
    %310 = vector.shape_cast %309 : vector<1x8x32xf32> to vector<8x32xf32>
    %311 = vector.extract_strided_slice %308 {offsets = [1, 0, 0], sizes = [1, 8, 32], strides = [1, 1, 1]} : vector<4x8x32xf32> to vector<1x8x32xf32>
    %312 = vector.shape_cast %311 : vector<1x8x32xf32> to vector<8x32xf32>
    %313 = vector.extract_strided_slice %308 {offsets = [2, 0, 0], sizes = [1, 8, 32], strides = [1, 1, 1]} : vector<4x8x32xf32> to vector<1x8x32xf32>
    %314 = vector.shape_cast %313 : vector<1x8x32xf32> to vector<8x32xf32>
    %315 = vector.extract_strided_slice %308 {offsets = [3, 0, 0], sizes = [1, 8, 32], strides = [1, 1, 1]} : vector<4x8x32xf32> to vector<1x8x32xf32>
    %316 = vector.shape_cast %315 : vector<1x8x32xf32> to vector<8x32xf32>
    %317 = tpu.concatenate %310, %312, %314, %316 in 1 : vector<8x32xf32>, vector<8x32xf32>, vector<8x32xf32>, vector<8x32xf32> -> vector<8x128xf32>
    %c0_267 = arith.constant 0 : index
    %c384 = arith.constant 384 : index
    %318 = vector.load %arg12[%c0_267, %c384] : memref<8x512xf32, #tpu.memory_space<vmem>>, vector<8x128xf32>
    tpu.vector_store %arg12[%c0_267, %c384], %317 {strides = array<i32>} : memref<8x512xf32, #tpu.memory_space<vmem>>, vector<8x128xf32>,
    %c0_268 = arith.constant 0 : index
    %c0_269 = arith.constant 0 : index
    %319 = vector.load %arg12[%c0_268, %c0_269] : memref<8x512xf32, #tpu.memory_space<vmem>>, vector<8x512xf32>
    %c0_270 = arith.constant 0 : index
    %c0_271 = arith.constant 0 : index
    %320 = vector.load %arg6[%c0_270, %c0_271] : memref<512x64xf32, #tpu.memory_space<vmem>>, vector<512x64xf32>
    %cst_272 = arith.constant dense<0.000000e+00> : vector<8x64xf32>
    %321 = tpu.matmul %319, %320, %cst_272 {dimension_numbers = #tpu.dot_dimension_numbers<[1], [0], [0], [1], [0, 0, 1, 1], [], []>} : vector<8x512xf32>, vector<512x64xf32>, vector<8x64xf32> -> vector<8x64xf32>
    %c0_273 = arith.constant 0 : index
    %c0_274 = arith.constant 0 : index
    %322 = vector.load %arg7[%c0_273, %c0_274] : memref<1x64xf32, #tpu.memory_space<vmem>>, vector<1x64xf32>
    %323 = vector.broadcast %322 : vector<1x64xf32> to vector<8x64xf32>
    %324 = arith.addf %321, %323 : vector<8x64xf32>
    %cst_275 = arith.constant 0.000000e+00 : f32
    %325 = vector.broadcast %cst_275 : f32 to vector<8x64xf32>
    %326 = arith.maximumf %324, %325 : vector<8x64xf32>
    %c0_276 = arith.constant 0 : index
    %c0_277 = arith.constant 0 : index
    %327 = vector.load %arg8[%c0_276, %c0_277] : memref<64x128xf32, #tpu.memory_space<vmem>>, vector<64x128xf32>
    %cst_278 = arith.constant dense<0.000000e+00> : vector<8x128xf32>
    %328 = tpu.matmul %326, %327, %cst_278 {dimension_numbers = #tpu.dot_dimension_numbers<[1], [0], [0], [1], [0, 0, 1, 1], [], []>} : vector<8x64xf32>, vector<64x128xf32>, vector<8x128xf32> -> vector<8x128xf32>
    %c0_279 = arith.constant 0 : index
    %c0_280 = arith.constant 0 : index
    %329 = vector.load %arg9[%c0_279, %c0_280] : memref<1x128xf32, #tpu.memory_space<vmem>>, vector<1x128xf32>
    %330 = vector.broadcast %329 : vector<1x128xf32> to vector<8x128xf32>
    %331 = arith.addf %328, %330 : vector<8x128xf32>
    %cst_281 = arith.constant 0.000000e+00 : f32
    %332 = vector.broadcast %cst_281 : f32 to vector<8x128xf32>
    %333 = arith.maximumf %331, %332 : vector<8x128xf32>
    %c0_282 = arith.constant 0 : index
    %c0_283 = arith.constant 0 : index
    %334 = vector.load %arg10[%c0_282, %c0_283] : memref<8x128xf32, #tpu.memory_space<vmem>>, vector<8x128xf32>
    tpu.vector_store %arg10[%c0_282, %c0_283], %333 {strides = array<i32>} : memref<8x128xf32, #tpu.memory_space<vmem>>, vector<8x128xf32>,
    return
  }
  func.func @transform_0(%arg0: i32) -> (i32, i32) {
    %c0_i32 = arith.constant 0 : i32
    %c0_i32_0 = arith.constant 0 : i32
    return %arg0, %c0_i32 : i32, i32
  }
  func.func @transform_1(%arg0: i32) -> (i32, i32) {
    %c0_i32 = arith.constant 0 : i32
    %c0_i32_0 = arith.constant 0 : i32
    %c0_i32_1 = arith.constant 0 : i32
    return %c0_i32, %c0_i32_0 : i32, i32
  }
  func.func @transform_2(%arg0: i32) -> (i32, i32) {
    %c0_i32 = arith.constant 0 : i32
    %c0_i32_0 = arith.constant 0 : i32
    %c0_i32_1 = arith.constant 0 : i32
    return %c0_i32, %c0_i32_0 : i32, i32
  }
  func.func @transform_3(%arg0: i32) -> (i32, i32, i32) {
    %c0_i32 = arith.constant 0 : i32
    %c0_i32_0 = arith.constant 0 : i32
    %c0_i32_1 = arith.constant 0 : i32
    %c0_i32_2 = arith.constant 0 : i32
    return %c0_i32, %c0_i32_0, %c0_i32_1 : i32, i32, i32
  }
  func.func @transform_4(%arg0: i32) -> (i32, i32) {
    %c0_i32 = arith.constant 0 : i32
    %c0_i32_0 = arith.constant 0 : i32
    %c0_i32_1 = arith.constant 0 : i32
    return %c0_i32, %c0_i32_0 : i32, i32
  }
  func.func @transform_5(%arg0: i32) -> (i32, i32) {
    %c0_i32 = arith.constant 0 : i32
    %c0_i32_0 = arith.constant 0 : i32
    %c0_i32_1 = arith.constant 0 : i32
    return %c0_i32, %c0_i32_0 : i32, i32
  }
  func.func @transform_6(%arg0: i32) -> (i32, i32) {
    %c0_i32 = arith.constant 0 : i32
    %c0_i32_0 = arith.constant 0 : i32
    %c0_i32_1 = arith.constant 0 : i32
    return %c0_i32, %c0_i32_0 : i32, i32
  }
  func.func @transform_7(%arg0: i32) -> (i32, i32) {
    %c0_i32 = arith.constant 0 : i32
    %c0_i32_0 = arith.constant 0 : i32
    %c0_i32_1 = arith.constant 0 : i32
    return %c0_i32, %c0_i32_0 : i32, i32
  }
  func.func @transform_8(%arg0: i32) -> (i32, i32) {
    %c0_i32 = arith.constant 0 : i32
    %c0_i32_0 = arith.constant 0 : i32
    %c0_i32_1 = arith.constant 0 : i32
    return %c0_i32, %c0_i32_0 : i32, i32
  }
  func.func @transform_9(%arg0: i32) -> (i32, i32) {
    %c0_i32 = arith.constant 0 : i32
    %c0_i32_0 = arith.constant 0 : i32
    return %arg0, %c0_i32 : i32, i32
  }
}

</mosaic_0001>

<bundles_post_ra>
// kernel: red_forward.1
= control target key start
LH: loop header
LB: loop body
LE: loop exit
PB: predicated region body
PF: predicated region fallthrough
CT: control target
= control target key end

     0   :  { %vm188_vm0 = vcmask 531456   ;;  %vm237_vm1 = vcmask 1040384   ;;  %v14319_v7 = vmov 0   ;;  %vm404_vm2 = vcmask 654336   ;;  %s14320_s24 = smov 32   ;;  %s14321_s11 = smov 64   ;;  %s18832_s1 = inlined_call_operand.vmem [shape: bf16[65,80], index: 1, kind: input, shape index: {}]   ;;  %s18833_s0 = inlined_call_operand.vmem [shape: bf16[3072,65], index: 0, kind: input, shape index: {}]   ;;  %s18834_s2 = inlined_call_operand.vmem [shape: f32[1,80], index: 2, kind: input, shape index: {}]   ;;  %s18835_s3 = inlined_call_operand.vmem [shape: f32[5,80,32], index: 3, kind: input, shape index: {}]   ;;  %s18836_s5 = inlined_call_operand.vmem [shape: f32[512,64], index: 5, kind: input, shape index: {}]   ;;  %s18837_s4 = inlined_call_operand.vmem [shape: f32[1,32], index: 4, kind: input, shape index: {}]   ;;  %s18838_s7 = inlined_call_operand.vmem [shape: f32[64,128], index: 7, kind: input, shape index: {}]   ;;  %s18839_s6 = inlined_call_operand.vmem [shape: f32[1,64], index: 6, kind: input, shape index: {}]   ;;  %s18840_s8 = inlined_call_operand.vmem [shape: f32[1,128], index: 8, kind: input, shape index: {}]   ;;  %s18841_s9 = inlined_call_operand.vmem [shape: f32[8,128], index: 9, kind: output, shape index: {}]  }
   0x1   :  { %v14379_v0 = vld [vmem:[%s18832_s1] sm:$0xff]   ;;  %v14384_v1 = vld [vmem:[%s18832_s1 + $0x8] sm:$0xff]   ;;  %v14395_v2 = vld [vmem:[%s18832_s1 + $0x10] sm:$0xff]   ;;  %v239_v8 = vsel %vm237_vm1, 65535, %v14319_v7  ;;  %vm6093_vm3 = vcmask 261120   ;;  %vm6147_vm4 = vcmask 523264  }
   0x2   :  { %11880 = vmatprep.subr.bf16.mxu0 %v14379_v0  ;;  %11922 = vmatprep.subr.bf16.mxu1 %v14379_v0  ;;  %v14121_v3 = vld [vmem:[%s18833_s0] sm:$0xff]   ;;  %v14414_v6 = vld [vmem:[%s18832_s1 + $0x18] sm:$0xff]   ;;  %v14123_v10 = vld [vmem:[%s18833_s0 + $0x8] sm:$0xff]   ;;  %vm6149_vm5 = vcmask 785408   ;;  %vm14324_vm6 = vmmov 0  }
   0x3   :  { %11881 = vmatpush3.bf16.msra.mxu0 %v14379_v0  ;;  %11923 = vmatpush3.bf16.msra.mxu1 %v14379_v0  ;;  %v14120_v4 = vld [vmem:[%s18832_s1 + $0x20] ss:$0 sps:$4 sm:$0x11]   ;;  %v14124_v11 = vld [vmem:[%s18833_s0 + $0x88] sm:$0xff]   ;;  %v14125_v12 = vld [vmem:[%s18833_s0 + $0x10] sm:$0xff]  }
   0x4   :  { %11882 = vmatprep.subr.bf16.mxu0 %v14384_v1  ;;  %11924 = vmatprep.subr.bf16.mxu1 %v14384_v1  ;;  %v14122_v5 = vld [vmem:[%s18833_s0 + $0x80] sm:$0xff]   ;;  %v14421_v9 = vand.u32 %v14120_v4, %v239_v8  ;;  %v14126_v13 = vld [vmem:[%s18833_s0 + $0x90] sm:$0xff]   ;;  %v14127_v14 = vld [vmem:[%s18833_s0 + $0x18] sm:$0xff]  }
   0x5   :  { %11890 = vmatprep.mubr.msk.bf16.mxu0 %vm188_vm0, %v14121_v3  ;;  %11932 = vmatprep.mubr.msk.bf16.mxu1 %vm188_vm0, %v14122_v5  ;;  %v14128_v15 = vld [vmem:[%s18833_s0 + $0x98] sm:$0xff]   ;;  %v14129_v16 = vld [vmem:[%s18833_s0 + $0x20] sm:$0xff]   ;;  %v14131_v18 = vld [vmem:[%s18833_s0 + $0x28] sm:$0xff]  }
   0x6   :  { %v14130_v17 = vld [vmem:[%s18833_s0 + $0xa0] sm:$0xff]   ;;  %v14132_v19 = vld [vmem:[%s18833_s0 + $0xa8] sm:$0xff]   ;;  %v14133_v20 = vld [vmem:[%s18833_s0 + $0x30] sm:$0xff]  }
   0x7   :  { %11883 = vmatpush3.bf16.msra.mxu0 %v14384_v1  ;;  %11925 = vmatpush3.bf16.msra.mxu1 %v14384_v1  ;;  %v14134_v21 = vld [vmem:[%s18833_s0 + $0xb0] sm:$0xff]   ;;  %v14135_v22 = vld [vmem:[%s18833_s0 + $0x38] sm:$0xff]   ;;  %v14137_v24 = vld [vmem:[%s18833_s0 + $0x40] sm:$0xff]  }
   0x8   :  { %11884 = vmatprep.subr.bf16.mxu0 %v14395_v2  ;;  %11926 = vmatprep.subr.bf16.mxu1 %v14395_v2  ;;  %v14136_v23 = vld [vmem:[%s18833_s0 + $0xb8] sm:$0xff]   ;;  %v14138_v25 = vld [vmem:[%s18833_s0 + $0xc0] sm:$0xff]   ;;  %v14139_v26 = vld [vmem:[%s18833_s0 + $0x48] sm:$0xff]  }
   0x9   :  { %v14140_v27 = vld [vmem:[%s18833_s0 + $0xc8] sm:$0xff]   ;;  %v14141_v28 = vld [vmem:[%s18833_s0 + $0x50] sm:$0xff]   ;;  %v14143_v30 = vld [vmem:[%s18833_s0 + $0x58] sm:$0xff]  }
   0xa   :  { %v14142_v29 = vld [vmem:[%s18833_s0 + $0xd0] sm:$0xff]   ;;  %v14144_v31 = vld [vmem:[%s18833_s0 + $0xd8] sm:$0xff]   ;;  %v14145_v32 = vld [vmem:[%s18833_s0 + $0x60] sm:$0xff]  }
   0xb   :  { %11885 = vmatpush3.bf16.msra.mxu0 %v14395_v2  ;;  %11927 = vmatpush3.bf16.msra.mxu1 %v14395_v2  ;;  %v14146_v33 = vld [vmem:[%s18833_s0 + $0xe0] sm:$0xff]   ;;  %v14147_v34 = vld [vmem:[%s18833_s0 + $0x68] sm:$0xff]   ;;  %v14149_v36 = vld [vmem:[%s18833_s0 + $0x70] sm:$0xff]  }
   0xc   :  { %11886 = vmatprep.subr.bf16.mxu0 %v14414_v6  ;;  %11928 = vmatprep.subr.bf16.mxu1 %v14414_v6  ;;  %v14148_v35 = vld [vmem:[%s18833_s0 + $0xe8] sm:$0xff]   ;;  %v14150_v37 = vld [vmem:[%s18833_s0 + $0xf0] sm:$0xff]   ;;  %v14151_v38 = vld [vmem:[%s18833_s0 + $0x78] sm:$0xff]  }
   0xd   :  { %v14152_v39 = vld [vmem:[%s18833_s0 + $0xf8] sm:$0xff]   ;;  %v14153_v40 = vld [vmem:[%s18833_s0 + $0x100] sm:$0xff]   ;;  %v14155_v42 = vld [vmem:[%s18833_s0 + $0x108] sm:$0xff]  }
   0xe   :  { %v14154_v41 = vld [vmem:[%s18833_s0 + $0x180] sm:$0xff]   ;;  %v14156_v43 = vld [vmem:[%s18833_s0 + $0x188] sm:$0xff]   ;;  %v14157_v44 = vld [vmem:[%s18833_s0 + $0x110] sm:$0xff]  }
   0xf   :  { %11887 = vmatpush3.bf16.msra.mxu0 %v14414_v6  ;;  %11929 = vmatpush3.bf16.msra.mxu1 %v14414_v6  ;;  %v14158_v45 = vld [vmem:[%s18833_s0 + $0x190] sm:$0xff]   ;;  %v14159_v46 = vld [vmem:[%s18833_s0 + $0x118] sm:$0xff]   ;;  %v14161_v48 = vld [vmem:[%s18833_s0 + $0x120] sm:$0xff]  }
  0x10   :  { %11888 = vmatprep.subr.bf16.mxu0 %v14421_v9  ;;  %11930 = vmatprep.subr.bf16.mxu1 %v14421_v9  ;;  %v14160_v47 = vld [vmem:[%s18833_s0 + $0x198] sm:$0xff]   ;;  %v14162_v49 = vld [vmem:[%s18833_s0 + $0x1a0] sm:$0xff]   ;;  %v14163_v50 = vld [vmem:[%s18833_s0 + $0x128] sm:$0xff]  }
  0x11   :  { %v14164_v51 = vld [vmem:[%s18833_s0 + $0x1a8] sm:$0xff]   ;;  %v14165_v52 = vld [vmem:[%s18833_s0 + $0x130] sm:$0xff]   ;;  %v14167_v54 = vld [vmem:[%s18833_s0 + $0x138] sm:$0xff]  }
  0x12   :  { %v14166_v53 = vld [vmem:[%s18833_s0 + $0x1b0] sm:$0xff]   ;;  %v14168_v55 = vld [vmem:[%s18833_s0 + $0x1b8] sm:$0xff]   ;;  %v14169_v56 = vld [vmem:[%s18833_s0 + $0x140] sm:$0xff]  }
  0x13   :  { %11889 = vmatpush3.bf16.msra.mxu0 %v14421_v9  ;;  %11931 = vmatpush3.bf16.msra.mxu1 %v14421_v9  ;;  %v14170_v57 = vld [vmem:[%s18833_s0 + $0x1c0] sm:$0xff]   ;;  %v14171_v58 = vld [vmem:[%s18833_s0 + $0x148] sm:$0xff]   ;;  %v14173_v60 = vld [vmem:[%s18833_s0 + $0x150] sm:$0xff]  }
  0x14   :  { %11964 = vmatprep.subr.bf16.mxu0 %v14379_v0  ;;  %12006 = vmatprep.subr.bf16.mxu1 %v14379_v0  ;;  %v14172_v59 = vld [vmem:[%s18833_s0 + $0x1c8] sm:$0xff]   ;;  %v14174_v61 = vld [vmem:[%s18833_s0 + $0x1d0] sm:$0xff]   ;;  %v14175_v62 = vld [vmem:[%s18833_s0 + $0x158] sm:$0xff]  }
  0x15   :  { %v14176_v63 = vld [vmem:[%s18833_s0 + $0x1d8] sm:$0xff]   ;;  %v14180_v3 = vld [vmem:[%s18833_s0 + $0x1e8] sm:$0xff]   ;;  %v14181_v4 = vld [vmem:[%s18833_s0 + $0x170] sm:$0xff]  }
  0x16   :  { %11891 = vmatmul.mubr.msk.bf16.vlgmr.msra.gmra.mrb[0].mxu0 %vm188_vm0, %v14123_v10  ;;  %11933 = vmatmul.mubr.msk.bf16.vlgmr.msra.gmra.mrb[0].mxu1 %vm188_vm0, %v14124_v11  ;;  %v14182_v5 = vld [vmem:[%s18833_s0 + $0x1f0] sm:$0xff]   ;;  %v14184_v7 = vld [vmem:[%s18833_s0 + $0x1f8] sm:$0xff]   ;;  %v14185_v8 = vld [vmem:[%s18833_s0 + $0x200] sm:$0xff]  }
  0x17   :  { %11965 = vmatpush3.bf16.msra.mxu0 %v14379_v0  ;;  %12007 = vmatpush3.bf16.msra.mxu1 %v14379_v0  ;;  %v14186_v10 = vld [vmem:[%s18833_s0 + $0x280] sm:$0xff]   ;;  %v14187_v11 = vld [vmem:[%s18833_s0 + $0x208] sm:$0xff]  }
  0x18   :  { %11894 = vmatprep.mubr.msk.bf16.mxu0 %vm188_vm0, %v14125_v12  ;;  %11936 = vmatprep.mubr.msk.bf16.mxu1 %vm188_vm0, %v14126_v13  ;;  %v14188_v12 = vld [vmem:[%s18833_s0 + $0x288] sm:$0xff]   ;;  %v14189_v13 = vld [vmem:[%s18833_s0 + $0x210] sm:$0xff]  }
  0x19   :  { %11966 = vmatprep.subr.bf16.mxu0 %v14384_v1  ;;  %12008 = vmatprep.subr.bf16.mxu1 %v14384_v1 }
  0x1b   :  { %11967 = vmatpush3.bf16.msra.mxu0 %v14384_v1  ;;  %12009 = vmatpush3.bf16.msra.mxu1 %v14384_v1 }
  0x1c   :  { %11968 = vmatprep.subr.bf16.mxu0 %v14395_v2  ;;  %12010 = vmatprep.subr.bf16.mxu1 %v14395_v2 }
  0x1e   :  { %11895 = vmatmul.mubr.msk.bf16.gmra.mrb[4].mxu0 %vm188_vm0, %v14127_v14  ;;  %11937 = vmatmul.mubr.msk.bf16.gmra.mrb[4].mxu1 %vm188_vm0, %v14128_v15  ;;  %v14190_v14 = vld [vmem:[%s18833_s0 + $0x290] sm:$0xff]   ;;  %v14744_v15 = vld [vmem:[%s18832_s1] sm:$0xff]  }
  0x1f   :  { %11898 = vmatprep.mubr.msk.bf16.mxu0 %vm188_vm0, %v14129_v16  ;;  %11940 = vmatprep.mubr.msk.bf16.mxu1 %vm188_vm0, %v14130_v17  ;;  %v14191_v16 = vld [vmem:[%s18833_s0 + $0x218] sm:$0xff]  }
  0x20   :  { %11969 = vmatpush3.bf16.msra.mxu0 %v14395_v2  ;;  %12011 = vmatpush3.bf16.msra.mxu1 %v14395_v2  ;;  %v14192_v17 = vld [vmem:[%s18833_s0 + $0x298] sm:$0xff]  }
  0x21   :  { %11970 = vmatprep.subr.bf16.mxu0 %v14414_v6  ;;  %12012 = vmatprep.subr.bf16.mxu1 %v14414_v6 }
  0x24   :  { %11971 = vmatpush3.bf16.msra.mxu0 %v14414_v6  ;;  %12013 = vmatpush3.bf16.msra.mxu1 %v14414_v6 }
  0x25   :  { %11972 = vmatprep.subr.bf16.mxu0 %v14421_v9  ;;  %12014 = vmatprep.subr.bf16.mxu1 %v14421_v9 }
  0x26   :  { %11899 = vmatmul.mubr.msk.bf16.gmra.mrb[8].mxu0 %vm188_vm0, %v14131_v18  ;;  %11941 = vmatmul.mubr.msk.bf16.gmra.mrb[8].mxu1 %vm188_vm0, %v14132_v19  ;;  %v14759_v18 = vld [vmem:[%s18832_s1 + $0x8] sm:$0xff]   ;;  %v14193_v19 = vld [vmem:[%s18833_s0 + $0x220] sm:$0xff]  }
  0x27   :  { %11902 = vmatprep.mubr.msk.bf16.mxu0 %vm188_vm0, %v14133_v20  ;;  %11944 = vmatprep.mubr.msk.bf16.mxu1 %vm188_vm0, %v14134_v21  ;;  %v14194_v20 = vld [vmem:[%s18833_s0 + $0x2a0] sm:$0xff]   ;;  %v14774_v21 = vld [vmem:[%s18832_s1 + $0x10] sm:$0xff]  }
  0x28   :  { %11973 = vmatpush3.bf16.msra.mxu0 %v14421_v9  ;;  %12015 = vmatpush3.bf16.msra.mxu1 %v14421_v9 }
  0x29   :  { %12048 = vmatprep.subr.bf16.mxu0 %v14379_v0  ;;  %12090 = vmatprep.subr.bf16.mxu1 %v14379_v0 }
  0x2e   :  { %11903 = vmatmul.mubr.msk.bf16.gmra.mrb[12].mxu0 %vm188_vm0, %v14135_v22  ;;  %11945 = vmatmul.mubr.msk.bf16.gmra.mrb[12].mxu1 %vm188_vm0, %v14136_v23  ;;  %v14195_v22 = vld [vmem:[%s18833_s0 + $0x228] sm:$0xff]  }
  0x2f   :  { %11906 = vmatprep.mubr.msk.bf16.mxu0 %vm188_vm0, %v14137_v24  ;;  %11948 = vmatprep.mubr.msk.bf16.mxu1 %vm188_vm0, %v14138_v25  ;;  %v14196_v23 = vld [vmem:[%s18833_s0 + $0x2a8] sm:$0xff]   ;;  %v14197_v24 = vld [vmem:[%s18833_s0 + $0x230] sm:$0xff]  }
  0x30   :  { %v14198_v25 = vld [vmem:[%s18833_s0 + $0x2b0] sm:$0xff]  }
  0x36   :  { %11907 = vmatmul.mubr.msk.bf16.gmra.mrb[16].mxu0 %vm188_vm0, %v14139_v26  ;;  %11949 = vmatmul.mubr.msk.bf16.gmra.mrb[16].mxu1 %vm188_vm0, %v14140_v27  ;;  %v14799_v26 = vld [vmem:[%s18832_s1 + $0x18] sm:$0xff]  }
  0x37   :  { %11910 = vmatprep.mubr.msk.bf16.mxu0 %vm188_vm0, %v14141_v28  ;;  %11952 = vmatprep.mubr.msk.bf16.mxu1 %vm188_vm0, %v14142_v29  ;;  %v14199_v27 = vld [vmem:[%s18833_s0 + $0x238] sm:$0xff]   ;;  %v14201_v29 = vld [vmem:[%s18833_s0 + $0x240] sm:$0xff]  }
  0x38   :  { %v14200_v28 = vld [vmem:[%s18833_s0 + $0x2b8] sm:$0xff]  }
  0x3e   :  { %11911 = vmatmul.mubr.msk.bf16.gmra.mrb[20].mxu0 %vm188_vm0, %v14143_v30  ;;  %11953 = vmatmul.mubr.msk.bf16.gmra.mrb[20].mxu1 %vm188_vm0, %v14144_v31  ;;  %v14202_v30 = vld [vmem:[%s18833_s0 + $0x2c0] sm:$0xff]   ;;  %v14203_v31 = vld [vmem:[%s18833_s0 + $0x248] sm:$0xff]  }
  0x3f   :  { %11914 = vmatprep.mubr.msk.bf16.mxu0 %vm188_vm0, %v14145_v32  ;;  %11956 = vmatprep.mubr.msk.bf16.mxu1 %vm188_vm0, %v14146_v33  ;;  %v14204_v32 = vld [vmem:[%s18833_s0 + $0x2c8] sm:$0xff]   ;;  %v14205_v33 = vld [vmem:[%s18833_s0 + $0x250] sm:$0xff]  }
  0x46   :  { %11915 = vmatmul.mubr.msk.bf16.gmra.mrb[24].mxu0 %vm188_vm0, %v14147_v34  ;;  %11957 = vmatmul.mubr.msk.bf16.gmra.mrb[24].mxu1 %vm188_vm0, %v14148_v35  ;;  %v14206_v34 = vld [vmem:[%s18833_s0 + $0x2d0] sm:$0xff]   ;;  %v14207_v35 = vld [vmem:[%s18833_s0 + $0x258] sm:$0xff]  }
  0x47   :  { %11918 = vmatprep.mubr.msk.bf16.mxu0 %vm188_vm0, %v14149_v36  ;;  %11960 = vmatprep.mubr.msk.bf16.mxu1 %vm188_vm0, %v14150_v37  ;;  %v14208_v36 = vld [vmem:[%s18833_s0 + $0x2d8] sm:$0xff]   ;;  %v14209_v37 = vld [vmem:[%s18833_s0 + $0x260] sm:$0xff]  }
  0x4e   :  { %11919 = vmatmul.mubr.msk.bf16.gmra.mrb[28].mxu0 %vm188_vm0, %v14151_v38  ;;  %11961 = vmatmul.mubr.msk.bf16.gmra.mrb[28].mxu1 %vm188_vm0, %v14152_v39  ;;  %v14210_v38 = vld [vmem:[%s18833_s0 + $0x2e0] sm:$0xff]   ;;  %v14211_v39 = vld [vmem:[%s18833_s0 + $0x268] sm:$0xff]  }
  0x4f   :  { %11974 = vmatprep.mubr.msk.bf16.mxu0 %vm188_vm0, %v14153_v40  ;;  %12016 = vmatprep.mubr.msk.bf16.mxu1 %vm188_vm0, %v14154_v41  ;;  %v14212_v40 = vld [vmem:[%s18833_s0 + $0x2e8] sm:$0xff]   ;;  %v14213_v41 = vld [vmem:[%s18833_s0 + $0x270] sm:$0xff]  }
  0x56   :  { %11975 = vmatmul.mubr.msk.bf16.vlgmr.msra.gmra.mrb[32].mxu0 %vm188_vm0, %v14155_v42  ;;  %12017 = vmatmul.mubr.msk.bf16.vlgmr.msra.gmra.mrb[32].mxu1 %vm188_vm0, %v14156_v43  ;;  %v14214_v42 = vld [vmem:[%s18833_s0 + $0x2f0] sm:$0xff]   ;;  %v14215_v43 = vld [vmem:[%s18833_s0 + $0x278] sm:$0xff]  }
  0x57   :  { %12049 = vmatpush3.bf16.msra.mxu0 %v14379_v0  ;;  %12091 = vmatpush3.bf16.msra.mxu1 %v14379_v0 }
  0x58   :  { %11978 = vmatprep.mubr.msk.bf16.mxu0 %vm188_vm0, %v14157_v44  ;;  %12020 = vmatprep.mubr.msk.bf16.mxu1 %vm188_vm0, %v14158_v45  ;;  %v14216_v44 = vld [vmem:[%s18833_s0 + $0x2f8] sm:$0xff]   ;;  %v14217_v45 = vld [vmem:[%s18833_s0 + $0x300] sm:$0xff]  }
  0x59   :  { %12050 = vmatprep.subr.bf16.mxu0 %v14384_v1  ;;  %12092 = vmatprep.subr.bf16.mxu1 %v14384_v1 }
  0x5b   :  { %12051 = vmatpush3.bf16.msra.mxu0 %v14384_v1  ;;  %12093 = vmatpush3.bf16.msra.mxu1 %v14384_v1  ;;  %v14178_v1 = vld [vmem:[%s18833_s0 + $0x1e0] sm:$0xff]  }
  0x5c   :  { %12052 = vmatprep.subr.bf16.mxu0 %v14395_v2  ;;  %12094 = vmatprep.subr.bf16.mxu1 %v14395_v2 }
  0x5e   :  { %11979 = vmatmul.mubr.msk.bf16.gmra.mrb[36].mxu0 %vm188_vm0, %v14159_v46  ;;  %12021 = vmatmul.mubr.msk.bf16.gmra.mrb[36].mxu1 %vm188_vm0, %v14160_v47  ;;  %v14218_v46 = vld [vmem:[%s18833_s0 + $0x380] sm:$0xff]   ;;  %v14219_v47 = vld [vmem:[%s18833_s0 + $0x308] sm:$0xff]  }
  0x5f   :  { %11982 = vmatprep.mubr.msk.bf16.mxu0 %vm188_vm0, %v14161_v48  ;;  %12024 = vmatprep.mubr.msk.bf16.mxu1 %vm188_vm0, %v14162_v49  ;;  %v14220_v48 = vld [vmem:[%s18833_s0 + $0x388] sm:$0xff]   ;;  %v14221_v49 = vld [vmem:[%s18833_s0 + $0x310] sm:$0xff]  }
  0x60   :  { %12053 = vmatpush3.bf16.msra.mxu0 %v14395_v2  ;;  %12095 = vmatpush3.bf16.msra.mxu1 %v14395_v2  ;;  %v14179_v2 = vld [vmem:[%s18833_s0 + $0x168] sm:$0xff]  }
  0x61   :  { %12054 = vmatprep.subr.bf16.mxu0 %v14414_v6  ;;  %12096 = vmatprep.subr.bf16.mxu1 %v14414_v6 }
  0x64   :  { %12055 = vmatpush3.bf16.msra.mxu0 %v14414_v6  ;;  %12097 = vmatpush3.bf16.msra.mxu1 %v14414_v6  ;;  %v14183_v6 = vld [vmem:[%s18833_s0 + $0x178] sm:$0xff]  }
  0x65   :  { %12056 = vmatprep.subr.bf16.mxu0 %v14421_v9  ;;  %12098 = vmatprep.subr.bf16.mxu1 %v14421_v9 }
  0x66   :  { %11983 = vmatmul.mubr.msk.bf16.gmra.mrb[40].mxu0 %vm188_vm0, %v14163_v50  ;;  %12025 = vmatmul.mubr.msk.bf16.gmra.mrb[40].mxu1 %vm188_vm0, %v14164_v51  ;;  %v14222_v50 = vld [vmem:[%s18833_s0 + $0x390] sm:$0xff]   ;;  %v14223_v51 = vld [vmem:[%s18833_s0 + $0x318] sm:$0xff]  }
  0x67   :  { %11986 = vmatprep.mubr.msk.bf16.mxu0 %vm188_vm0, %v14165_v52  ;;  %12028 = vmatprep.mubr.msk.bf16.mxu1 %vm188_vm0, %v14166_v53  ;;  %v14224_v52 = vld [vmem:[%s18833_s0 + $0x398] sm:$0xff]   ;;  %v14225_v53 = vld [vmem:[%s18833_s0 + $0x320] sm:$0xff]  }
  0x68   :  { %12057 = vmatpush3.bf16.msra.mxu0 %v14421_v9  ;;  %12099 = vmatpush3.bf16.msra.mxu1 %v14421_v9 }
  0x69   :  { %12132 = vmatprep.subr.bf16.mxu0 %v14379_v0  ;;  %12174 = vmatprep.subr.bf16.mxu1 %v14379_v0  ;;  %v14177_v0 = vld [vmem:[%s18833_s0 + $0x160] sm:$0xff]  }
  0x6e   :  { %11987 = vmatmul.mubr.msk.bf16.gmra.mrb[44].mxu0 %vm188_vm0, %v14167_v54  ;;  %12029 = vmatmul.mubr.msk.bf16.gmra.mrb[44].mxu1 %vm188_vm0, %v14168_v55  ;;  %v14226_v54 = vld [vmem:[%s18833_s0 + $0x3a0] sm:$0xff]   ;;  %v14227_v55 = vld [vmem:[%s18833_s0 + $0x328] sm:$0xff]  }
  0x6f   :  { %11990 = vmatprep.mubr.msk.bf16.mxu0 %vm188_vm0, %v14169_v56  ;;  %12032 = vmatprep.mubr.msk.bf16.mxu1 %vm188_vm0, %v14170_v57  ;;  %v14228_v56 = vld [vmem:[%s18833_s0 + $0x3a8] sm:$0xff]   ;;  %v14229_v57 = vld [vmem:[%s18833_s0 + $0x330] sm:$0xff]  }
  0x76   :  { %11991 = vmatmul.mubr.msk.bf16.gmra.mrb[48].mxu0 %vm188_vm0, %v14171_v58  ;;  %12033 = vmatmul.mubr.msk.bf16.gmra.mrb[48].mxu1 %vm188_vm0, %v14172_v59  ;;  %v14230_v58 = vld [vmem:[%s18833_s0 + $0x3b0] sm:$0xff]  }
  0x77   :  { %11994 = vmatprep.mubr.msk.bf16.mxu0 %vm188_vm0, %v14173_v60  ;;  %12036 = vmatprep.mubr.msk.bf16.mxu1 %vm188_vm0, %v14174_v61 }
  0x7e   :  { %11995 = vmatmul.mubr.msk.bf16.gmra.mrb[52].mxu0 %vm188_vm0, %v14175_v62  ;;  %12037 = vmatmul.mubr.msk.bf16.gmra.mrb[52].mxu1 %vm188_vm0, %v14176_v63  ;;  %v14231_v63 = vld [vmem:[%s18833_s0 + $0x338] sm:$0xff]  }
  0x7f   :  { %11998 = vmatprep.mubr.msk.bf16.mxu0 %vm188_vm0, %v14177_v0  ;;  %12040 = vmatprep.mubr.msk.bf16.mxu1 %vm188_vm0, %v14178_v1  ;;  %v14232_v0 = vld [vmem:[%s18833_s0 + $0x3b8] sm:$0xff]  }
  0x86   :  { %11999 = vmatmul.mubr.msk.bf16.gmra.mrb[56].mxu0 %vm188_vm0, %v14179_v2  ;;  %12041 = vmatmul.mubr.msk.bf16.gmra.mrb[56].mxu1 %vm188_vm0, %v14180_v3  ;;  %v14233_v3 = vld [vmem:[%s18833_s0 + $0x340] sm:$0xff]  }
  0x87   :  { %12002 = vmatprep.mubr.msk.bf16.mxu0 %vm188_vm0, %v14181_v4  ;;  %12044 = vmatprep.mubr.msk.bf16.mxu1 %vm188_vm0, %v14182_v5  ;;  %v14234_v4 = vld [vmem:[%s18833_s0 + $0x3c0] sm:$0xff]  }
  0x8e   :  { %12003 = vmatmul.mubr.msk.bf16.gmra.mrb[60].mxu0 %vm188_vm0, %v14183_v6  ;;  %12045 = vmatmul.mubr.msk.bf16.gmra.mrb[60].mxu1 %vm188_vm0, %v14184_v7 }
  0x8f   :  { %12058 = vmatprep.mubr.msk.bf16.mxu0 %vm188_vm0, %v14185_v8  ;;  %12100 = vmatprep.mubr.msk.bf16.mxu1 %vm188_vm0, %v14186_v10 }
  0x96   :  { %12059 = vmatmul.mubr.msk.bf16.vlgmr.msra.gmra.mrb[64].mxu0 %vm188_vm0, %v14187_v11  ;;  %12101 = vmatmul.mubr.msk.bf16.vlgmr.msra.gmra.mrb[64].mxu1 %vm188_vm0, %v14188_v12  ;;  %v14235_v12 = vld [vmem:[%s18833_s0 + $0x348] sm:$0xff]  }
  0x97   :  { %12133 = vmatpush3.bf16.msra.mxu0 %v14744_v15  ;;  %12175 = vmatpush3.bf16.msra.mxu1 %v14744_v15 }
  0x98   :  { %12062 = vmatprep.mubr.msk.bf16.mxu0 %vm188_vm0, %v14189_v13  ;;  %12104 = vmatprep.mubr.msk.bf16.mxu1 %vm188_vm0, %v14190_v14  ;;  %v14236_v13 = vld [vmem:[%s18833_s0 + $0x3c8] sm:$0xff]  }
  0x99   :  { %12134 = vmatprep.subr.bf16.mxu0 %v14759_v18  ;;  %12176 = vmatprep.subr.bf16.mxu1 %v14759_v18 }
  0x9b   :  { %12135 = vmatpush3.bf16.msra.mxu0 %v14759_v18  ;;  %12177 = vmatpush3.bf16.msra.mxu1 %v14759_v18 }
  0x9c   :  { %12136 = vmatprep.subr.bf16.mxu0 %v14774_v21  ;;  %12178 = vmatprep.subr.bf16.mxu1 %v14774_v21 }
  0x9e   :  { %12063 = vmatmul.mubr.msk.bf16.gmra.mrb[68].mxu0 %vm188_vm0, %v14191_v16  ;;  %12105 = vmatmul.mubr.msk.bf16.gmra.mrb[68].mxu1 %vm188_vm0, %v14192_v17  ;;  %v14237_v17 = vld [vmem:[%s18833_s0 + $0x350] sm:$0xff]  }
  0x9f   :  { %12066 = vmatprep.mubr.msk.bf16.mxu0 %vm188_vm0, %v14193_v19  ;;  %12108 = vmatprep.mubr.msk.bf16.mxu1 %vm188_vm0, %v14194_v20  ;;  %v14238_v19 = vld [vmem:[%s18833_s0 + $0x3d0] sm:$0xff]  }
  0xa0   :  { %12137 = vmatpush3.bf16.msra.mxu0 %v14774_v21  ;;  %12179 = vmatpush3.bf16.msra.mxu1 %v14774_v21 }
  0xa1   :  { %12138 = vmatprep.subr.bf16.mxu0 %v14799_v26  ;;  %12180 = vmatprep.subr.bf16.mxu1 %v14799_v26 }
  0xa4   :  { %12139 = vmatpush3.bf16.msra.mxu0 %v14799_v26  ;;  %12181 = vmatpush3.bf16.msra.mxu1 %v14799_v26 }
  0xa5   :  { %12140 = vmatprep.subr.bf16.mxu0 %v14421_v9  ;;  %12182 = vmatprep.subr.bf16.mxu1 %v14421_v9 }
  0xa6   :  { %12067 = vmatmul.mubr.msk.bf16.gmra.mrb[72].mxu0 %vm188_vm0, %v14195_v22  ;;  %12109 = vmatmul.mubr.msk.bf16.gmra.mrb[72].mxu1 %vm188_vm0, %v14196_v23 }
  0xa7   :  { %12070 = vmatprep.mubr.msk.bf16.mxu0 %vm188_vm0, %v14197_v24  ;;  %12112 = vmatprep.mubr.msk.bf16.mxu1 %vm188_vm0, %v14198_v25  ;;  %v14239_v25 = vld [vmem:[%s18833_s0 + $0x358] sm:$0xff]  }
  0xa8   :  { %12141 = vmatpush3.bf16.msra.mxu0 %v14421_v9  ;;  %12183 = vmatpush3.bf16.msra.mxu1 %v14421_v9 }
  0xa9   :  { %12216 = vmatprep.subr.bf16.mxu0 %v14744_v15  ;;  %12258 = vmatprep.subr.bf16.mxu1 %v14744_v15 }
  0xae   :  { %12071 = vmatmul.mubr.msk.bf16.gmra.mrb[76].mxu0 %vm188_vm0, %v14199_v27  ;;  %12113 = vmatmul.mubr.msk.bf16.gmra.mrb[76].mxu1 %vm188_vm0, %v14200_v28  ;;  %v14240_v27 = vld [vmem:[%s18833_s0 + $0x3d8] sm:$0xff]  }
  0xaf   :  { %12074 = vmatprep.mubr.msk.bf16.mxu0 %vm188_vm0, %v14201_v29  ;;  %12116 = vmatprep.mubr.msk.bf16.mxu1 %vm188_vm0, %v14202_v30 }
  0xb6   :  { %12075 = vmatmul.mubr.msk.bf16.gmra.mrb[80].mxu0 %vm188_vm0, %v14203_v31  ;;  %12117 = vmatmul.mubr.msk.bf16.gmra.mrb[80].mxu1 %vm188_vm0, %v14204_v32 }
  0xb7   :  { %12078 = vmatprep.mubr.msk.bf16.mxu0 %vm188_vm0, %v14205_v33  ;;  %12120 = vmatprep.mubr.msk.bf16.mxu1 %vm188_vm0, %v14206_v34 }
  0xbe   :  { %12079 = vmatmul.mubr.msk.bf16.gmra.mrb[84].mxu0 %vm188_vm0, %v14207_v35  ;;  %12121 = vmatmul.mubr.msk.bf16.gmra.mrb[84].mxu1 %vm188_vm0, %v14208_v36 }
  0xbf   :  { %12082 = vmatprep.mubr.msk.bf16.mxu0 %vm188_vm0, %v14209_v37  ;;  %12124 = vmatprep.mubr.msk.bf16.mxu1 %vm188_vm0, %v14210_v38 }
  0xc6   :  { %12083 = vmatmul.mubr.msk.bf16.gmra.mrb[88].mxu0 %vm188_vm0, %v14211_v39  ;;  %12125 = vmatmul.mubr.msk.bf16.gmra.mrb[88].mxu1 %vm188_vm0, %v14212_v40 }
  0xc7   :  { %12086 = vmatprep.mubr.msk.bf16.mxu0 %vm188_vm0, %v14213_v41  ;;  %12128 = vmatprep.mubr.msk.bf16.mxu1 %vm188_vm0, %v14214_v42 }
  0xce   :  { %12087 = vmatmul.mubr.msk.bf16.gmra.mrb[92].mxu0 %vm188_vm0, %v14215_v43  ;;  %12129 = vmatmul.mubr.msk.bf16.gmra.mrb[92].mxu1 %vm188_vm0, %v14216_v44 }
  0xcf   :  { %12142 = vmatprep.mubr.msk.bf16.mxu0 %vm188_vm0, %v14217_v45  ;;  %12184 = vmatprep.mubr.msk.bf16.mxu1 %vm188_vm0, %v14218_v46  ;;  %v14241_v46 = vld [vmem:[%s18833_s0 + $0x360] sm:$0xff]  }
  0xd6   :  { %12143 = vmatmul.mubr.msk.bf16.vlgmr.msra.gmra.mrb[96].mxu0 %vm188_vm0, %v14219_v47  ;;  %12185 = vmatmul.mubr.msk.bf16.vlgmr.msra.gmra.mrb[96].mxu1 %vm188_vm0, %v14220_v48  ;;  %v14242_v47 = vld [vmem:[%s18833_s0 + $0x3e0] sm:$0xff]  }
  0xd7   :  { %12217 = vmatpush3.bf16.msra.mxu0 %v14744_v15  ;;  %12259 = vmatpush3.bf16.msra.mxu1 %v14744_v15 }
  0xd8   :  { %12146 = vmatprep.mubr.msk.bf16.mxu0 %vm188_vm0, %v14221_v49  ;;  %12188 = vmatprep.mubr.msk.bf16.mxu1 %vm188_vm0, %v14222_v50 }
  0xd9   :  { %12218 = vmatprep.subr.bf16.mxu0 %v14759_v18  ;;  %12260 = vmatprep.subr.bf16.mxu1 %v14759_v18 }
  0xdb   :  { %12219 = vmatpush3.bf16.msra.mxu0 %v14759_v18  ;;  %12261 = vmatpush3.bf16.msra.mxu1 %v14759_v18 }
  0xdc   :  { %12220 = vmatprep.subr.bf16.mxu0 %v14774_v21  ;;  %12262 = vmatprep.subr.bf16.mxu1 %v14774_v21 }
  0xde   :  { %12147 = vmatmul.mubr.msk.bf16.gmra.mrb[100].mxu0 %vm188_vm0, %v14223_v51  ;;  %12189 = vmatmul.mubr.msk.bf16.gmra.mrb[100].mxu1 %vm188_vm0, %v14224_v52 }
  0xdf   :  { %12150 = vmatprep.mubr.msk.bf16.mxu0 %vm188_vm0, %v14225_v53  ;;  %12192 = vmatprep.mubr.msk.bf16.mxu1 %vm188_vm0, %v14226_v54 }
  0xe0   :  { %12221 = vmatpush3.bf16.msra.mxu0 %v14774_v21  ;;  %12263 = vmatpush3.bf16.msra.mxu1 %v14774_v21 }
  0xe1   :  { %12222 = vmatprep.subr.bf16.mxu0 %v14799_v26  ;;  %12264 = vmatprep.subr.bf16.mxu1 %v14799_v26 }
  0xe4   :  { %12223 = vmatpush3.bf16.msra.mxu0 %v14799_v26  ;;  %12265 = vmatpush3.bf16.msra.mxu1 %v14799_v26 }
  0xe5   :  { %12224 = vmatprep.subr.bf16.mxu0 %v14421_v9  ;;  %12266 = vmatprep.subr.bf16.mxu1 %v14421_v9 }
  0xe6   :  { %12151 = vmatmul.mubr.msk.bf16.gmra.mrb[104].mxu0 %vm188_vm0, %v14227_v55  ;;  %12193 = vmatmul.mubr.msk.bf16.gmra.mrb[104].mxu1 %vm188_vm0, %v14228_v56 }
  0xe7   :  { %12154 = vmatprep.mubr.msk.bf16.mxu0 %vm188_vm0, %v14229_v57  ;;  %12196 = vmatprep.mubr.msk.bf16.mxu1 %vm188_vm0, %v14230_v58 }
  0xe8   :  { %12225 = vmatpush3.bf16.msra.mxu0 %v14421_v9  ;;  %12267 = vmatpush3.bf16.msra.mxu1 %v14421_v9 }
  0xe9   :  { %v11892_v59 = vpop.f32.mrb[0].mxu0  ;;  %v11934_v60 = vpop.f32.mrb[0].mxu1  ;;  %12300 = vmatprep.subr.bf16.mxu0 %v14744_v15  ;;  %12342 = vmatprep.subr.bf16.mxu1 %v14744_v15 }
  0xea   :  { %v277_v61 = vpop.f32.mrb[1].mxu0  ;;  %v679_v62 = vpop.f32.mrb[1].mxu1  ;;  %v14996_v23 = vsel %vm404_vm2, %v11892_v59, -inf  ;;  %v14999_v24 = vsel %vm404_vm2, %v11934_v60, -inf }
  0xeb   :  { %v11893_v1 = vpop.f32.mrb[2].mxu0  ;;  %v11935_v2 = vpop.f32.mrb[2].mxu1  ;;  %v15008_v28 = vsel %vm404_vm2, %v277_v61, -inf  ;;  %v15011_v29 = vsel %vm404_vm2, %v679_v62, -inf  ;;  %v14243_v62 = vld [vmem:[%s18833_s0 + $0x368] sm:$0xff]  }
  0xec   :  { %v280_v5 = vpop.f32.mrb[3].mxu0  ;;  %v682_v6 = vpop.f32.mrb[3].mxu1  ;;  %v15014_v30 = vsel %vm404_vm2, %v11893_v1, -inf  ;;  %v15017_v31 = vsel %vm404_vm2, %v11935_v2, -inf }
  0xed   :  { %v15020_v34 = vsel %vm404_vm2, %v280_v5, -inf  ;;  %v15023_v35 = vsel %vm404_vm2, %v682_v6, -inf }
  0xee   :  { %12155 = vmatmul.mubr.msk.bf16.gmra.mrb[108].mxu0 %vm188_vm0, %v14231_v63  ;;  %12197 = vmatmul.mubr.msk.bf16.gmra.mrb[108].mxu1 %vm188_vm0, %v14232_v0  ;;  %v14244_v63 = vld [vmem:[%s18833_s0 + $0x3e8] sm:$0xff]  }
  0xef   :  { %12158 = vmatprep.mubr.msk.bf16.mxu0 %vm188_vm0, %v14233_v3  ;;  %12200 = vmatprep.mubr.msk.bf16.mxu1 %vm188_vm0, %v14234_v4 }
  0xf1   :  { %v11896_v7 = vpop.f32.mrb[4].mxu0  ;;  %v11938_v8 = vpop.f32.mrb[4].mxu1 }
  0xf2   :  { %v293_v10 = vpop.f32.mrb[5].mxu0  ;;  %v695_v11 = vpop.f32.mrb[5].mxu1  ;;  %v15076_v60 = vsel %vm404_vm2, %v11896_v7, -inf  ;;  %v15079_v61 = vsel %vm404_vm2, %v11938_v8, -inf }
  0xf3   :  { %v11897_v14 = vpop.f32.mrb[6].mxu0  ;;  %v11939_v16 = vpop.f32.mrb[6].mxu1  ;;  %v15088_v0 = vsel %vm404_vm2, %v293_v10, -inf  ;;  %v15091_v1 = vsel %vm404_vm2, %v695_v11, -inf }
  0xf4   :  { %v296_v20 = vpop.f32.mrb[7].mxu0  ;;  %v698_v22 = vpop.f32.mrb[7].mxu1  ;;  %v15094_v2 = vsel %vm404_vm2, %v11897_v14, -inf  ;;  %v15097_v3 = vsel %vm404_vm2, %v11939_v16, -inf }
  0xf5   :  { %v15100_v6 = vsel %vm404_vm2, %v296_v20, -inf  ;;  %v15103_v7 = vsel %vm404_vm2, %v698_v22, -inf  ;;  %v14245_v22 = vld [vmem:[%s18833_s0 + $0x370] sm:$0xff]  }
  0xf6   :  { %12159 = vmatmul.mubr.msk.bf16.gmra.mrb[112].mxu0 %vm188_vm0, %v14235_v12  ;;  %12201 = vmatmul.mubr.msk.bf16.gmra.mrb[112].mxu1 %vm188_vm0, %v14236_v13 }
  0xf7   :  { %12162 = vmatprep.mubr.msk.bf16.mxu0 %vm188_vm0, %v14237_v17  ;;  %12204 = vmatprep.mubr.msk.bf16.mxu1 %vm188_vm0, %v14238_v19 }
  0xf9   :  { %v11900_v32 = vpop.f32.mrb[8].mxu0  ;;  %v11942_v33 = vpop.f32.mrb[8].mxu1 }
  0xfa   :  { %v15026_v36 = vsel %vm404_vm2, %v11900_v32, -inf  ;;  %v15029_v37 = vsel %vm404_vm2, %v11942_v33, -inf  ;;  %v309_v38 = vpop.f32.mrb[9].mxu0  ;;  %v711_v39 = vpop.f32.mrb[9].mxu1 }
  0xfb   :  { %v421_v40 = vmax.f32 %v14996_v23, %v15026_v36  ;;  %v822_v41 = vmax.f32 %v14999_v24, %v15029_v37  ;;  %v15036_v42 = vsel %vm404_vm2, %v309_v38, -inf  ;;  %v15039_v43 = vsel %vm404_vm2, %v711_v39, -inf  ;;  %v11901_v44 = vpop.f32.mrb[10].mxu0  ;;  %v11943_v45 = vpop.f32.mrb[10].mxu1  ;;  %v14250_v23 = vld [vmem:[%s18833_s0 + $0x480] sm:$0xff]  }
  0xfc   :  { %v407_v48 = vmax.f32 %v15008_v28, %v15036_v42  ;;  %v808_v49 = vmax.f32 %v15011_v29, %v15039_v43  ;;  %v15052_v50 = vsel %vm404_vm2, %v11901_v44, -inf  ;;  %v15055_v51 = vsel %vm404_vm2, %v11943_v45, -inf  ;;  %v312_v52 = vpop.f32.mrb[11].mxu0  ;;  %v714_v53 = vpop.f32.mrb[11].mxu1 }
  0xfd   :  { %v428_v54 = vmax.f32 %v15014_v30, %v15052_v50  ;;  %v829_v55 = vmax.f32 %v15017_v31, %v15055_v51  ;;  %v15062_v56 = vsel %vm404_vm2, %v312_v52, -inf  ;;  %v15065_v57 = vsel %vm404_vm2, %v714_v53, -inf }
  0xfe   :  { %v414_v58 = vmax.f32 %v15020_v34, %v15062_v56  ;;  %v815_v59 = vmax.f32 %v15023_v35, %v15065_v57  ;;  %12163 = vmatmul.mubr.msk.bf16.gmra.mrb[116].mxu0 %vm188_vm0, %v14239_v25  ;;  %12205 = vmatmul.mubr.msk.bf16.gmra.mrb[116].mxu1 %vm188_vm0, %v14240_v27  ;;  %v14246_v25 = vld [vmem:[%s18833_s0 + $0x3f0] sm:$0xff]   ;;  %v14251_v35 = vld [vmem:[%s18833_s0 + $0x408] sm:$0xff]  }
  0xff   :  { %12166 = vmatprep.mubr.msk.bf16.mxu0 %vm188_vm0, %v14241_v46  ;;  %12208 = vmatprep.mubr.msk.bf16.mxu1 %vm188_vm0, %v14242_v47 }
 0x101   :  { %v11904_v4 = vpop.f32.mrb[12].mxu0  ;;  %v11946_v5 = vpop.f32.mrb[12].mxu1 }
 0x102   :  { %v15106_v8 = vsel %vm404_vm2, %v11904_v4, -inf  ;;  %v15109_v10 = vsel %vm404_vm2, %v11946_v5, -inf  ;;  %v325_v11 = vpop.f32.mrb[13].mxu0  ;;  %v727_v12 = vpop.f32.mrb[13].mxu1 }
 0x103   :  { %v449_v13 = vmax.f32 %v15076_v60, %v15106_v8  ;;  %v850_v14 = vmax.f32 %v15079_v61, %v15109_v10  ;;  %v15116_v16 = vsel %vm404_vm2, %v325_v11, -inf  ;;  %v15119_v17 = vsel %vm404_vm2, %v727_v12, -inf  ;;  %v11905_v19 = vpop.f32.mrb[14].mxu0  ;;  %v11947_v20 = vpop.f32.mrb[14].mxu1  ;;  %v14253_v61 = vld [vmem:[%s18833_s0 + $0x410] sm:$0xff]  }
 0x104   :  { %v435_v27 = vmax.f32 %v15088_v0, %v15116_v16  ;;  %v836_v32 = vmax.f32 %v15091_v1, %v15119_v17  ;;  %v15132_v33 = vsel %vm404_vm2, %v11905_v19, -inf  ;;  %v15135_v38 = vsel %vm404_vm2, %v11947_v20, -inf  ;;  %v328_v39 = vpop.f32.mrb[15].mxu0  ;;  %v730_v44 = vpop.f32.mrb[15].mxu1  ;;  %v14247_v17 = vld [vmem:[%s18833_s0 + $0x378] sm:$0xff]   ;;  %v14254_v10 = vld [vmem:[%s18833_s0 + $0x490] sm:$0xff]  }
 0x105   :  { %v456_v45 = vmax.f32 %v15094_v2, %v15132_v33  ;;  %v857_v46 = vmax.f32 %v15097_v3, %v15135_v38  ;;  %v15142_v47 = vsel %vm404_vm2, %v328_v39, -inf  ;;  %v15145_v52 = vsel %vm404_vm2, %v730_v44, -inf  ;;  %v14249_v44 = vld [vmem:[%s18833_s0 + $0x400] sm:$0xff]  }
 0x106   :  { %v442_v53 = vmax.f32 %v15100_v6, %v15142_v47  ;;  %v843_v0 = vmax.f32 %v15103_v7, %v15145_v52  ;;  %12167 = vmatmul.mubr.msk.bf16.gmra.mrb[120].mxu0 %vm188_vm0, %v14243_v62  ;;  %12209 = vmatmul.mubr.msk.bf16.gmra.mrb[120].mxu1 %vm188_vm0, %v14244_v63  ;;  %v14248_v62 = vld [vmem:[%s18833_s0 + $0x3f8] sm:$0xff]   ;;  %v15282_v3 = vld [vmem:[%s18834_s2] ss:$0 sm:$0xff] }
 0x107   :  { %12170 = vmatprep.mubr.msk.bf16.mxu0 %vm188_vm0, %v14245_v22  ;;  %12212 = vmatprep.mubr.msk.bf16.mxu1 %vm188_vm0, %v14246_v25  ;;  %v14256_v47 = vld [vmem:[%s18833_s0 + $0x498] sm:$0xff]  }
 0x109   :  { %v11908_v1 = vpop.f32.mrb[16].mxu0  ;;  %v11950_v4 = vpop.f32.mrb[16].mxu1 }
 0x10a   :  { %v422_v5 = vsel %vm404_vm2, %v11908_v1, -inf  ;;  %v823_v11 = vsel %vm404_vm2, %v11950_v4, -inf  ;;  %v341_v12 = vpop.f32.mrb[17].mxu0  ;;  %v743_v16 = vpop.f32.mrb[17].mxu1 }
 0x10b   :  { %v15166_v63 = vmax.f32 %v421_v40, %v422_v5  ;;  %v15171_v19 = vmax.f32 %v822_v41, %v823_v11  ;;  %v408_v20 = vsel %vm404_vm2, %v341_v12, -inf  ;;  %v809_v22 = vsel %vm404_vm2, %v743_v16, -inf  ;;  %v11909_v25 = vpop.f32.mrb[18].mxu0  ;;  %v11951_v39 = vpop.f32.mrb[18].mxu1 }
 0x10c   :  { %v15184_v24 = vmax.f32 %v407_v48, %v408_v20  ;;  %v15189_v36 = vmax.f32 %v808_v49, %v809_v22  ;;  %v429_v37 = vsel %vm404_vm2, %v11909_v25, -inf  ;;  %v830_v40 = vsel %vm404_vm2, %v11951_v39, -inf  ;;  %v344_v41 = vpop.f32.mrb[19].mxu0  ;;  %v746_v1 = vpop.f32.mrb[19].mxu1  ;;  %v14257_v39 = vld [vmem:[%s18833_s0 + $0x420] sm:$0xff]  }
 0x10d   :  { %v15196_v4 = vmax.f32 %v428_v54, %v429_v37  ;;  %v15201_v28 = vmax.f32 %v829_v55, %v830_v40  ;;  %v415_v29 = vsel %vm404_vm2, %v344_v41, -inf  ;;  %v816_v42 = vsel %vm404_vm2, %v746_v1, -inf  ;;  %v14252_v54 = vld [vmem:[%s18833_s0 + $0x488] sm:$0xff]  }
 0x10e   :  { %v15208_v43 = vmax.f32 %v414_v58, %v415_v29  ;;  %v15213_v30 = vmax.f32 %v815_v59, %v816_v42  ;;  %12171 = vmatmul.mubr.msk.bf16.gmra.mrb[124].mxu0 %vm188_vm0, %v14247_v17  ;;  %12213 = vmatmul.mubr.msk.bf16.gmra.mrb[124].mxu1 %vm188_vm0, %v14248_v62 }
 0x10f   :  { %12226 = vmatprep.mubr.msk.bf16.mxu0 %vm188_vm0, %v14249_v44  ;;  %12268 = vmatprep.mubr.msk.bf16.mxu1 %vm188_vm0, %v14250_v23 }
 0x111   :  { %v11912_v31 = vpop.f32.mrb[20].mxu0  ;;  %v11954_v48 = vpop.f32.mrb[20].mxu1 }
 0x112   :  { %v450_v49 = vsel %vm404_vm2, %v11912_v31, -inf  ;;  %v851_v34 = vsel %vm404_vm2, %v11954_v48, -inf  ;;  %v357_v50 = vpop.f32.mrb[21].mxu0  ;;  %v759_v51 = vpop.f32.mrb[21].mxu1 }
 0x113   :  { %v15230_v55 = vmax.f32 %v449_v13, %v450_v49  ;;  %v15235_v56 = vmax.f32 %v850_v14, %v851_v34  ;;  %v436_v57 = vsel %vm404_vm2, %v357_v50, -inf  ;;  %v837_v58 = vsel %vm404_vm2, %v759_v51, -inf  ;;  %v11913_v59 = vpop.f32.mrb[22].mxu0  ;;  %v11955_v5 = vpop.f32.mrb[22].mxu1  ;;  %v4930_v49 = vld [vmem:[%s18835_s3] sm:$0xff] }
 0x114   :  { %v15239_v11 = vmax.f32 %v435_v27, %v436_v57  ;;  %v15241_v12 = vmax.f32 %v836_v32, %v837_v58  ;;  %v457_v16 = vsel %vm404_vm2, %v11913_v59, -inf  ;;  %v858_v60 = vsel %vm404_vm2, %v11955_v5, -inf  ;;  %v360_v8 = vpop.f32.mrb[23].mxu0  ;;  %v762_v13 = vpop.f32.mrb[23].mxu1 }
 0x115   :  { %v15254_v14 = vmax.f32 %v456_v45, %v457_v16  ;;  %v15259_v27 = vmax.f32 %v857_v46, %v858_v60  ;;  %v443_v32 = vsel %vm404_vm2, %v360_v8, -inf  ;;  %v844_v17 = vsel %vm404_vm2, %v762_v13, -inf  ;;  %v14255_v46 = vld [vmem:[%s18833_s0 + $0x418] sm:$0xff]  }
 0x116   :  { %v15266_v62 = vmax.f32 %v442_v53, %v443_v32  ;;  %v15271_v2 = vmax.f32 %v843_v0, %v844_v17  ;;  %12227 = vmatmul.mubr.msk.bf16.vlgmr.msra.gmra.mrb[128].mxu0 %vm188_vm0, %v14251_v35  ;;  %12269 = vmatmul.mubr.msk.bf16.vlgmr.msra.gmra.mrb[128].mxu1 %vm188_vm0, %v14252_v54  ;;  %v14259_v32 = vld [vmem:[%s18833_s0 + $0x428] sm:$0xff]  }
 0x117   :  { %12301 = vmatpush3.bf16.msra.mxu0 %v14744_v15  ;;  %12343 = vmatpush3.bf16.msra.mxu1 %v14744_v15 }
 0x118   :  { %12230 = vmatprep.mubr.msk.bf16.mxu0 %vm188_vm0, %v14253_v61  ;;  %12272 = vmatprep.mubr.msk.bf16.mxu1 %vm188_vm0, %v14254_v10 }
 0x119   :  { %v11916_v6 = vpop.f32.mrb[24].mxu0  ;;  %v11958_v7 = vpop.f32.mrb[24].mxu1  ;;  %12302 = vmatprep.subr.bf16.mxu0 %v14759_v18  ;;  %12344 = vmatprep.subr.bf16.mxu1 %v14759_v18 }
 0x11a   :  { %v424_v33 = vsel %vm404_vm2, %v11916_v6, -inf  ;;  %v825_v38 = vsel %vm404_vm2, %v11958_v7, -inf  ;;  %v373_v15 = vpop.f32.mrb[25].mxu0  ;;  %v775_v45 = vpop.f32.mrb[25].mxu1 }
 0x11b   :  { %v425_v52 = vmax.f32 %v15166_v63, %v424_v33  ;;  %v826_v53 = vmax.f32 %v15171_v19, %v825_v38  ;;  %v410_v0 = vsel %vm404_vm2, %v373_v15, -inf  ;;  %v811_v20 = vsel %vm404_vm2, %v775_v45, -inf  ;;  %v11917_v22 = vpop.f32.mrb[26].mxu0  ;;  %v11959_v25 = vpop.f32.mrb[26].mxu1  ;;  %12303 = vmatpush3.bf16.msra.mxu0 %v14759_v18  ;;  %12345 = vmatpush3.bf16.msra.mxu1 %v14759_v18  ;;  %v14258_v63 = vld [vmem:[%s18833_s0 + $0x4a0] sm:$0xff]   ;;  %v14260_v45 = vld [vmem:[%s18833_s0 + $0x4a8] sm:$0xff]  }
 0x11c   :  { %v411_v19 = vmax.f32 %v15184_v24, %v410_v0  ;;  %v812_v44 = vmax.f32 %v15189_v36, %v811_v20  ;;  %v431_v23 = vsel %vm404_vm2, %v11917_v22, -inf  ;;  %v832_v37 = vsel %vm404_vm2, %v11959_v25, -inf  ;;  %v376_v40 = vpop.f32.mrb[27].mxu0  ;;  %v778_v41 = vpop.f32.mrb[27].mxu1  ;;  %12304 = vmatprep.subr.bf16.mxu0 %v14774_v21  ;;  %12346 = vmatprep.subr.bf16.mxu1 %v14774_v21  ;;  %v14262_v20 = vld [vmem:[%s18833_s0 + $0x4b0] sm:$0xff]  }
 0x11d   :  { %v463_v18 = vadd.f32 %v15282_v3, %v425_v52  ;;  %v864_v1 = vadd.f32 %v15282_v3, %v826_v53  ;;  %v432_v29 = vmax.f32 %v15196_v4, %v431_v23  ;;  %v833_v24 = vmax.f32 %v15201_v28, %v832_v37  ;;  %v4931_v4 = vld [vmem:[%s18835_s3 + $0x8] sm:$0xff] }
 0x11e   :  { %v461_v36 = vadd.f32 %v15282_v3, %v411_v19  ;;  %v862_v42 = vadd.f32 %v15282_v3, %v812_v44  ;;  %v417_v31 = vsel %vm404_vm2, %v376_v40, -inf  ;;  %v818_v48 = vsel %vm404_vm2, %v778_v41, -inf  ;;  %12231 = vmatmul.mubr.msk.bf16.gmra.mrb[132].mxu0 %vm188_vm0, %v14255_v46  ;;  %12273 = vmatmul.mubr.msk.bf16.gmra.mrb[132].mxu1 %vm188_vm0, %v14256_v47  ;;  %v14261_v46 = vld [vmem:[%s18833_s0 + $0x430] sm:$0xff]  }
 0x11f   :  { %v471_v28 = vmax.f32 %v463_v18, 0.0  ;;  %v872_v34 = vmax.f32 %v864_v1, 0.0  ;;  %v464_v50 = vadd.f32 %v15282_v3, %v432_v29  ;;  %v865_v51 = vadd.f32 %v15282_v3, %v833_v24  ;;  %12234 = vmatprep.mubr.msk.bf16.mxu0 %vm188_vm0, %v14257_v39  ;;  %12276 = vmatprep.mubr.msk.bf16.mxu1 %vm188_vm0, %v14258_v63 }
 0x120   :  { %v469_v35 = vmax.f32 %v461_v36, 0.0  ;;  %v870_v54 = vmax.f32 %v862_v42, 0.0  ;;  %v418_v57 = vmax.f32 %v15208_v43, %v417_v31  ;;  %v819_v58 = vmax.f32 %v15213_v30, %v818_v48  ;;  %12305 = vmatpush3.bf16.msra.mxu0 %v14774_v21  ;;  %12347 = vmatpush3.bf16.msra.mxu1 %v14774_v21 }
 0x121   :  { %479 = vst.msk [vmem:[#allocation2 + $0x10] sm:$0xff] %vm404_vm2, %v471_v28  ;;  %881 = vst.msk [vmem:[#allocation2 + $0x50] sm:$0xff] %vm404_vm2, %v872_v34  ;;  %v472_v59 = vmax.f32 %v464_v50, 0.0  ;;  %v873_v5 = vmax.f32 %v865_v51, 0.0  ;;  %v11920_v16 = vpop.f32.mrb[28].mxu0  ;;  %v11962_v60 = vpop.f32.mrb[28].mxu1  ;;  %12306 = vmatprep.subr.bf16.mxu0 %v14799_v26  ;;  %12348 = vmatprep.subr.bf16.mxu1 %v14799_v26  ;;  %v15340_v8 = vpack.c.bf16 %v4931_v4, %v4930_v49 }
 0x122   :  { %477 = vst.msk [vmem:[#allocation2] sm:$0xff] %vm404_vm2, %v469_v35  ;;  %879 = vst.msk [vmem:[#allocation2 + $0x40] sm:$0xff] %vm404_vm2, %v870_v54  ;;  %v462_v21 = vadd.f32 %v15282_v3, %v418_v57  ;;  %v863_v43 = vadd.f32 %v15282_v3, %v819_v58  ;;  %v452_v30 = vsel %vm404_vm2, %v11920_v16, -inf  ;;  %v853_v13 = vsel %vm404_vm2, %v11962_v60, -inf  ;;  %v389_v61 = vpop.f32.mrb[29].mxu0  ;;  %v791_v10 = vpop.f32.mrb[29].mxu1 }
 0x123   :  { %480 = vst.msk [vmem:[#allocation2 + $0x18] sm:$0xff] %vm404_vm2, %v472_v59  ;;  %882 = vst.msk [vmem:[#allocation2 + $0x58] sm:$0xff] %vm404_vm2, %v873_v5  ;;  %v453_v17 = vmax.f32 %v15230_v55, %v452_v30  ;;  %v854_v6 = vmax.f32 %v15235_v56, %v853_v13  ;;  %v438_v7 = vsel %vm404_vm2, %v389_v61, -inf  ;;  %v839_v33 = vsel %vm404_vm2, %v791_v10, -inf  ;;  %v11921_v38 = vpop.f32.mrb[30].mxu0  ;;  %v11963_v15 = vpop.f32.mrb[30].mxu1 }
 0x124   :  { %v470_v47 = vmax.f32 %v462_v21, 0.0  ;;  %v871_v52 = vmax.f32 %v863_v43, 0.0  ;;  %v439_v55 = vmax.f32 %v15239_v11, %v438_v7  ;;  %v840_v56 = vmax.f32 %v15241_v12, %v839_v33  ;;  %v392_v53 = vpop.f32.mrb[31].mxu0  ;;  %v794_v0 = vpop.f32.mrb[31].mxu1  ;;  %12307 = vmatpush3.bf16.msra.mxu0 %v14799_v26  ;;  %12349 = vmatpush3.bf16.msra.mxu1 %v14799_v26  ;;  %v14264_v34 = vld [vmem:[%s18833_s0 + $0x4b8] sm:$0xff]   ;;  %v14265_v50 = vld [vmem:[%s18833_s0 + $0x440] sm:$0xff]  }
 0x125   :  { %v467_v22 = vadd.f32 %v15282_v3, %v453_v17  ;;  %v868_v25 = vadd.f32 %v15282_v3, %v854_v6  ;;  %v459_v39 = vsel %vm404_vm2, %v11921_v38, -inf  ;;  %v860_v11 = vsel %vm404_vm2, %v11963_v15, -inf  ;;  %12308 = vmatprep.subr.bf16.mxu0 %v14421_v9  ;;  %12350 = vmatprep.subr.bf16.mxu1 %v14421_v9  ;;  %v14266_v54 = vld [vmem:[%s18833_s0 + $0x4c0] sm:$0xff]   ;;  %v14267_v21 = vld [vmem:[%s18833_s0 + $0x448] sm:$0xff]   ;;  %v14269_v61 = vld [vmem:[%s18833_s0 + $0x450] sm:$0xff]  }
 0x126   :  { %478 = vst.msk [vmem:[#allocation2 + $0x8] sm:$0xff] %vm404_vm2, %v470_v47  ;;  %880 = vst.msk [vmem:[#allocation2 + $0x48] sm:$0xff] %vm404_vm2, %v871_v52  ;;  %v465_v12 = vadd.f32 %v15282_v3, %v439_v55  ;;  %v866_v26 = vadd.f32 %v15282_v3, %v840_v56  ;;  %v460_v63 = vmax.f32 %v15254_v14, %v459_v39  ;;  %12235 = vmatmul.mubr.msk.bf16.gmra.mrb[136].mxu0 %vm188_vm0, %v14259_v32  ;;  %v14268_v13 = vld [vmem:[%s18833_s0 + $0x4c8] sm:$0xff]   ;;  %v14270_v17 = vld [vmem:[%s18833_s0 + $0x4d0] sm:$0xff]  }
 0x127   :  { %v861_v19 = vmax.f32 %v15259_v27, %v860_v11  ;;  %v475_v44 = vmax.f32 %v467_v22, 0.0  ;;  %v876_v23 = vmax.f32 %v868_v25, 0.0  ;;  %v445_v37 = vsel %vm404_vm2, %v392_v53, -inf  ;;  %12277 = vmatmul.mubr.msk.bf16.gmra.mrb[136].mxu1 %vm188_vm0, %v14260_v45  ;;  %12238 = vmatprep.mubr.msk.bf16.mxu0 %vm188_vm0, %v14261_v46  ;;  %v14271_v33 = vld [vmem:[%s18833_s0 + $0x458] sm:$0xff]  }
 0x128   :  { %v846_v40 = vsel %vm404_vm2, %v794_v0, -inf  ;;  %v473_v41 = vmax.f32 %v465_v12, 0.0  ;;  %v874_v18 = vmax.f32 %v866_v26, 0.0  ;;  %v468_v1 = vadd.f32 %v15282_v3, %v460_v63  ;;  %12280 = vmatprep.mubr.msk.bf16.mxu1 %vm188_vm0, %v14262_v20  ;;  %12309 = vmatpush3.bf16.msra.mxu0 %v14421_v9 }
 0x129   :  { %v869_v14 = vadd.f32 %v15282_v3, %v861_v19  ;;  %483 = vst.msk [vmem:[#allocation2 + $0x30] sm:$0xff] %vm404_vm2, %v475_v44  ;;  %885 = vst.msk [vmem:[#allocation2 + $0x70] sm:$0xff] %vm404_vm2, %v876_v23  ;;  %v446_v27 = vmax.f32 %v15266_v62, %v445_v37  ;;  %v847_v29 = vmax.f32 %v15271_v2, %v846_v40  ;;  %v11976_v24 = vpop.f32.mrb[32].mxu0  ;;  %v12018_v36 = vpop.f32.mrb[32].mxu1  ;;  %12351 = vmatpush3.bf16.msra.mxu1 %v14421_v9  ;;  %v14263_v62 = vld [vmem:[%s18833_s0 + $0x438] sm:$0xff]   ;;  %v14273_v44 = vld [vmem:[%s18833_s0 + $0x460] sm:$0xff]  }
 0x12a   :  { %13284 = vmatprep.subr.bf16.mxu0 %v15340_v8  ;;  %481 = vst.msk [vmem:[#allocation2 + $0x20] sm:$0xff] %vm404_vm2, %v473_v41  ;;  %883 = vst.msk [vmem:[#allocation2 + $0x60] sm:$0xff] %vm404_vm2, %v874_v18  ;;  %v476_v42 = vmax.f32 %v468_v1, 0.0  ;;  %v1081_v48 = vpop.f32.mrb[33].mxu0  ;;  %v1483_v49 = vpop.f32.mrb[33].mxu1  ;;  %13384 = vmatprep.subr.bf16.mxu1 %v15340_v8  ;;  %v15438_v6 = vsel %vm404_vm2, %v11976_v24, -inf }
 0x12b   :  { %v877_v31 = vmax.f32 %v869_v14, 0.0  ;;  %v466_v2 = vadd.f32 %v15282_v3, %v446_v27  ;;  %v867_v9 = vadd.f32 %v15282_v3, %v847_v29  ;;  %v11977_v4 = vpop.f32.mrb[34].mxu0  ;;  %v12019_v28 = vpop.f32.mrb[34].mxu1  ;;  %v15441_v7 = vsel %vm404_vm2, %v12018_v36, -inf  ;;  %v14272_v19 = vld [vmem:[%s18833_s0 + $0x4d8] sm:$0xff]   ;;  %v14274_v14 = vld [vmem:[%s18833_s0 + $0x4e0] sm:$0xff]  }
 0x12c   :  { %484 = vst.msk [vmem:[#allocation2 + $0x38] sm:$0xff] %vm404_vm2, %v476_v42  ;;  %v1084_v51 = vpop.f32.mrb[35].mxu0  ;;  %v1486_v35 = vpop.f32.mrb[35].mxu1  ;;  %v15448_v38 = vsel %vm404_vm2, %v1081_v48, -inf  ;;  %v15451_v15 = vsel %vm404_vm2, %v1483_v49, -inf  ;;  %v15454_v45 = vsel %vm404_vm2, %v11977_v4, -inf }
 0x12d   :  { %886 = vst.msk [vmem:[#allocation2 + $0x78] sm:$0xff] %vm404_vm2, %v877_v31  ;;  %v474_v57 = vmax.f32 %v466_v2, 0.0  ;;  %v875_v58 = vmax.f32 %v867_v9, 0.0  ;;  %v15457_v46 = vsel %vm404_vm2, %v12019_v28, -inf  ;;  %v15460_v55 = vsel %vm404_vm2, %v1084_v51, -inf }
 0x12e   :  { %12239 = vmatmul.mubr.msk.bf16.gmra.mrb[140].mxu0 %vm188_vm0, %v14263_v62  ;;  %v15463_v56 = vsel %vm404_vm2, %v1486_v35, -inf  ;;  %v14275_v62 = vld [vmem:[%s18833_s0 + $0x468] sm:$0xff]  }
 0x12f   :  { %482 = vst.msk [vmem:[#allocation2 + $0x28] sm:$0xff] %vm404_vm2, %v474_v57  ;;  %884 = vst.msk [vmem:[#allocation2 + $0x68] sm:$0xff] %vm404_vm2, %v875_v58  ;;  %12281 = vmatmul.mubr.msk.bf16.gmra.mrb[140].mxu1 %vm188_vm0, %v14264_v34  ;;  %12242 = vmatprep.mubr.msk.bf16.mxu0 %vm188_vm0, %v14265_v50 }
 0x130   :  { %12284 = vmatprep.mubr.msk.bf16.mxu1 %vm188_vm0, %v14266_v54 }
 0x131   :  { %v11980_v59 = vpop.f32.mrb[36].mxu0  ;;  %v12022_v5 = vpop.f32.mrb[36].mxu1 }
 0x132   :  { %v1097_v16 = vpop.f32.mrb[37].mxu0  ;;  %v1499_v60 = vpop.f32.mrb[37].mxu1  ;;  %v15518_v48 = vsel %vm404_vm2, %v11980_v59, -inf  ;;  %v15521_v49 = vsel %vm404_vm2, %v12022_v5, -inf }
 0x133   :  { %v11981_v43 = vpop.f32.mrb[38].mxu0  ;;  %v12023_v30 = vpop.f32.mrb[38].mxu1  ;;  %v15528_v2 = vsel %vm404_vm2, %v1097_v16, -inf  ;;  %v15531_v9 = vsel %vm404_vm2, %v1499_v60, -inf }
 0x134   :  { %v1100_v10 = vpop.f32.mrb[39].mxu0  ;;  %v1502_v32 = vpop.f32.mrb[39].mxu1  ;;  %v15534_v4 = vsel %vm404_vm2, %v11981_v43, -inf  ;;  %v15537_v28 = vsel %vm404_vm2, %v12023_v30, -inf }
 0x135   :  { %v15540_v51 = vsel %vm404_vm2, %v1100_v10, -inf  ;;  %v15543_v35 = vsel %vm404_vm2, %v1502_v32, -inf }
 0x136   :  { %12243 = vmatmul.mubr.msk.bf16.gmra.mrb[144].mxu0 %vm188_vm0, %v14267_v21 }
 0x137   :  { %12285 = vmatmul.mubr.msk.bf16.gmra.mrb[144].mxu1 %vm188_vm0, %v14268_v13  ;;  %12246 = vmatprep.mubr.msk.bf16.mxu0 %vm188_vm0, %v14269_v61  ;;  %v14276_v13 = vld [vmem:[%s18833_s0 + $0x4e8] sm:$0xff]   ;;  %v14277_v61 = vld [vmem:[%s18833_s0 + $0x470] sm:$0xff]  }
 0x138   :  { %12288 = vmatprep.mubr.msk.bf16.mxu1 %vm188_vm0, %v14270_v17 }
 0x139   :  { %v11984_v47 = vpop.f32.mrb[40].mxu0  ;;  %v12026_v52 = vpop.f32.mrb[40].mxu1 }
 0x13a   :  { %v15466_v53 = vsel %vm404_vm2, %v11984_v47, -inf  ;;  %v15469_v0 = vsel %vm404_vm2, %v12026_v52, -inf  ;;  %v1113_v20 = vpop.f32.mrb[41].mxu0  ;;  %v1515_v22 = vpop.f32.mrb[41].mxu1 }
 0x13b   :  { %v1224_v25 = vmax.f32 %v15438_v6, %v15466_v53  ;;  %v1626_v39 = vmax.f32 %v15441_v7, %v15469_v0  ;;  %v15476_v11 = vsel %vm404_vm2, %v1113_v20, -inf  ;;  %v15479_v12 = vsel %vm404_vm2, %v1515_v22, -inf  ;;  %v11985_v26 = vpop.f32.mrb[42].mxu0  ;;  %v12027_v63 = vpop.f32.mrb[42].mxu1  ;;  %v14278_v20 = vld [vmem:[%s18833_s0 + $0x4f0] sm:$0xff]   ;;  %v14281_v6 = vld [vmem:[%s18833_s0 + $0x500] sm:$0xff]  }
 0x13c   :  { %v1210_v23 = vmax.f32 %v15448_v38, %v15476_v11  ;;  %v1612_v37 = vmax.f32 %v15451_v15, %v15479_v12  ;;  %v15492_v40 = vsel %vm404_vm2, %v11985_v26, -inf  ;;  %v15495_v41 = vsel %vm404_vm2, %v12027_v63, -inf  ;;  %v1116_v18 = vpop.f32.mrb[43].mxu0  ;;  %v1518_v1 = vpop.f32.mrb[43].mxu1 }
 0x13d   :  { %v1231_v27 = vmax.f32 %v15454_v45, %v15492_v40  ;;  %v1633_v29 = vmax.f32 %v15457_v46, %v15495_v41  ;;  %v15505_v24 = vsel %vm404_vm2, %v1116_v18, -inf  ;;  %v15508_v36 = vsel %vm404_vm2, %v1518_v1, -inf  ;;  %v4932_v46 = vld [vmem:[%s18835_s3 + $0x10] sm:$0xff] }
 0x13e   :  { %v1217_v42 = vmax.f32 %v15460_v55, %v15505_v24  ;;  %v1619_v31 = vmax.f32 %v15463_v56, %v15508_v36  ;;  %12247 = vmatmul.mubr.msk.bf16.gmra.mrb[148].mxu0 %vm188_vm0, %v14271_v33  ;;  %v4933_v55 = vld [vmem:[%s18835_s3 + $0x18] sm:$0xff]  ;;  %v14283_v24 = vld [vmem:[%s18833_s0 + $0x508] sm:$0xff]  }
 0x13f   :  { %12289 = vmatmul.mubr.msk.bf16.gmra.mrb[148].mxu1 %vm188_vm0, %v14272_v19  ;;  %12250 = vmatprep.mubr.msk.bf16.mxu0 %vm188_vm0, %v14273_v44  ;;  %v13287_v36 = vpack.c.bf16 %v4933_v55, %v4932_v46  ;;  %v14290_v55 = vld [vmem:[%s18833_s0 + $0x5a0] sm:$0xff]  }
 0x140   :  { %12292 = vmatprep.mubr.msk.bf16.mxu1 %vm188_vm0, %v14274_v14 }
 0x141   :  { %v11988_v34 = vpop.f32.mrb[44].mxu0  ;;  %v12030_v50 = vpop.f32.mrb[44].mxu1 }
 0x142   :  { %v15546_v54 = vsel %vm404_vm2, %v11988_v34, -inf  ;;  %v15549_v57 = vsel %vm404_vm2, %v12030_v50, -inf  ;;  %v1129_v58 = vpop.f32.mrb[45].mxu0  ;;  %v1531_v59 = vpop.f32.mrb[45].mxu1 }
 0x143   :  { %v1252_v5 = vmax.f32 %v15518_v48, %v15546_v54  ;;  %v1654_v16 = vmax.f32 %v15521_v49, %v15549_v57  ;;  %v15556_v60 = vsel %vm404_vm2, %v1129_v58, -inf  ;;  %v15559_v21 = vsel %vm404_vm2, %v1531_v59, -inf  ;;  %v11989_v43 = vpop.f32.mrb[46].mxu0  ;;  %v12031_v30 = vpop.f32.mrb[46].mxu1 }
 0x144   :  { %v1238_v10 = vmax.f32 %v15528_v2, %v15556_v60  ;;  %v1640_v32 = vmax.f32 %v15531_v9, %v15559_v21  ;;  %v15572_v17 = vsel %vm404_vm2, %v11989_v43, -inf  ;;  %v15575_v33 = vsel %vm404_vm2, %v12031_v30, -inf  ;;  %v1132_v47 = vpop.f32.mrb[47].mxu0  ;;  %v1534_v52 = vpop.f32.mrb[47].mxu1  ;;  %v14279_v43 = vld [vmem:[%s18833_s0 + $0x478] sm:$0xff]  }
 0x145   :  { %v1259_v22 = vmax.f32 %v15534_v4, %v15572_v17  ;;  %v1661_v26 = vmax.f32 %v15537_v28, %v15575_v33  ;;  %v15585_v63 = vsel %vm404_vm2, %v1132_v47, -inf  ;;  %v15588_v19 = vsel %vm404_vm2, %v1534_v52, -inf  ;;  %v4935_v4 = vld [vmem:[%s18835_s3 + $0x28] sm:$0xff]  ;;  %v4936_v33 = vld [vmem:[%s18835_s3 + $0x30] sm:$0xff] }
 0x146   :  { %v1245_v44 = vmax.f32 %v15540_v51, %v15585_v63  ;;  %v1647_v18 = vmax.f32 %v15543_v35, %v15588_v19  ;;  %12251 = vmatmul.mubr.msk.bf16.gmra.mrb[152].mxu0 %vm188_vm0, %v14275_v62  ;;  %v4937_v51 = vld [vmem:[%s18835_s3 + $0x38] sm:$0xff] }
 0x147   :  { %12293 = vmatmul.mubr.msk.bf16.gmra.mrb[152].mxu1 %vm188_vm0, %v14276_v13  ;;  %12254 = vmatprep.mubr.msk.bf16.mxu0 %vm188_vm0, %v14277_v61 }
 0x148   :  { %12296 = vmatprep.mubr.msk.bf16.mxu1 %vm188_vm0, %v14278_v20  ;;  %v14280_v20 = vld [vmem:[%s18833_s0 + $0x4f8] sm:$0xff]  }
 0x149   :  { %v11992_v1 = vpop.f32.mrb[48].mxu0  ;;  %v12034_v14 = vpop.f32.mrb[48].mxu1 }
 0x14a   :  { %v1225_v34 = vsel %vm404_vm2, %v11992_v1, -inf  ;;  %v1627_v50 = vsel %vm404_vm2, %v12034_v14, -inf  ;;  %v1145_v58 = vpop.f32.mrb[49].mxu0  ;;  %v1547_v59 = vpop.f32.mrb[49].mxu1  ;;  %v14282_v14 = vld [vmem:[%s18833_s0 + $0x580] sm:$0xff]  }
 0x14b   :  { %v15606_v62 = vmax.f32 %v1224_v25, %v1225_v34  ;;  %v15611_v30 = vmax.f32 %v1626_v39, %v1627_v50  ;;  %v1211_v13 = vsel %vm404_vm2, %v1145_v58, -inf  ;;  %v1613_v61 = vsel %vm404_vm2, %v1547_v59, -inf  ;;  %v11993_v47 = vpop.f32.mrb[50].mxu0  ;;  %v12035_v52 = vpop.f32.mrb[50].mxu1 }
 0x14c   :  { %v15624_v7 = vmax.f32 %v1210_v23, %v1211_v13  ;;  %v15629_v53 = vmax.f32 %v1612_v37, %v1613_v61  ;;  %v1232_v0 = vsel %vm404_vm2, %v11993_v47, -inf  ;;  %v1634_v25 = vsel %vm404_vm2, %v12035_v52, -inf  ;;  %v1148_v39 = vpop.f32.mrb[51].mxu0  ;;  %v1550_v1 = vpop.f32.mrb[51].mxu1  ;;  %v14285_v13 = vld [vmem:[%s18833_s0 + $0x510] sm:$0xff]   ;;  %v14287_v61 = vld [vmem:[%s18833_s0 + $0x518] sm:$0xff]  }
 0x14d   :  { %v15639_v38 = vmax.f32 %v1231_v27, %v1232_v0  ;;  %v15644_v15 = vmax.f32 %v1633_v29, %v1634_v25  ;;  %v1218_v11 = vsel %vm404_vm2, %v1148_v39, -inf  ;;  %v1620_v12 = vsel %vm404_vm2, %v1550_v1, -inf  ;;  %v14288_v39 = vld [vmem:[%s18833_s0 + $0x598] sm:$0xff]   ;;  %v14289_v1 = vld [vmem:[%s18833_s0 + $0x520] sm:$0xff]  }
 0x14e   :  { %v15651_v23 = vmax.f32 %v1217_v42, %v1218_v11  ;;  %v15656_v45 = vmax.f32 %v1619_v31, %v1620_v12  ;;  %12255 = vmatmul.mubr.msk.bf16.gmra.mrb[156].mxu0 %vm188_vm0, %v14279_v43  ;;  %v14284_v43 = vld [vmem:[%s18833_s0 + $0x588] sm:$0xff]  }
 0x14f   :  { %12297 = vmatmul.mubr.msk.bf16.gmra.mrb[156].mxu1 %vm188_vm0, %v14280_v20  ;;  %12310 = vmatprep.mubr.msk.bf16.mxu0 %vm188_vm0, %v14281_v6 }
 0x150   :  { %12352 = vmatprep.mubr.msk.bf16.mxu1 %vm188_vm0, %v14282_v14 }
 0x151   :  { %v11996_v37 = vpop.f32.mrb[52].mxu0  ;;  %v12038_v56 = vpop.f32.mrb[52].mxu1 }
 0x152   :  { %v1253_v40 = vsel %vm404_vm2, %v11996_v37, -inf  ;;  %v1655_v41 = vsel %vm404_vm2, %v12038_v56, -inf  ;;  %v1161_v27 = vpop.f32.mrb[53].mxu0  ;;  %v1563_v29 = vpop.f32.mrb[53].mxu1 }
 0x153   :  { %v15676_v42 = vmax.f32 %v1252_v5, %v1253_v40  ;;  %v15681_v31 = vmax.f32 %v1654_v16, %v1655_v41  ;;  %v1239_v34 = vsel %vm404_vm2, %v1161_v27, -inf  ;;  %v1641_v50 = vsel %vm404_vm2, %v1563_v29, -inf  ;;  %v11997_v58 = vpop.f32.mrb[54].mxu0  ;;  %v12039_v59 = vpop.f32.mrb[54].mxu1  ;;  %v4938_v40 = vld [vmem:[%s18835_s3 + $0x40] sm:$0xff] }
 0x154   :  { %v15691_v48 = vmax.f32 %v1238_v10, %v1239_v34  ;;  %v15696_v49 = vmax.f32 %v1640_v32, %v1641_v50  ;;  %v1260_v54 = vsel %vm404_vm2, %v11997_v58, -inf  ;;  %v1662_v57 = vsel %vm404_vm2, %v12039_v59, -inf  ;;  %v1164_v5 = vpop.f32.mrb[55].mxu0  ;;  %v1566_v16 = vpop.f32.mrb[55].mxu1  ;;  %v14286_v10 = vld [vmem:[%s18833_s0 + $0x590] sm:$0xff]   ;;  %v4934_v32 = vld [vmem:[%s18835_s3 + $0x20] sm:$0xff] }
 0x155   :  { %v15706_v2 = vmax.f32 %v1259_v22, %v1260_v54  ;;  %v15711_v9 = vmax.f32 %v1661_v26, %v1662_v57  ;;  %v1246_v60 = vsel %vm404_vm2, %v1164_v5, -inf  ;;  %v1648_v21 = vsel %vm404_vm2, %v1566_v16, -inf }
 0x156   :  { %v15727_v28 = vmax.f32 %v1245_v44, %v1246_v60  ;;  %v15732_v17 = vmax.f32 %v1647_v18, %v1648_v21  ;;  %12311 = vmatmul.mubr.msk.bf16.vlgmr.msra.gmra.mrb[160].mxu0 %vm188_vm0, %v14283_v24  ;;  %v13291_v35 = vpack.c.bf16 %v4935_v4, %v4934_v32 }
 0x157   :  { %12353 = vmatmul.mubr.msk.bf16.vlgmr.msra.gmra.mrb[160].mxu1 %vm188_vm0, %v14284_v43  ;;  %13286 = vmatpush3.bf16.msra.mxu0 %v15340_v8 }
 0x158   :  { %13386 = vmatpush3.bf16.msra.mxu1 %v15340_v8  ;;  %12314 = vmatprep.mubr.msk.bf16.mxu0 %vm188_vm0, %v14285_v13  ;;  %v15751_v8 = vpack.c.bf16 %v4937_v51, %v4936_v33 }
 0x159   :  { %v12000_v22 = vpop.f32.mrb[56].mxu0  ;;  %v12042_v26 = vpop.f32.mrb[56].mxu1  ;;  %12356 = vmatprep.mubr.msk.bf16.mxu1 %vm188_vm0, %v14286_v10  ;;  %13288 = vmatprep.subr.bf16.mxu0 %v13287_v36 }
 0x15a   :  { %v1227_v63 = vsel %vm404_vm2, %v12000_v22, -inf  ;;  %v1629_v19 = vsel %vm404_vm2, %v12042_v26, -inf  ;;  %v1177_v44 = vpop.f32.mrb[57].mxu0  ;;  %v1579_v18 = vpop.f32.mrb[57].mxu1  ;;  %13388 = vmatprep.subr.bf16.mxu1 %v13287_v36 }
 0x15b   :  { %v1228_v47 = vmax.f32 %v15606_v62, %v1227_v63  ;;  %v1630_v52 = vmax.f32 %v15611_v30, %v1629_v19  ;;  %v1213_v20 = vsel %vm404_vm2, %v1177_v44, -inf  ;;  %v1615_v6 = vsel %vm404_vm2, %v1579_v18, -inf  ;;  %v12001_v0 = vpop.f32.mrb[58].mxu0  ;;  %v12043_v25 = vpop.f32.mrb[58].mxu1  ;;  %13290 = vmatpush3.bf16.msra.mxu0 %v13287_v36 }
 0x15c   :  { %v1214_v14 = vmax.f32 %v15624_v7, %v1213_v20  ;;  %v1616_v62 = vmax.f32 %v15629_v53, %v1615_v6  ;;  %v1234_v30 = vsel %vm404_vm2, %v12001_v0, -inf  ;;  %v1636_v11 = vsel %vm404_vm2, %v12043_v25, -inf  ;;  %v1180_v12 = vpop.f32.mrb[59].mxu0  ;;  %v1582_v46 = vpop.f32.mrb[59].mxu1  ;;  %13390 = vmatpush3.bf16.msra.mxu1 %v13287_v36  ;;  %13292 = vmatprep.subr.bf16.mxu0 %v13291_v35  ;;  %v10563_v36 = vld [vmem:[%s18835_s3 + $0x58] sm:$0xff] }
 0x15d   :  { %v1266_v37 = vadd.f32 %v15282_v3, %v1228_v47  ;;  %v1668_v56 = vadd.f32 %v15282_v3, %v1630_v52  ;;  %v1235_v7 = vmax.f32 %v15639_v38, %v1234_v30  ;;  %v1637_v53 = vmax.f32 %v15644_v15, %v1636_v11  ;;  %13392 = vmatprep.subr.bf16.mxu1 %v13291_v35  ;;  %v4939_v38 = vld [vmem:[%s18835_s3 + $0x48] sm:$0xff]  ;;  %v10562_v15 = vld [vmem:[%s18835_s3 + $0x50] sm:$0xff] }
 0x15e   :  { %v1264_v41 = vadd.f32 %v15282_v3, %v1214_v14  ;;  %v1666_v27 = vadd.f32 %v15282_v3, %v1616_v62  ;;  %v1220_v29 = vsel %vm404_vm2, %v1180_v12, -inf  ;;  %v1622_v24 = vsel %vm404_vm2, %v1582_v46, -inf  ;;  %12315 = vmatmul.mubr.msk.bf16.gmra.mrb[164].mxu0 %vm188_vm0, %v14287_v61  ;;  %v14292_v47 = vld [vmem:[%s18833_s0 + $0x5a8] sm:$0xff]   ;;  %v14293_v52 = vld [vmem:[%s18833_s0 + $0x530] sm:$0xff]  }
 0x15f   :  { %v1274_v34 = vmax.f32 %v1266_v37, 0.0  ;;  %v1676_v50 = vmax.f32 %v1668_v56, 0.0  ;;  %v1267_v58 = vadd.f32 %v15282_v3, %v1235_v7  ;;  %v1669_v59 = vadd.f32 %v15282_v3, %v1637_v53  ;;  %12357 = vmatmul.mubr.msk.bf16.gmra.mrb[164].mxu1 %vm188_vm0, %v14288_v39  ;;  %12318 = vmatprep.mubr.msk.bf16.mxu0 %vm188_vm0, %v14289_v1  ;;  %v14294_v39 = vld [vmem:[%s18833_s0 + $0x5b0] sm:$0xff]  }
 0x160   :  { %v1272_v43 = vmax.f32 %v1264_v41, 0.0  ;;  %v1674_v54 = vmax.f32 %v1666_v27, 0.0  ;;  %v1221_v57 = vmax.f32 %v15651_v23, %v1220_v29  ;;  %v1623_v5 = vmax.f32 %v15656_v45, %v1622_v24  ;;  %12360 = vmatprep.mubr.msk.bf16.mxu1 %vm188_vm0, %v14290_v55  ;;  %13294 = vmatpush3.bf16.msra.mxu0 %v13291_v35 }
 0x161   :  { %1283 = vst.msk [vmem:[#allocation2 + $0x90] sm:$0xff] %vm404_vm2, %v1274_v34  ;;  %1685 = vst.msk [vmem:[#allocation2 + $0xd0] sm:$0xff] %vm404_vm2, %v1676_v50  ;;  %v1275_v16 = vmax.f32 %v1267_v58, 0.0  ;;  %v1677_v13 = vmax.f32 %v1669_v59, 0.0  ;;  %v12004_v60 = vpop.f32.mrb[60].mxu0  ;;  %v12046_v21 = vpop.f32.mrb[60].mxu1  ;;  %13394 = vmatpush3.bf16.msra.mxu1 %v13291_v35  ;;  %13296 = vmatprep.subr.bf16.mxu0 %v15751_v8  ;;  %v13299_v10 = vpack.c.bf16 %v4939_v38, %v4938_v40 }
 0x162   :  { %v15801_v32 = vpack.c.bf16 %v10563_v36, %v10562_v15  ;;  %1281 = vst.msk [vmem:[#allocation2 + $0x80] sm:$0xff] %vm404_vm2, %v1272_v43  ;;  %1683 = vst.msk [vmem:[#allocation2 + $0xc0] sm:$0xff] %vm404_vm2, %v1674_v54  ;;  %v1265_v23 = vadd.f32 %v15282_v3, %v1221_v57  ;;  %v1667_v45 = vadd.f32 %v15282_v3, %v1623_v5  ;;  %v1255_v4 = vsel %vm404_vm2, %v12004_v60, -inf  ;;  %v1193_v51 = vpop.f32.mrb[61].mxu0  ;;  %v1595_v22 = vpop.f32.mrb[61].mxu1  ;;  %v14291_v35 = vld [vmem:[%s18833_s0 + $0x528] sm:$0xff]  }
 0x163   :  { %v1657_v33 = vsel %vm404_vm2, %v12046_v21, -inf  ;;  %13396 = vmatprep.subr.bf16.mxu1 %v15751_v8  ;;  %1284 = vst.msk [vmem:[#allocation2 + $0x98] sm:$0xff] %vm404_vm2, %v1275_v16  ;;  %1686 = vst.msk [vmem:[#allocation2 + $0xd8] sm:$0xff] %vm404_vm2, %v1677_v13  ;;  %v1256_v26 = vmax.f32 %v15676_v42, %v1255_v4  ;;  %v1241_v19 = vsel %vm404_vm2, %v1193_v51, -inf  ;;  %v1643_v44 = vsel %vm404_vm2, %v1595_v22, -inf  ;;  %v12005_v18 = vpop.f32.mrb[62].mxu0 }
 0x164   :  { %v1658_v63 = vmax.f32 %v15681_v31, %v1657_v33  ;;  %v12047_v61 = vpop.f32.mrb[62].mxu1  ;;  %v1273_v20 = vmax.f32 %v1265_v23, 0.0  ;;  %v1675_v6 = vmax.f32 %v1667_v45, 0.0  ;;  %v1242_v42 = vmax.f32 %v15691_v48, %v1241_v19  ;;  %v1196_v0 = vpop.f32.mrb[63].mxu0  ;;  %13298 = vmatpush3.bf16.msra.mxu0 %v15751_v8  ;;  %v14295_v36 = vld [vmem:[%s18833_s0 + $0x538] sm:$0xff]   ;;  %v14297_v59 = vld [vmem:[%s18833_s0 + $0x540] sm:$0xff]  }
 0x165   :  { %v1644_v31 = vmax.f32 %v15696_v49, %v1643_v44  ;;  %v1598_v25 = vpop.f32.mrb[63].mxu1  ;;  %v1270_v1 = vadd.f32 %v15282_v3, %v1256_v26  ;;  %v1262_v62 = vsel %vm404_vm2, %v12005_v18, -inf  ;;  %v1664_v30 = vsel %vm404_vm2, %v12047_v61, -inf  ;;  %13398 = vmatpush3.bf16.msra.mxu1 %v15751_v8  ;;  %13300 = vmatprep.subr.bf16.mxu0 %v13299_v10  ;;  %v14296_v58 = vld [vmem:[%s18833_s0 + $0x5b8] sm:$0xff]   ;;  %v14300_v4 = vld [vmem:[%s18833_s0 + $0x5c8] sm:$0xff]   ;;  %v14301_v33 = vld [vmem:[%s18833_s0 + $0x550] sm:$0xff]  }
 0x166   :  { %v1672_v14 = vadd.f32 %v15282_v3, %v1658_v63  ;;  %1282 = vst.msk [vmem:[#allocation2 + $0x88] sm:$0xff] %vm404_vm2, %v1273_v20  ;;  %1684 = vst.msk [vmem:[#allocation2 + $0xc8] sm:$0xff] %vm404_vm2, %v1675_v6  ;;  %v1268_v48 = vadd.f32 %v15282_v3, %v1242_v42  ;;  %v1263_v11 = vmax.f32 %v15706_v2, %v1262_v62  ;;  %12319 = vmatmul.mubr.msk.bf16.gmra.mrb[168].mxu0 %vm188_vm0, %v14291_v35  ;;  %v14302_v35 = vld [vmem:[%s18833_s0 + $0x5d0] sm:$0xff]   ;;  %v14303_v19 = vld [vmem:[%s18833_s0 + $0x558] sm:$0xff]  }
 0x167   :  { %v1670_v49 = vadd.f32 %v15282_v3, %v1644_v31  ;;  %v1665_v12 = vmax.f32 %v15711_v9, %v1664_v30  ;;  %v1278_v46 = vmax.f32 %v1270_v1, 0.0  ;;  %v1248_v37 = vsel %vm404_vm2, %v1196_v0, -inf  ;;  %12361 = vmatmul.mubr.msk.bf16.gmra.mrb[168].mxu1 %vm188_vm0, %v14292_v47  ;;  %12322 = vmatprep.mubr.msk.bf16.mxu0 %vm188_vm0, %v14293_v52 }
 0x168   :  { %v1680_v55 = vmax.f32 %v1672_v14, 0.0  ;;  %v1650_v8 = vsel %vm404_vm2, %v1598_v25, -inf  ;;  %v1276_v56 = vmax.f32 %v1268_v48, 0.0  ;;  %v1271_v53 = vadd.f32 %v15282_v3, %v1263_v11  ;;  %12364 = vmatprep.mubr.msk.bf16.mxu1 %vm188_vm0, %v14294_v39  ;;  %13400 = vmatprep.subr.bf16.mxu1 %v13299_v10  ;;  %v14304_v11 = vld [vmem:[%s18833_s0 + $0x5d8] sm:$0xff]  }
 0x169   :  { %v1678_v7 = vmax.f32 %v1670_v49, 0.0  ;;  %v1673_v2 = vadd.f32 %v15282_v3, %v1665_v12  ;;  %1287 = vst.msk [vmem:[#allocation2 + $0xb0] sm:$0xff] %vm404_vm2, %v1278_v46  ;;  %v1249_v9 = vmax.f32 %v15727_v28, %v1248_v37  ;;  %v1651_v40 = vmax.f32 %v15732_v17, %v1650_v8  ;;  %v12060_v41 = vpop.f32.mrb[64].mxu0  ;;  %v12102_v27 = vpop.f32.mrb[64].mxu1  ;;  %13302 = vmatpush3.bf16.msra.mxu0 %v13299_v10  ;;  %v14305_v12 = vld [vmem:[%s18833_s0 + $0x560] sm:$0xff]  }
 0x16a   :  { %1689 = vst.msk [vmem:[#allocation2 + $0xf0] sm:$0xff] %vm404_vm2, %v1680_v55  ;;  %13402 = vmatpush3.bf16.msra.mxu1 %v13299_v10  ;;  %1285 = vst.msk [vmem:[#allocation2 + $0xa0] sm:$0xff] %vm404_vm2, %v1276_v56  ;;  %v1279_v29 = vmax.f32 %v1271_v53, 0.0  ;;  %v1885_v38 = vpop.f32.mrb[65].mxu0  ;;  %v2287_v15 = vpop.f32.mrb[65].mxu1  ;;  %13304 = vmatprep.subr.bf16.mxu0 %v15801_v32  ;;  %v14299_v10 = vld [vmem:[%s18833_s0 + $0x548] sm:$0xff]  }
 0x16b   :  { %1687 = vst.msk [vmem:[#allocation2 + $0xe0] sm:$0xff] %vm404_vm2, %v1678_v7  ;;  %v1681_v24 = vmax.f32 %v1673_v2, 0.0  ;;  %13404 = vmatprep.subr.bf16.mxu1 %v15801_v32  ;;  %v1269_v28 = vadd.f32 %v15282_v3, %v1249_v9  ;;  %v1671_v17 = vadd.f32 %v15282_v3, %v1651_v40  ;;  %v12061_v34 = vpop.f32.mrb[66].mxu0  ;;  %v12103_v50 = vpop.f32.mrb[66].mxu1  ;;  %v14298_v3 = vld [vmem:[%s18833_s0 + $0x5c0] sm:$0xff]   ;;  %v15896_v26 = vsel %vm404_vm2, %v12060_v41, -inf }
 0x16c   :  { %1288 = vst.msk [vmem:[#allocation2 + $0xb8] sm:$0xff] %vm404_vm2, %v1279_v29  ;;  %v1888_v43 = vpop.f32.mrb[67].mxu0  ;;  %v2290_v54 = vpop.f32.mrb[67].mxu1  ;;  %v15899_v63 = vsel %vm404_vm2, %v12102_v27, -inf  ;;  %v15906_v44 = vsel %vm404_vm2, %v1885_v38, -inf  ;;  %v15909_v18 = vsel %vm404_vm2, %v2287_v15, -inf }
 0x16d   :  { %1690 = vst.msk [vmem:[#allocation2 + $0xf8] sm:$0xff] %vm404_vm2, %v1681_v24  ;;  %v1277_v57 = vmax.f32 %v1269_v28, 0.0  ;;  %v1679_v5 = vmax.f32 %v1671_v17, 0.0  ;;  %v15912_v61 = vsel %vm404_vm2, %v12061_v34, -inf  ;;  %v15915_v47 = vsel %vm404_vm2, %v12103_v50, -inf  ;;  %v14306_v53 = vld [vmem:[%s18833_s0 + $0x5e0] sm:$0xff]  }
 0x16e   :  { %12323 = vmatmul.mubr.msk.bf16.gmra.mrb[172].mxu0 %vm188_vm0, %v14295_v36  ;;  %v15918_v6 = vsel %vm404_vm2, %v1888_v43, -inf  ;;  %v15921_v42 = vsel %vm404_vm2, %v2290_v54, -inf  ;;  %v14307_v15 = vld [vmem:[%s18833_s0 + $0x568] sm:$0xff]  }
 0x16f   :  { %1286 = vst.msk [vmem:[#allocation2 + $0xa8] sm:$0xff] %vm404_vm2, %v1277_v57  ;;  %1688 = vst.msk [vmem:[#allocation2 + $0xe8] sm:$0xff] %vm404_vm2, %v1679_v5  ;;  %12365 = vmatmul.mubr.msk.bf16.gmra.mrb[172].mxu1 %vm188_vm0, %v14296_v58  ;;  %12326 = vmatprep.mubr.msk.bf16.mxu0 %vm188_vm0, %v14297_v59 }
 0x170   :  { %12368 = vmatprep.mubr.msk.bf16.mxu1 %vm188_vm0, %v14298_v3 }
 0x171   :  { %v12064_v16 = vpop.f32.mrb[68].mxu0  ;;  %v12106_v13 = vpop.f32.mrb[68].mxu1 }
 0x172   :  { %v1901_v60 = vpop.f32.mrb[69].mxu0  ;;  %v2303_v21 = vpop.f32.mrb[69].mxu1  ;;  %v15976_v24 = vsel %vm404_vm2, %v12064_v16, -inf  ;;  %v15979_v38 = vsel %vm404_vm2, %v12106_v13, -inf }
 0x173   :  { %v12065_v23 = vpop.f32.mrb[70].mxu0  ;;  %v12107_v45 = vpop.f32.mrb[70].mxu1  ;;  %v15986_v36 = vsel %vm404_vm2, %v1901_v60, -inf  ;;  %v15989_v28 = vsel %vm404_vm2, %v2303_v21, -inf }
 0x174   :  { %v1904_v51 = vpop.f32.mrb[71].mxu0  ;;  %v2306_v22 = vpop.f32.mrb[71].mxu1  ;;  %v15992_v17 = vsel %vm404_vm2, %v12065_v23, -inf  ;;  %v15995_v34 = vsel %vm404_vm2, %v12107_v45, -inf  ;;  %v14308_v45 = vld [vmem:[%s18833_s0 + $0x5e8] sm:$0xff]  }
 0x175   :  { %v15998_v59 = vsel %vm404_vm2, %v1904_v51, -inf  ;;  %v16001_v43 = vsel %vm404_vm2, %v2306_v22, -inf }
 0x176   :  { %12327 = vmatmul.mubr.msk.bf16.gmra.mrb[176].mxu0 %vm188_vm0, %v14299_v10 }
 0x177   :  { %12369 = vmatmul.mubr.msk.bf16.gmra.mrb[176].mxu1 %vm188_vm0, %v14300_v4  ;;  %12330 = vmatprep.mubr.msk.bf16.mxu0 %vm188_vm0, %v14301_v33  ;;  %v14309_v4 = vld [vmem:[%s18833_s0 + $0x570] sm:$0xff]  }
 0x178   :  { %12372 = vmatprep.mubr.msk.bf16.mxu1 %vm188_vm0, %v14302_v35 }
 0x179   :  { %v12068_v52 = vpop.f32.mrb[72].mxu0  ;;  %v12110_v20 = vpop.f32.mrb[72].mxu1 }
 0x17a   :  { %v15924_v31 = vsel %vm404_vm2, %v12068_v52, -inf  ;;  %v15927_v0 = vsel %vm404_vm2, %v12110_v20, -inf  ;;  %v1917_v25 = vpop.f32.mrb[73].mxu0  ;;  %v2319_v39 = vpop.f32.mrb[73].mxu1  ;;  %v14310_v20 = vld [vmem:[%s18833_s0 + $0x5f0] sm:$0xff]  }
 0x17b   :  { %v2028_v1 = vmax.f32 %v15896_v26, %v15924_v31  ;;  %v2430_v14 = vmax.f32 %v15899_v63, %v15927_v0  ;;  %v15934_v62 = vsel %vm404_vm2, %v1917_v25, -inf  ;;  %v15937_v30 = vsel %vm404_vm2, %v2319_v39, -inf  ;;  %v12069_v48 = vpop.f32.mrb[74].mxu0  ;;  %v12111_v49 = vpop.f32.mrb[74].mxu1 }
 0x17c   :  { %v2014_v46 = vmax.f32 %v15906_v44, %v15934_v62  ;;  %v2416_v55 = vmax.f32 %v15909_v18, %v15937_v30  ;;  %v15950_v37 = vsel %vm404_vm2, %v12069_v48, -inf  ;;  %v15953_v8 = vsel %vm404_vm2, %v12111_v49, -inf  ;;  %v1920_v56 = vpop.f32.mrb[75].mxu0  ;;  %v2322_v7 = vpop.f32.mrb[75].mxu1 }
 0x17d   :  { %v2035_v2 = vmax.f32 %v15912_v61, %v15950_v37  ;;  %v2437_v9 = vmax.f32 %v15915_v47, %v15953_v8  ;;  %v15963_v40 = vsel %vm404_vm2, %v1920_v56, -inf  ;;  %v15966_v41 = vsel %vm404_vm2, %v2322_v7, -inf  ;;  %v16113_v47 = vld [vmem:[#allocation2 + $0x80] sm:$0xff] }
 0x17e   :  { %v2021_v27 = vmax.f32 %v15918_v6, %v15963_v40  ;;  %v2423_v29 = vmax.f32 %v15921_v42, %v15966_v41  ;;  %12331 = vmatmul.mubr.msk.bf16.gmra.mrb[180].mxu0 %vm188_vm0, %v14303_v19  ;;  %v10564_v6 = vld [vmem:[%s18835_s3 + $0x60] sm:$0xff] }
 0x17f   :  { %12373 = vmatmul.mubr.msk.bf16.gmra.mrb[180].mxu1 %vm188_vm0, %v14304_v11  ;;  %12334 = vmatprep.mubr.msk.bf16.mxu0 %vm188_vm0, %v14305_v12 }
 0x180   :  { %12376 = vmatprep.mubr.msk.bf16.mxu1 %vm188_vm0, %v14306_v53 }
 0x181   :  { %v12072_v50 = vpop.f32.mrb[76].mxu0  ;;  %v12114_v58 = vpop.f32.mrb[76].mxu1 }
 0x182   :  { %v16004_v54 = vsel %vm404_vm2, %v12072_v50, -inf  ;;  %v16007_v3 = vsel %vm404_vm2, %v12114_v58, -inf  ;;  %v1933_v57 = vpop.f32.mrb[77].mxu0  ;;  %v2335_v5 = vpop.f32.mrb[77].mxu1 }
 0x183   :  { %v2056_v16 = vmax.f32 %v15976_v24, %v16004_v54  ;;  %v2458_v13 = vmax.f32 %v15979_v38, %v16007_v3  ;;  %v16014_v60 = vsel %vm404_vm2, %v1933_v57, -inf  ;;  %v16017_v21 = vsel %vm404_vm2, %v2335_v5, -inf  ;;  %v12073_v10 = vpop.f32.mrb[78].mxu0  ;;  %v12115_v23 = vpop.f32.mrb[78].mxu1  ;;  %v14311_v5 = vld [vmem:[%s18833_s0 + $0x578] sm:$0xff]  }
 0x184   :  { %v2042_v33 = vmax.f32 %v15986_v36, %v16014_v60  ;;  %v2444_v51 = vmax.f32 %v15989_v28, %v16017_v21  ;;  %v16030_v22 = vsel %vm404_vm2, %v12073_v10, -inf  ;;  %v16033_v35 = vsel %vm404_vm2, %v12115_v23, -inf  ;;  %v1936_v19 = vpop.f32.mrb[79].mxu0  ;;  %v2338_v52 = vpop.f32.mrb[79].mxu1  ;;  %v4915_v21 = vld [vmem:[#allocation2 + $0x8] sm:$0xff] }
 0x185   :  { %v2063_v25 = vmax.f32 %v15992_v17, %v16030_v22  ;;  %v2465_v39 = vmax.f32 %v15995_v34, %v16033_v35  ;;  %v16043_v48 = vsel %vm404_vm2, %v1936_v19, -inf  ;;  %v16046_v49 = vsel %vm404_vm2, %v2338_v52, -inf  ;;  %v14312_v52 = vld [vmem:[%s18833_s0 + $0x5f8] sm:$0xff]   ;;  %v16174_v34 = vld [vmem:[#allocation2 + $0x88] sm:$0xff]  ;;  %v10566_v22 = vld [vmem:[%s18835_s3 + $0x70] sm:$0xff] }
 0x186   :  { %v2049_v11 = vmax.f32 %v15998_v59, %v16043_v48  ;;  %v2451_v12 = vmax.f32 %v16001_v43, %v16046_v49  ;;  %12335 = vmatmul.mubr.msk.bf16.gmra.mrb[184].mxu0 %vm188_vm0, %v14307_v15  ;;  %v10567_v35 = vld [vmem:[%s18835_s3 + $0x78] sm:$0xff]  ;;  %v16185_v59 = vld [vmem:[#allocation2 + $0x90] sm:$0xff]  ;;  %v10568_v43 = vld [vmem:[%s18835_s3 + $0x80] sm:$0xff] }
 0x187   :  { %12377 = vmatmul.mubr.msk.bf16.gmra.mrb[184].mxu1 %vm188_vm0, %v14308_v45  ;;  %12338 = vmatprep.mubr.msk.bf16.mxu0 %vm188_vm0, %v14309_v4  ;;  %v4917_v49 = vld [vmem:[#allocation2 + $0x18] sm:$0xff] }
 0x188   :  { %12380 = vmatprep.mubr.msk.bf16.mxu1 %vm188_vm0, %v14310_v20 }
 0x189   :  { %v12076_v56 = vpop.f32.mrb[80].mxu0  ;;  %v12118_v7 = vpop.f32.mrb[80].mxu1 }
 0x18a   :  { %v2029_v53 = vsel %vm404_vm2, %v12076_v56, -inf  ;;  %v2431_v50 = vsel %vm404_vm2, %v12118_v7, -inf  ;;  %v1949_v58 = vpop.f32.mrb[81].mxu0  ;;  %v2351_v57 = vpop.f32.mrb[81].mxu1 }
 0x18b   :  { %v16064_v15 = vmax.f32 %v2028_v1, %v2029_v53  ;;  %v16069_v10 = vmax.f32 %v2430_v14, %v2431_v50  ;;  %v2015_v23 = vsel %vm404_vm2, %v1949_v58, -inf  ;;  %v2417_v45 = vsel %vm404_vm2, %v2351_v57, -inf  ;;  %v12077_v4 = vpop.f32.mrb[82].mxu0  ;;  %v12119_v19 = vpop.f32.mrb[82].mxu1 }
 0x18c   :  { %v16079_v26 = vmax.f32 %v2014_v46, %v2015_v23  ;;  %v16084_v63 = vmax.f32 %v2416_v55, %v2417_v45  ;;  %v2036_v31 = vsel %vm404_vm2, %v12077_v4, -inf  ;;  %v2438_v0 = vsel %vm404_vm2, %v12119_v19, -inf  ;;  %v1952_v1 = vpop.f32.mrb[83].mxu0  ;;  %v2354_v14 = vpop.f32.mrb[83].mxu1  ;;  %v4914_v46 = vld [vmem:[#allocation2] sm:$0xff]  ;;  %v10565_v55 = vld [vmem:[%s18835_s3 + $0x68] sm:$0xff] }
 0x18d   :  { %v16091_v20 = vmax.f32 %v2035_v2, %v2036_v31  ;;  %v16096_v44 = vmax.f32 %v2437_v9, %v2438_v0  ;;  %v2022_v18 = vsel %vm404_vm2, %v1952_v1, -inf  ;;  %v2424_v62 = vsel %vm404_vm2, %v2354_v14, -inf  ;;  %v16201_v23 = vld [vmem:[#allocation2 + $0x98] sm:$0xff]  ;;  %v4918_v45 = vld [vmem:[#allocation2 + $0x20] sm:$0xff] }
 0x18e   :  { %v16103_v30 = vmax.f32 %v2021_v27, %v2022_v18  ;;  %v16108_v61 = vmax.f32 %v2423_v29, %v2424_v62  ;;  %12339 = vmatmul.mubr.msk.bf16.gmra.mrb[188].mxu0 %vm188_vm0, %v14311_v5  ;;  %v16125_v41 = vpack.c.bf16 %v10565_v55, %v10564_v6  ;;  %v13311_v4 = vpack.c.bf16 %v10567_v35, %v10566_v22  ;;  %v16213_v18 = vld [vmem:[#allocation2 + $0xa0] sm:$0xff] }
 0x18f   :  { %12381 = vmatmul.mubr.msk.bf16.gmra.mrb[188].mxu1 %vm188_vm0, %v14312_v52  ;;  %12404 = vmatprep.mubr.msk.f32.mxu0 %vm404_vm2, %v4914_v46 }
 0x190   :  { %12624 = vmatprep.mubr.msk.f32.mxu1 %vm404_vm2, %v16113_v47 }
 0x191   :  { %v12080_v42 = vpop.f32.mrb[84].mxu0  ;;  %v12122_v37 = vpop.f32.mrb[84].mxu1 }
 0x192   :  { %v2057_v8 = vsel %vm404_vm2, %v12080_v42, -inf  ;;  %v2459_v2 = vsel %vm404_vm2, %v12122_v37, -inf  ;;  %v1965_v9 = vpop.f32.mrb[85].mxu0  ;;  %v2367_v40 = vpop.f32.mrb[85].mxu1  ;;  %v4920_v42 = vld [vmem:[#allocation2 + $0x30] sm:$0xff] }
 0x193   :  { %v16130_v27 = vmax.f32 %v2056_v16, %v2057_v8  ;;  %v16135_v29 = vmax.f32 %v2458_v13, %v2459_v2  ;;  %v2043_v56 = vsel %vm404_vm2, %v1965_v9, -inf  ;;  %v2445_v7 = vsel %vm404_vm2, %v2367_v40, -inf  ;;  %v12081_v53 = vpop.f32.mrb[86].mxu0  ;;  %v12123_v50 = vpop.f32.mrb[86].mxu1  ;;  %v16225_v37 = vld [vmem:[%s18834_s2] ss:$0 sm:$0xff] }
 0x194   :  { %v16142_v58 = vmax.f32 %v2042_v33, %v2043_v56  ;;  %v16147_v24 = vmax.f32 %v2444_v51, %v2445_v7  ;;  %v2064_v38 = vsel %vm404_vm2, %v12081_v53, -inf  ;;  %v2466_v54 = vsel %vm404_vm2, %v12123_v50, -inf  ;;  %v1968_v3 = vpop.f32.mrb[87].mxu0  ;;  %v2370_v16 = vpop.f32.mrb[87].mxu1  ;;  %v4916_v33 = vld [vmem:[#allocation2 + $0x10] sm:$0xff]  ;;  %v4919_v9 = vld [vmem:[#allocation2 + $0x28] sm:$0xff] }
 0x195   :  { %v16154_v13 = vmax.f32 %v2063_v25, %v2064_v38  ;;  %v16159_v36 = vmax.f32 %v2465_v39, %v2466_v54  ;;  %v2050_v28 = vsel %vm404_vm2, %v1968_v3, -inf  ;;  %v2452_v60 = vsel %vm404_vm2, %v2370_v16, -inf  ;;  %v10569_v25 = vld [vmem:[%s18835_s3 + $0x88] sm:$0xff]  ;;  %v10570_v40 = vld [vmem:[%s18835_s3 + $0x90] sm:$0xff]  ;;  %v10571_v56 = vld [vmem:[%s18835_s3 + $0x98] sm:$0xff] }
 0x196   :  { %v16166_v51 = vmax.f32 %v2049_v11, %v2050_v28  ;;  %v16171_v17 = vmax.f32 %v2451_v12, %v2452_v60  ;;  %12405 = vmatmul.mubr.msk.f32.vlgmr.msra.gmra.mrb[192].mxu0 %vm404_vm2, %v4915_v21  ;;  %v10589_v38 = vld [vmem:[%s18835_s3 + $0xa8] sm:$0xff]  ;;  %v16256_v60 = vld [vmem:[#allocation2 + $0xb0] sm:$0xff] }
 0x197   :  { %12625 = vmatmul.mubr.msk.f32.vlgmr.msra.gmra.mrb[192].mxu1 %vm404_vm2, %v16174_v34  ;;  %12407 = vmatprep.mubr.msk.f32.mxu0 %vm404_vm2, %v4916_v33 }
 0x198   :  { %13306 = vmatpush3.bf16.msra.mxu0 %v15801_v32  ;;  %12627 = vmatprep.mubr.msk.f32.mxu1 %vm404_vm2, %v16185_v59 }
 0x199   :  { %13406 = vmatpush3.bf16.msra.mxu1 %v15801_v32  ;;  %v12084_v39 = vpop.f32.mrb[88].mxu0  ;;  %v12126_v48 = vpop.f32.mrb[88].mxu1  ;;  %13308 = vmatprep.subr.bf16.mxu0 %v16125_v41  ;;  %v16204_v32 = vpack.c.bf16 %v10569_v25, %v10568_v43 }
 0x19a   :  { %v2031_v11 = vsel %vm404_vm2, %v12084_v39, -inf  ;;  %v2433_v12 = vsel %vm404_vm2, %v12126_v48, -inf  ;;  %v1981_v57 = vpop.f32.mrb[89].mxu0  ;;  %v2383_v5 = vpop.f32.mrb[89].mxu1  ;;  %12408 = vmatmul.mubr.msk.f32.gmra.mrb[194].mxu0 %vm404_vm2, %v4917_v49  ;;  %13408 = vmatprep.subr.bf16.mxu1 %v16125_v41  ;;  %v4921_v49 = vld [vmem:[#allocation2 + $0x38] sm:$0xff] }
 0x19b   :  { %v2032_v19 = vmax.f32 %v16064_v15, %v2031_v11  ;;  %v2434_v52 = vmax.f32 %v16069_v10, %v2433_v12  ;;  %v2017_v31 = vsel %vm404_vm2, %v1981_v57, -inf  ;;  %v2419_v0 = vsel %vm404_vm2, %v2383_v5, -inf  ;;  %12628 = vmatmul.mubr.msk.f32.gmra.mrb[194].mxu1 %vm404_vm2, %v16201_v23  ;;  %v12085_v1 = vpop.f32.mrb[90].mxu0  ;;  %v12127_v14 = vpop.f32.mrb[90].mxu1  ;;  %12410 = vmatprep.mubr.msk.f32.mxu0 %vm404_vm2, %v4918_v45 }
 0x19c   :  { %v2018_v62 = vmax.f32 %v16079_v26, %v2017_v31  ;;  %v2420_v46 = vmax.f32 %v16084_v63, %v2419_v0  ;;  %v2038_v15 = vsel %vm404_vm2, %v12085_v1, -inf  ;;  %v2440_v10 = vsel %vm404_vm2, %v12127_v14, -inf  ;;  %12630 = vmatprep.mubr.msk.f32.mxu1 %vm404_vm2, %v16213_v18  ;;  %v1984_v6 = vpop.f32.mrb[91].mxu0  ;;  %v2386_v55 = vpop.f32.mrb[91].mxu1  ;;  %13310 = vmatpush3.bf16.msra.mxu0 %v16125_v41 }
 0x19d   :  { %v2070_v26 = vadd.f32 %v16225_v37, %v2032_v19  ;;  %v2472_v63 = vadd.f32 %v16225_v37, %v2434_v52  ;;  %v2039_v8 = vmax.f32 %v16091_v20, %v2038_v15  ;;  %v2441_v2 = vmax.f32 %v16096_v44, %v2440_v10  ;;  %13410 = vmatpush3.bf16.msra.mxu1 %v16125_v41  ;;  %v16243_v44 = vld [vmem:[#allocation2 + $0xa8] sm:$0xff]  ;;  %v10588_v41 = vld [vmem:[%s18835_s3 + $0xa0] sm:$0xff] }
 0x19e   :  { %v2068_v7 = vadd.f32 %v16225_v37, %v2018_v62  ;;  %v2470_v53 = vadd.f32 %v16225_v37, %v2420_v46  ;;  %v2024_v50 = vsel %vm404_vm2, %v1984_v6, -inf  ;;  %v2426_v20 = vsel %vm404_vm2, %v2386_v55, -inf  ;;  %12411 = vmatmul.mubr.msk.f32.gmra.mrb[196].mxu0 %vm404_vm2, %v4919_v9  ;;  %13312 = vmatprep.subr.bf16.mxu0 %v13311_v4  ;;  %v16277_v52 = vld [vmem:[#allocation2 + $0x40] sm:$0xff]  ;;  %v16301_v9 = vld [vmem:[#allocation2 + $0x48] sm:$0xff] }
 0x19f   :  { %v2078_v54 = vmax.f32 %v2070_v26, 0.0  ;;  %v2480_v3 = vmax.f32 %v2472_v63, 0.0  ;;  %v2071_v16 = vadd.f32 %v16225_v37, %v2039_v8  ;;  %v2473_v28 = vadd.f32 %v16225_v37, %v2441_v2  ;;  %12631 = vmatmul.mubr.msk.f32.gmra.mrb[196].mxu1 %vm404_vm2, %v16243_v44  ;;  %12413 = vmatprep.mubr.msk.f32.mxu0 %vm404_vm2, %v4920_v42  ;;  %v16290_v15 = vld [vmem:[#allocation2 + $0xc0] sm:$0xff] }
 0x1a0   :  { %v2076_v21 = vmax.f32 %v2068_v7, 0.0  ;;  %v2478_v33 = vmax.f32 %v2470_v53, 0.0  ;;  %v2025_v22 = vmax.f32 %v16103_v30, %v2024_v50  ;;  %v2427_v35 = vmax.f32 %v16108_v61, %v2426_v20  ;;  %12633 = vmatprep.mubr.msk.f32.mxu1 %vm404_vm2, %v16256_v60  ;;  %13412 = vmatprep.subr.bf16.mxu1 %v13311_v4  ;;  %v16313_v7 = vld [vmem:[#allocation2 + $0xc8] sm:$0xff]  ;;  %v16315_v53 = vld [vmem:[#allocation2 + $0x50] sm:$0xff] }
 0x1a1   :  { %2087 = vst.msk [vmem:[#allocation2 + $0x110] sm:$0xff] %vm404_vm2, %v2078_v54  ;;  %2489 = vst.msk [vmem:[#allocation2 + $0x150] sm:$0xff] %vm404_vm2, %v2480_v3  ;;  %v2079_v43 = vmax.f32 %v2071_v16, 0.0  ;;  %v2481_v25 = vmax.f32 %v2473_v28, 0.0  ;;  %v12088_v39 = vpop.f32.mrb[92].mxu0  ;;  %v12130_v48 = vpop.f32.mrb[92].mxu1  ;;  %13314 = vmatpush3.bf16.msra.mxu0 %v13311_v4  ;;  %13414 = vmatpush3.bf16.msra.mxu1 %v13311_v4  ;;  %v16264_v11 = vpack.c.bf16 %v10571_v56, %v10570_v40 }
 0x1a2   :  { %v16266_v30 = vpack.c.bf16 %v10589_v38, %v10588_v41  ;;  %2085 = vst.msk [vmem:[#allocation2 + $0x100] sm:$0xff] %vm404_vm2, %v2076_v21  ;;  %2487 = vst.msk [vmem:[#allocation2 + $0x140] sm:$0xff] %vm404_vm2, %v2478_v33  ;;  %v2069_v61 = vadd.f32 %v16225_v37, %v2025_v22  ;;  %v2471_v12 = vadd.f32 %v16225_v37, %v2427_v35  ;;  %v2059_v57 = vsel %vm404_vm2, %v12088_v39, -inf  ;;  %v1997_v45 = vpop.f32.mrb[93].mxu0  ;;  %v2399_v19 = vpop.f32.mrb[93].mxu1  ;;  %v16275_v4 = vld [vmem:[#allocation2 + $0xb8] sm:$0xff] }
 0x1a3   :  { %v2461_v5 = vsel %vm404_vm2, %v12130_v48, -inf  ;;  %12414 = vmatmul.mubr.msk.f32.gmra.mrb[198].mxu0 %vm404_vm2, %v4921_v49  ;;  %13316 = vmatprep.subr.bf16.mxu0 %v16204_v32  ;;  %2088 = vst.msk [vmem:[#allocation2 + $0x118] sm:$0xff] %vm404_vm2, %v2079_v43  ;;  %2490 = vst.msk [vmem:[#allocation2 + $0x158] sm:$0xff] %vm404_vm2, %v2481_v25  ;;  %v2060_v31 = vmax.f32 %v16130_v27, %v2059_v57  ;;  %v2045_v1 = vsel %vm404_vm2, %v1997_v45, -inf  ;;  %v2447_v14 = vsel %vm404_vm2, %v2399_v19, -inf  ;;  %v12089_v62 = vpop.f32.mrb[94].mxu0 }
 0x1a4   :  { %v2462_v0 = vmax.f32 %v16135_v29, %v2461_v5  ;;  %12634 = vmatmul.mubr.msk.f32.gmra.mrb[198].mxu1 %vm404_vm2, %v16275_v4  ;;  %v12131_v46 = vpop.f32.mrb[94].mxu1  ;;  %12416 = vmatprep.mubr.msk.f32.mxu0 %vm404_vm2, %v16277_v52  ;;  %v2077_v10 = vmax.f32 %v2069_v61, 0.0  ;;  %v2479_v6 = vmax.f32 %v2471_v12, 0.0  ;;  %v2046_v27 = vmax.f32 %v16142_v58, %v2045_v1  ;;  %v2000_v55 = vpop.f32.mrb[95].mxu0  ;;  %v16338_v22 = vld [vmem:[#allocation2 + $0x58] sm:$0xff]  ;;  %v16348_v39 = vld [vmem:[#allocation2 + $0x60] sm:$0xff] }
 0x1a5   :  { %v2448_v29 = vmax.f32 %v16147_v24, %v2447_v14  ;;  %12636 = vmatprep.mubr.msk.f32.mxu1 %vm404_vm2, %v16290_v15  ;;  %v2402_v42 = vpop.f32.mrb[95].mxu1  ;;  %13416 = vmatprep.subr.bf16.mxu1 %v16204_v32  ;;  %v2074_v26 = vadd.f32 %v16225_v37, %v2060_v31  ;;  %v2066_v8 = vsel %vm404_vm2, %v12089_v62, -inf  ;;  %v2468_v2 = vsel %vm404_vm2, %v12131_v46, -inf  ;;  %v16357_v57 = vld [vmem:[#allocation2 + $0xe0] sm:$0xff]  ;;  %v16364_v31 = vld [vmem:[#allocation2 + $0x68] sm:$0xff]  ;;  %v16371_v1 = vld [vmem:[#allocation2 + $0x70] sm:$0xff] }
 0x1a6   :  { %v2476_v63 = vadd.f32 %v16225_v37, %v2462_v0  ;;  %13318 = vmatpush3.bf16.msra.mxu0 %v16204_v32  ;;  %13418 = vmatpush3.bf16.msra.mxu1 %v16204_v32  ;;  %2086 = vst.msk [vmem:[#allocation2 + $0x108] sm:$0xff] %vm404_vm2, %v2077_v10  ;;  %2488 = vst.msk [vmem:[#allocation2 + $0x148] sm:$0xff] %vm404_vm2, %v2479_v6  ;;  %v2072_v58 = vadd.f32 %v16225_v37, %v2046_v27  ;;  %v2052_v20 = vsel %vm404_vm2, %v2000_v55, -inf  ;;  %v16369_v0 = vld [vmem:[#allocation2 + $0xe8] sm:$0xff]  ;;  %v16379_v14 = vld [vmem:[#allocation2 + $0xf0] sm:$0xff] }
 0x1a7   :  { %v2474_v24 = vadd.f32 %v16225_v37, %v2448_v29  ;;  %v2067_v40 = vmax.f32 %v16154_v13, %v2066_v8  ;;  %v2469_v56 = vmax.f32 %v16159_v36, %v2468_v2  ;;  %12417 = vmatmul.mubr.msk.f32.gmra.mrb[200].mxu0 %vm404_vm2, %v16301_v9  ;;  %v2082_v32 = vmax.f32 %v2074_v26, 0.0  ;;  %v16323_v13 = vld [vmem:[#allocation2 + $0xd0] sm:$0xff]  ;;  %13320 = vmatprep.subr.bf16.mxu0 %v16264_v11  ;;  %v16387_v10 = vld [vmem:[#allocation2 + $0x78] sm:$0xff] }
 0x1a8   :  { %v2484_v50 = vmax.f32 %v2476_v63, 0.0  ;;  %v2454_v41 = vsel %vm404_vm2, %v2402_v42, -inf  ;;  %12637 = vmatmul.mubr.msk.f32.gmra.mrb[200].mxu1 %vm404_vm2, %v16313_v7  ;;  %12419 = vmatprep.mubr.msk.f32.mxu0 %vm404_vm2, %v16315_v53  ;;  %v2080_v36 = vmax.f32 %v2072_v58, 0.0  ;;  %v2053_v16 = vmax.f32 %v16166_v51, %v2052_v20  ;;  %18844 = vst [vmem:[#allocation4_spill] sm:$0xff] %v16379_v14  ;;  %v16395_v29 = vld [vmem:[#allocation2 + $0xf8] sm:$0xff]  ;;  %v10590_v55 = vld [vmem:[%s18835_s3 + $0xb0] sm:$0xff] }
 0x1a9   :  { %v2482_v38 = vmax.f32 %v2474_v24, 0.0  ;;  %v2075_v54 = vadd.f32 %v16225_v37, %v2067_v40  ;;  %v2477_v3 = vadd.f32 %v16225_v37, %v2469_v56  ;;  %12639 = vmatprep.mubr.msk.f32.mxu1 %vm404_vm2, %v16323_v13  ;;  %2091 = vst.msk [vmem:[#allocation2 + $0x130] sm:$0xff] %vm404_vm2, %v2082_v32  ;;  %v2455_v28 = vmax.f32 %v16171_v17, %v2454_v41  ;;  %v16334_v21 = vpop.f32.mrb[96].mxu0  ;;  %v16336_v33 = vpop.f32.mrb[96].mxu1  ;;  %v16346_v17 = vld [vmem:[#allocation2 + $0xd8] sm:$0xff]  ;;  %v10592_v58 = vld [vmem:[%s18835_s3 + $0xc0] sm:$0xff] }
 0x1aa   :  { %2493 = vst.msk [vmem:[#allocation2 + $0x170] sm:$0xff] %vm404_vm2, %v2484_v50  ;;  %13420 = vmatprep.subr.bf16.mxu1 %v16264_v11  ;;  %13322 = vmatpush3.bf16.msra.mxu0 %v16264_v11  ;;  %2089 = vst.msk [vmem:[#allocation2 + $0x120] sm:$0xff] %vm404_vm2, %v2080_v36  ;;  %v2689_v25 = vpop.f32.mrb[97].mxu0  ;;  %v3091_v51 = vpop.f32.mrb[97].mxu1  ;;  %v2073_v48 = vadd.f32 %v16225_v37, %v2053_v16  ;;  %v10591_v42 = vld [vmem:[%s18835_s3 + $0xb8] sm:$0xff]  ;;  %v10593_v40 = vld [vmem:[%s18835_s3 + $0xc8] sm:$0xff] }
 0x1ab   :  { %2491 = vst.msk [vmem:[#allocation2 + $0x160] sm:$0xff] %vm404_vm2, %v2482_v38  ;;  %v2083_v35 = vmax.f32 %v2075_v54, 0.0  ;;  %v2485_v43 = vmax.f32 %v2477_v3, 0.0  ;;  %12420 = vmatmul.mubr.msk.f32.gmra.mrb[202].mxu0 %vm404_vm2, %v16338_v22  ;;  %13422 = vmatpush3.bf16.msra.mxu1 %v16264_v11  ;;  %v2475_v49 = vadd.f32 %v16225_v37, %v2455_v28  ;;  %v12145_v61 = vpop.f32.mrb[98].mxu0  ;;  %v12187_v12 = vpop.f32.mrb[98].mxu1  ;;  %18845 = vst [vmem:[#allocation5_spill] sm:$0xff] %v16395_v29 }
 0x1ac   :  { %12640 = vmatmul.mubr.msk.f32.gmra.mrb[202].mxu1 %vm404_vm2, %v16346_v17  ;;  %12422 = vmatprep.mubr.msk.f32.mxu0 %vm404_vm2, %v16348_v39  ;;  %v2692_v11 = vpop.f32.mrb[99].mxu0  ;;  %v3094_v5 = vpop.f32.mrb[99].mxu1  ;;  %v2081_v45 = vmax.f32 %v2073_v48, 0.0  ;;  %v13327_v24 = vpack.c.bf16 %v10591_v42, %v10590_v55  ;;  %v10595_v56 = vld [vmem:[%s18835_s3 + $0xd8] sm:$0xff]  ;;  %v16437_v32 = vsel %vm404_vm2, %v16334_v21, -inf  ;;  %v16441_v50 = vsel %vm404_vm2, %v16336_v33, -inf }
 0x1ad   :  { %2092 = vst.msk [vmem:[#allocation2 + $0x138] sm:$0xff] %vm404_vm2, %v2083_v35  ;;  %2494 = vst.msk [vmem:[#allocation2 + $0x178] sm:$0xff] %vm404_vm2, %v2485_v43  ;;  %12642 = vmatprep.mubr.msk.f32.mxu1 %vm404_vm2, %v16357_v57  ;;  %13324 = vmatprep.subr.bf16.mxu0 %v16266_v30  ;;  %v2483_v19 = vmax.f32 %v2475_v49, 0.0  ;;  %v16449_v41 = vsel %vm404_vm2, %v2689_v25, -inf  ;;  %v16455_v36 = vsel %vm404_vm2, %v12145_v61, -inf  ;;  %v16458_v38 = vsel %vm404_vm2, %v12187_v12, -inf }
 0x1ae   :  { %13424 = vmatprep.subr.bf16.mxu1 %v16266_v30  ;;  %2090 = vst.msk [vmem:[#allocation2 + $0x128] sm:$0xff] %vm404_vm2, %v2081_v45  ;;  %v16462_v16 = vsel %vm404_vm2, %v2692_v11, -inf  ;;  %v16465_v28 = vsel %vm404_vm2, %v3094_v5, -inf  ;;  %v16640_v12 = vld [vmem:[#allocation2 + $0x118] sm:$0xff] }
 0x1af   :  { %12423 = vmatmul.mubr.msk.f32.gmra.mrb[204].mxu0 %vm404_vm2, %v16364_v31  ;;  %2492 = vst.msk [vmem:[#allocation2 + $0x168] sm:$0xff] %vm404_vm2, %v2483_v19 }
 0x1b0   :  { %12643 = vmatmul.mubr.msk.f32.gmra.mrb[204].mxu1 %vm404_vm2, %v16369_v0  ;;  %12425 = vmatprep.mubr.msk.f32.mxu0 %vm404_vm2, %v16371_v1 }
 0x1b1   :  { %12645 = vmatprep.mubr.msk.f32.mxu1 %vm404_vm2, %v16379_v14  ;;  %v16383_v62 = vpop.f32.mrb[100].mxu0  ;;  %v16385_v46 = vpop.f32.mrb[100].mxu1 }
 0x1b2   :  { %v16389_v6 = vpop.f32.mrb[101].mxu0  ;;  %v16391_v27 = vpop.f32.mrb[101].mxu1 }
 0x1b3   :  { %12426 = vmatmul.mubr.msk.f32.gmra.mrb[206].mxu0 %vm404_vm2, %v16387_v10  ;;  %v16405_v26 = vpop.f32.mrb[102].mxu0  ;;  %v16407_v63 = vpop.f32.mrb[102].mxu1 }
 0x1b4   :  { %12646 = vmatmul.mubr.msk.f32.gmra.mrb[206].mxu1 %vm404_vm2, %v16395_v29  ;;  %12448 = vmatprep.mubr.msk.f32.mxu0 %vm404_vm2, %v16277_v52  ;;  %v16413_v8 = vpop.f32.mrb[103].mxu0  ;;  %v16415_v2 = vpop.f32.mrb[103].mxu1  ;;  %v10594_v52 = vld [vmem:[%s18835_s3 + $0xd0] sm:$0xff] }
 0x1b5   :  { %12668 = vmatprep.mubr.msk.f32.mxu1 %vm404_vm2, %v16290_v15  ;;  %v16446_v20 = vpack.c.bf16 %v10595_v56, %v10594_v52  ;;  %v10597_v52 = vld [vmem:[%s18835_s3 + $0xe8] sm:$0xff]  ;;  %v10614_v56 = vld [vmem:[%s18835_s3 + $0xf0] sm:$0xff] }
 0x1b7   :  { %12449 = vmatmul.mubr.msk.f32.vlgmr.msra.gmra.mrb[192].mxu0 %vm404_vm2, %v16301_v9  ;;  %v13331_v9 = vpack.c.bf16 %v10593_v40, %v10592_v58 }
 0x1b8   :  { %12669 = vmatmul.mubr.msk.f32.vlgmr.msra.gmra.mrb[192].mxu1 %vm404_vm2, %v16313_v7  ;;  %12451 = vmatprep.mubr.msk.f32.mxu0 %vm404_vm2, %v16315_v53  ;;  %v16452_v53 = vsel %vm404_vm2, %v3091_v51, -inf }
 0x1b9   :  { %13326 = vmatpush3.bf16.msra.mxu0 %v16266_v30  ;;  %12671 = vmatprep.mubr.msk.f32.mxu1 %vm404_vm2, %v16323_v13  ;;  %v12152_v54 = vpop.f32.mrb[104].mxu0  ;;  %v12194_v3 = vpop.f32.mrb[104].mxu1 }
 0x1ba   :  { %13426 = vmatpush3.bf16.msra.mxu1 %v16266_v30  ;;  %13328 = vmatprep.subr.bf16.mxu0 %v13327_v24  ;;  %v16468_v21 = vsel %vm404_vm2, %v12152_v54, -inf  ;;  %v16471_v33 = vsel %vm404_vm2, %v12194_v3, -inf  ;;  %v2721_v35 = vpop.f32.mrb[105].mxu0  ;;  %v3123_v43 = vpop.f32.mrb[105].mxu1  ;;  %v10615_v54 = vld [vmem:[%s18835_s3 + $0xf8] sm:$0xff]  ;;  %v16625_v3 = vld [vmem:[#allocation2 + $0x108] sm:$0xff] }
 0x1bb   :  { %12452 = vmatmul.mubr.msk.f32.gmra.mrb[194].mxu0 %vm404_vm2, %v16338_v22  ;;  %13428 = vmatprep.subr.bf16.mxu1 %v13327_v24  ;;  %v2832_v30 = vmax.f32 %v16437_v32, %v16468_v21  ;;  %v3234_v25 = vmax.f32 %v16441_v50, %v16471_v33  ;;  %v16480_v51 = vsel %vm404_vm2, %v2721_v35, -inf  ;;  %v16483_v48 = vsel %vm404_vm2, %v3123_v43, -inf  ;;  %v12153_v49 = vpop.f32.mrb[106].mxu0  ;;  %v12195_v61 = vpop.f32.mrb[106].mxu1  ;;  %v16659_v32 = vld [vmem:[#allocation2 + $0x120] sm:$0xff] }
 0x1bc   :  { %12672 = vmatmul.mubr.msk.f32.gmra.mrb[194].mxu1 %vm404_vm2, %v16346_v17  ;;  %12454 = vmatprep.mubr.msk.f32.mxu0 %vm404_vm2, %v16348_v39  ;;  %v16494_v11 = vsel %vm404_vm2, %v12153_v49, -inf  ;;  %v16497_v5 = vsel %vm404_vm2, %v12195_v61, -inf  ;;  %v2724_v45 = vpop.f32.mrb[107].mxu0  ;;  %v3126_v19 = vpop.f32.mrb[107].mxu1  ;;  %v10596_v39 = vld [vmem:[%s18835_s3 + $0xe0] sm:$0xff]  ;;  %v16539_v43 = vsel %vm404_vm2, %v16385_v46, -inf  ;;  %v16543_v49 = vpack.c.bf16 %v10615_v54, %v10614_v56 }
 0x1bd   :  { %12674 = vmatprep.mubr.msk.f32.mxu1 %vm404_vm2, %v16357_v57  ;;  %13330 = vmatpush3.bf16.msra.mxu0 %v13327_v24  ;;  %v16509_v58 = vsel %vm404_vm2, %v2724_v45, -inf  ;;  %v16512_v40 = vsel %vm404_vm2, %v3126_v19, -inf  ;;  %v16547_v61 = vsel %vm404_vm2, %v16389_v6, -inf  ;;  %v16559_v46 = vsel %vm404_vm2, %v16407_v63, -inf }
 0x1be   :  { %13430 = vmatpush3.bf16.msra.mxu1 %v13327_v24  ;;  %13332 = vmatprep.subr.bf16.mxu0 %v13331_v9  ;;  %v16535_v24 = vsel %vm404_vm2, %v16383_v62, -inf  ;;  %v16555_v62 = vsel %vm404_vm2, %v16405_v26, -inf  ;;  %v16564_v6 = vsel %vm404_vm2, %v16413_v8, -inf  ;;  %v18846_v21 = vmax.f32 %v16449_v41, %v16480_v51 }
 0x1bf   :  { %12455 = vmatmul.mubr.msk.f32.gmra.mrb[196].mxu0 %vm404_vm2, %v16364_v31  ;;  %13432 = vmatprep.subr.bf16.mxu1 %v13331_v9  ;;  %v13339_v31 = vpack.c.bf16 %v10597_v52, %v10596_v39  ;;  %v18847_v33 = vmax.f32 %v16452_v53, %v16483_v48  ;;  %v18849_v51 = vmax.f32 %v16458_v38, %v16497_v5  ;;  %v16699_v38 = vld [vmem:[#allocation2 + $0x128] sm:$0xff] }
 0x1c0   :  { %12675 = vmatmul.mubr.msk.f32.gmra.mrb[196].mxu1 %vm404_vm2, %v16369_v0  ;;  %12457 = vmatprep.mubr.msk.f32.mxu0 %vm404_vm2, %v16371_v1  ;;  %v16551_v1 = vsel %vm404_vm2, %v16391_v27, -inf  ;;  %v16568_v27 = vsel %vm404_vm2, %v16415_v2, -inf }
 0x1c1   :  { %12677 = vmatprep.mubr.msk.f32.mxu1 %vm404_vm2, %v16379_v14  ;;  %13334 = vmatpush3.bf16.msra.mxu0 %v13331_v9  ;;  %v12156_v45 = vpop.f32.mrb[108].mxu0  ;;  %v12198_v19 = vpop.f32.mrb[108].mxu1 }
 0x1c2   :  { %13434 = vmatpush3.bf16.msra.mxu1 %v13331_v9  ;;  %13336 = vmatprep.subr.bf16.mxu0 %v16446_v20  ;;  %v16571_v26 = vsel %vm404_vm2, %v12156_v45, -inf  ;;  %v16574_v39 = vsel %vm404_vm2, %v12198_v19, -inf  ;;  %v2737_v63 = vpop.f32.mrb[109].mxu0  ;;  %v3139_v52 = vpop.f32.mrb[109].mxu1 }
 0x1c3   :  { %12458 = vmatmul.mubr.msk.f32.gmra.mrb[198].mxu0 %vm404_vm2, %v16387_v10  ;;  %13436 = vmatprep.subr.bf16.mxu1 %v16446_v20  ;;  %v16584_v9 = vsel %vm404_vm2, %v2737_v63, -inf  ;;  %v16587_v56 = vsel %vm404_vm2, %v3139_v52, -inf  ;;  %v12157_v54 = vpop.f32.mrb[110].mxu0  ;;  %v12199_v45 = vpop.f32.mrb[110].mxu1  ;;  %v16593_v10 = vld [vmem:[#allocation2 + $0x100] sm:$0xff] }
 0x1c4   :  { %12678 = vmatmul.mubr.msk.f32.gmra.mrb[198].mxu1 %vm404_vm2, %v16395_v29  ;;  %12460 = vmatprep.mubr.msk.f32.mxu0 %vm404_vm2, %v16113_v47  ;;  %v16600_v2 = vsel %vm404_vm2, %v12157_v54, -inf  ;;  %v16603_v52 = vsel %vm404_vm2, %v12199_v45, -inf  ;;  %v2740_v8 = vpop.f32.mrb[111].mxu0  ;;  %v3142_v35 = vpop.f32.mrb[111].mxu1 }
 0x1c5   :  { %12680 = vmatprep.mubr.msk.f32.mxu1 %vm404_vm2, %v16593_v10  ;;  %13338 = vmatpush3.bf16.msra.mxu0 %v16446_v20  ;;  %v16613_v63 = vsel %vm404_vm2, %v2740_v8, -inf  ;;  %v16616_v54 = vsel %vm404_vm2, %v3142_v35, -inf }
 0x1c6   :  { %13438 = vmatpush3.bf16.msra.mxu1 %v16446_v20  ;;  %13340 = vmatprep.subr.bf16.mxu0 %v13339_v31  ;;  %v16631_v20 = vld [vmem:[#allocation2 + $0x110] sm:$0xff] }
 0x1c7   :  { %12461 = vmatmul.mubr.msk.f32.gmra.mrb[200].mxu0 %vm404_vm2, %v16174_v34  ;;  %13440 = vmatprep.subr.bf16.mxu1 %v13339_v31 }
 0x1c8   :  { %12681 = vmatmul.mubr.msk.f32.gmra.mrb[200].mxu1 %vm404_vm2, %v16625_v3  ;;  %12463 = vmatprep.mubr.msk.f32.mxu0 %vm404_vm2, %v16185_v59 }
 0x1c9   :  { %12683 = vmatprep.mubr.msk.f32.mxu1 %vm404_vm2, %v16631_v20  ;;  %13342 = vmatpush3.bf16.msra.mxu0 %v13339_v31  ;;  %v12160_v35 = vpop.f32.mrb[112].mxu0  ;;  %v12202_v8 = vpop.f32.mrb[112].mxu1 }
 0x1ca   :  { %13442 = vmatpush3.bf16.msra.mxu1 %v13339_v31  ;;  %13344 = vmatprep.subr.bf16.mxu0 %v16543_v49  ;;  %v2833_v42 = vsel %vm404_vm2, %v12160_v35, -inf  ;;  %v3235_v45 = vsel %vm404_vm2, %v12202_v8, -inf  ;;  %v2753_v19 = vpop.f32.mrb[113].mxu0  ;;  %v3155_v55 = vpop.f32.mrb[113].mxu1 }
 0x1cb   :  { %12464 = vmatmul.mubr.msk.f32.gmra.mrb[202].mxu0 %vm404_vm2, %v16201_v23  ;;  %13444 = vmatprep.subr.bf16.mxu1 %v16543_v49  ;;  %v16646_v22 = vmax.f32 %v2832_v30, %v2833_v42  ;;  %v16651_v31 = vmax.f32 %v3234_v25, %v3235_v45  ;;  %v2819_v35 = vsel %vm404_vm2, %v2753_v19, -inf  ;;  %v3221_v8 = vsel %vm404_vm2, %v3155_v55, -inf  ;;  %v12161_v29 = vpop.f32.mrb[114].mxu0  ;;  %v12203_v14 = vpop.f32.mrb[114].mxu1 }
 0x1cc   :  { %12684 = vmatmul.mubr.msk.f32.gmra.mrb[202].mxu1 %vm404_vm2, %v16640_v12  ;;  %12466 = vmatprep.mubr.msk.f32.mxu0 %vm404_vm2, %v16213_v18  ;;  %v16664_v50 = vmax.f32 %v18846_v21, %v2819_v35  ;;  %v16669_v30 = vmax.f32 %v18847_v33, %v3221_v8  ;;  %v2840_v25 = vsel %vm404_vm2, %v12161_v29, -inf  ;;  %v3242_v55 = vsel %vm404_vm2, %v12203_v14, -inf  ;;  %v2756_v42 = vpop.f32.mrb[115].mxu0  ;;  %v3158_v19 = vpop.f32.mrb[115].mxu1 }
 0x1cd   :  { %12686 = vmatprep.mubr.msk.f32.mxu1 %vm404_vm2, %v16659_v32  ;;  %v18848_v45 = vmax.f32 %v16455_v36, %v16494_v11  ;;  %v16683_v53 = vmax.f32 %v18849_v51, %v3242_v55  ;;  %v2826_v48 = vsel %vm404_vm2, %v2756_v42, -inf  ;;  %v3228_v29 = vsel %vm404_vm2, %v3158_v19, -inf  ;;  %v16705_v11 = vld [vmem:[#allocation2 + $0x130] sm:$0xff]  ;;  %v16719_v55 = vld [vmem:[#allocation2 + $0x138] sm:$0xff] }
 0x1ce   :  { %v18850_v14 = vmax.f32 %v16462_v16, %v16509_v58  ;;  %v18851_v8 = vmax.f32 %v16465_v28, %v16512_v40  ;;  %v10616_v16 = vld [vmem:[%s18835_s3 + $0x100] sm:$0xff]  ;;  %v10617_v28 = vld [vmem:[%s18835_s3 + $0x108] sm:$0xff]  ;;  %v18852_v19 = vmax.f32 %v16535_v24, %v16571_v26  ;;  %v18853_v51 = vmax.f32 %v16539_v43, %v16574_v39 }
 0x1cf   :  { %v16678_v41 = vmax.f32 %v18848_v45, %v2840_v25  ;;  %12467 = vmatmul.mubr.msk.f32.gmra.mrb[204].mxu0 %vm404_vm2, %v16243_v44  ;;  %v16721_v42 = vpack.c.bf16 %v10617_v28, %v10616_v16  ;;  %v18854_v24 = vmax.f32 %v16547_v61, %v16584_v9  ;;  %v18855_v43 = vmax.f32 %v16551_v1, %v16587_v56 }
 0x1d0   :  { %v16690_v35 = vmax.f32 %v18850_v14, %v2826_v48  ;;  %v16695_v36 = vmax.f32 %v18851_v8, %v3228_v29  ;;  %12687 = vmatmul.mubr.msk.f32.gmra.mrb[204].mxu1 %vm404_vm2, %v16699_v38  ;;  %12469 = vmatprep.mubr.msk.f32.mxu0 %vm404_vm2, %v16256_v60  ;;  %v18857_v9 = vmax.f32 %v16559_v46, %v16603_v52  ;;  %v10618_v46 = vld [vmem:[%s18835_s3 + $0x110] sm:$0xff] }
 0x1d1   :  { %12689 = vmatprep.mubr.msk.f32.mxu1 %vm404_vm2, %v16705_v11  ;;  %v12164_v5 = vpop.f32.mrb[116].mxu0  ;;  %v12206_v58 = vpop.f32.mrb[116].mxu1 }
 0x1d2   :  { %v2861_v40 = vsel %vm404_vm2, %v12164_v5, -inf  ;;  %v3263_v21 = vsel %vm404_vm2, %v12206_v58, -inf  ;;  %v2769_v33 = vpop.f32.mrb[117].mxu0  ;;  %v3171_v25 = vpop.f32.mrb[117].mxu1 }
 0x1d3   :  { %12470 = vmatmul.mubr.msk.f32.gmra.mrb[206].mxu0 %vm404_vm2, %v16275_v4  ;;  %v16726_v45 = vmax.f32 %v18852_v19, %v2861_v40  ;;  %v16731_v48 = vmax.f32 %v18853_v51, %v3263_v21  ;;  %v2847_v29 = vsel %vm404_vm2, %v2769_v33, -inf  ;;  %v3249_v14 = vsel %vm404_vm2, %v3171_v25, -inf  ;;  %v12165_v8 = vpop.f32.mrb[118].mxu0  ;;  %v12207_v16 = vpop.f32.mrb[118].mxu1 }
 0x1d4   :  { %12690 = vmatmul.mubr.msk.f32.gmra.mrb[206].mxu1 %vm404_vm2, %v16719_v55  ;;  %12492 = vmatprep.mubr.msk.f32.mxu0 %vm404_vm2, %v16113_v47  ;;  %v16742_v26 = vmax.f32 %v18854_v24, %v2847_v29  ;;  %v16747_v39 = vmax.f32 %v18855_v43, %v3249_v14  ;;  %v2868_v28 = vsel %vm404_vm2, %v12165_v8, -inf  ;;  %v3270_v5 = vsel %vm404_vm2, %v12207_v16, -inf  ;;  %v2772_v58 = vpop.f32.mrb[119].mxu0  ;;  %v3174_v40 = vpop.f32.mrb[119].mxu1 }
 0x1d5   :  { %12712 = vmatprep.mubr.msk.f32.mxu1 %vm404_vm2, %v16593_v10  ;;  %v18856_v47 = vmax.f32 %v16555_v62, %v16600_v2  ;;  %v16761_v1 = vmax.f32 %v18857_v9, %v3270_v5  ;;  %v2854_v56 = vsel %vm404_vm2, %v2772_v58, -inf  ;;  %v3256_v21 = vsel %vm404_vm2, %v3174_v40, -inf }
 0x1d6   :  { %v18858_v33 = vmax.f32 %v16564_v6, %v16613_v63  ;;  %v18859_v19 = vmax.f32 %v16568_v27, %v16616_v54  ;;  %v10619_v6 = vld [vmem:[%s18835_s3 + $0x118] sm:$0xff]  ;;  %v10620_v27 = vld [vmem:[%s18835_s3 + $0x120] sm:$0xff] }
 0x1d7   :  { %v16756_v61 = vmax.f32 %v18856_v47, %v2868_v28  ;;  %12493 = vmatmul.mubr.msk.f32.vlgmr.msra.gmra.mrb[192].mxu0 %vm404_vm2, %v16174_v34  ;;  %v10621_v34 = vld [vmem:[%s18835_s3 + $0x128] sm:$0xff]  ;;  %v13351_v29 = vpack.c.bf16 %v10619_v6, %v10618_v46 }
 0x1d8   :  { %v16768_v25 = vmax.f32 %v18858_v33, %v2854_v56  ;;  %v16773_v62 = vmax.f32 %v18859_v19, %v3256_v21  ;;  %12713 = vmatmul.mubr.msk.f32.vlgmr.msra.gmra.mrb[192].mxu1 %vm404_vm2, %v16625_v3  ;;  %12495 = vmatprep.mubr.msk.f32.mxu0 %vm404_vm2, %v16185_v59  ;;  %v16803_v14 = vpack.c.bf16 %v10621_v34, %v10620_v27 }
 0x1d9   :  { %13346 = vmatpush3.bf16.msra.mxu0 %v16543_v49  ;;  %12715 = vmatprep.mubr.msk.f32.mxu1 %vm404_vm2, %v16631_v20  ;;  %v12168_v59 = vpop.f32.mrb[120].mxu0  ;;  %v12210_v2 = vpop.f32.mrb[120].mxu1 }
 0x1da   :  { %13446 = vmatpush3.bf16.msra.mxu1 %v16543_v49  ;;  %13348 = vmatprep.subr.bf16.mxu0 %v16721_v42  ;;  %v2835_v63 = vsel %vm404_vm2, %v12168_v59, -inf  ;;  %v3237_v52 = vsel %vm404_vm2, %v12210_v2, -inf  ;;  %v2785_v54 = vpop.f32.mrb[121].mxu0  ;;  %v3187_v51 = vpop.f32.mrb[121].mxu1 }
 0x1db   :  { %12496 = vmatmul.mubr.msk.f32.gmra.mrb[194].mxu0 %vm404_vm2, %v16201_v23  ;;  %13448 = vmatprep.subr.bf16.mxu1 %v16721_v42  ;;  %v2836_v49 = vmax.f32 %v16646_v22, %v2835_v63  ;;  %v3238_v8 = vmax.f32 %v16651_v31, %v3237_v52  ;;  %v2821_v16 = vsel %vm404_vm2, %v2785_v54, -inf  ;;  %v3223_v24 = vsel %vm404_vm2, %v3187_v51, -inf  ;;  %v12169_v43 = vpop.f32.mrb[122].mxu0  ;;  %v12211_v28 = vpop.f32.mrb[122].mxu1 }
 0x1dc   :  { %12716 = vmatmul.mubr.msk.f32.gmra.mrb[194].mxu1 %vm404_vm2, %v16640_v12  ;;  %12498 = vmatprep.mubr.msk.f32.mxu0 %vm404_vm2, %v16213_v18  ;;  %v2822_v23 = vmax.f32 %v16664_v50, %v2821_v16  ;;  %v3224_v5 = vmax.f32 %v16669_v30, %v3223_v24  ;;  %v2842_v22 = vsel %vm404_vm2, %v12169_v43, -inf  ;;  %v3244_v31 = vsel %vm404_vm2, %v12211_v28, -inf  ;;  %v2788_v58 = vpop.f32.mrb[123].mxu0  ;;  %v3190_v40 = vpop.f32.mrb[123].mxu1  ;;  %v10622_v30 = vld [vmem:[%s18835_s3 + $0x130] sm:$0xff] }
 0x1dd   :  { %12718 = vmatprep.mubr.msk.f32.mxu1 %vm404_vm2, %v16659_v32  ;;  %13350 = vmatpush3.bf16.msra.mxu0 %v16721_v42  ;;  %v2874_v47 = vadd.f32 %v16225_v37, %v2836_v49  ;;  %v3276_v9 = vadd.f32 %v16225_v37, %v3238_v8  ;;  %v2843_v18 = vmax.f32 %v16678_v41, %v2842_v22  ;;  %v2828_v33 = vsel %vm404_vm2, %v2788_v58, -inf  ;;  %v10623_v41 = vld [vmem:[%s18835_s3 + $0x138] sm:$0xff] }
 0x1de   :  { %v3245_v50 = vmax.f32 %v16683_v53, %v3244_v31  ;;  %13450 = vmatpush3.bf16.msra.mxu1 %v16721_v42  ;;  %v2872_v56 = vadd.f32 %v16225_v37, %v2822_v23  ;;  %v3274_v21 = vadd.f32 %v16225_v37, %v3224_v5  ;;  %v3230_v19 = vsel %vm404_vm2, %v3190_v40, -inf  ;;  %13352 = vmatprep.subr.bf16.mxu0 %v13351_v29  ;;  %v10640_v53 = vld [vmem:[%s18835_s3 + $0x140] sm:$0xff]  ;;  %v10641_v42 = vld [vmem:[%s18835_s3 + $0x148] sm:$0xff] }
 0x1df   :  { %12499 = vmatmul.mubr.msk.f32.gmra.mrb[196].mxu0 %vm404_vm2, %v16243_v44  ;;  %v2882_v46 = vmax.f32 %v2874_v47, 0.0  ;;  %v3284_v6 = vmax.f32 %v3276_v9, 0.0  ;;  %v2875_v27 = vadd.f32 %v16225_v37, %v2843_v18  ;;  %v2829_v2 = vmax.f32 %v16690_v35, %v2828_v33  ;;  %13452 = vmatprep.subr.bf16.mxu1 %v13351_v29 }
 0x1e0   :  { %v3277_v34 = vadd.f32 %v16225_v37, %v3245_v50  ;;  %12719 = vmatmul.mubr.msk.f32.gmra.mrb[196].mxu1 %vm404_vm2, %v16699_v38  ;;  %12501 = vmatprep.mubr.msk.f32.mxu0 %vm404_vm2, %v16256_v60  ;;  %v2880_v44 = vmax.f32 %v2872_v56, 0.0  ;;  %v3282_v59 = vmax.f32 %v3274_v21, 0.0  ;;  %v3231_v63 = vmax.f32 %v16695_v36, %v3230_v19  ;;  %v16899_v19 = vld [vmem:[#allocation2 + $0x148] sm:$0xff] }
 0x1e1   :  { %12721 = vmatprep.mubr.msk.f32.mxu1 %vm404_vm2, %v16705_v11  ;;  %2891 = vst.msk [vmem:[#allocation2 + $0x190] sm:$0xff] %vm404_vm2, %v2882_v46  ;;  %3293 = vst.msk [vmem:[#allocation2 + $0x1d0] sm:$0xff] %vm404_vm2, %v3284_v6  ;;  %v2883_v52 = vmax.f32 %v2875_v27, 0.0  ;;  %v12172_v51 = vpop.f32.mrb[124].mxu0  ;;  %v12214_v49 = vpop.f32.mrb[124].mxu1  ;;  %13354 = vmatpush3.bf16.msra.mxu0 %v13351_v29  ;;  %v16855_v60 = vpack.c.bf16 %v10623_v41, %v10622_v30  ;;  %v16857_v8 = vpack.c.bf16 %v10641_v42, %v10640_v53 }
 0x1e2   :  { %v3285_v54 = vmax.f32 %v3277_v34, 0.0  ;;  %13454 = vmatpush3.bf16.msra.mxu1 %v13351_v29  ;;  %2889 = vst.msk [vmem:[#allocation2 + $0x180] sm:$0xff] %vm404_vm2, %v2880_v44  ;;  %3291 = vst.msk [vmem:[#allocation2 + $0x1c0] sm:$0xff] %vm404_vm2, %v3282_v59  ;;  %v2873_v35 = vadd.f32 %v16225_v37, %v2829_v2  ;;  %v3275_v36 = vadd.f32 %v16225_v37, %v3231_v63  ;;  %v2863_v16 = vsel %vm404_vm2, %v12172_v51, -inf  ;;  %v2801_v43 = vpop.f32.mrb[125].mxu0  ;;  %v3203_v28 = vpop.f32.mrb[125].mxu1 }
 0x1e3   :  { %v3265_v24 = vsel %vm404_vm2, %v12214_v49, -inf  ;;  %12502 = vmatmul.mubr.msk.f32.gmra.mrb[198].mxu0 %vm404_vm2, %v16275_v4  ;;  %13356 = vmatprep.subr.bf16.mxu0 %v16803_v14  ;;  %2892 = vst.msk [vmem:[#allocation2 + $0x198] sm:$0xff] %vm404_vm2, %v2883_v52  ;;  %v2864_v29 = vmax.f32 %v16726_v45, %v2863_v16  ;;  %v2849_v5 = vsel %vm404_vm2, %v2801_v43, -inf  ;;  %v3251_v22 = vsel %vm404_vm2, %v3203_v28, -inf  ;;  %v12173_v31 = vpop.f32.mrb[126].mxu0  ;;  %v12215_v58 = vpop.f32.mrb[126].mxu1 }
 0x1e4   :  { %3294 = vst.msk [vmem:[#allocation2 + $0x1d8] sm:$0xff] %vm404_vm2, %v3285_v54  ;;  %v3266_v23 = vmax.f32 %v16731_v48, %v3265_v24  ;;  %12722 = vmatmul.mubr.msk.f32.gmra.mrb[198].mxu1 %vm404_vm2, %v16719_v55  ;;  %12504 = vmatprep.mubr.msk.f32.mxu0 %vm404_vm2, %v16290_v15  ;;  %v16878_v4 = vld [vmem:[#allocation2 + $0x140] sm:$0xff]  ;;  %v2881_v40 = vmax.f32 %v2873_v35, 0.0  ;;  %v3283_v47 = vmax.f32 %v3275_v36, 0.0  ;;  %v2850_v45 = vmax.f32 %v16742_v26, %v2849_v5  ;;  %v2804_v9 = vpop.f32.mrb[127].mxu0  ;;  %v3206_v18 = vpop.f32.mrb[127].mxu1 }
 0x1e5   :  { %v3252_v48 = vmax.f32 %v16747_v39, %v3251_v22  ;;  %12724 = vmatprep.mubr.msk.f32.mxu1 %vm404_vm2, %v16878_v4  ;;  %13456 = vmatprep.subr.bf16.mxu1 %v16803_v14  ;;  %v2878_v50 = vadd.f32 %v16225_v37, %v2864_v29  ;;  %v2870_v15 = vsel %vm404_vm2, %v12173_v31, -inf  ;;  %v3272_v56 = vsel %vm404_vm2, %v12215_v58, -inf  ;;  %v16939_v35 = vld [vmem:[#allocation2 + $0x160] sm:$0xff]  ;;  %v16959_v24 = vld [vmem:[#allocation2 + $0x170] sm:$0xff]  ;;  %v18861_v5 = vld [vmem:[#allocation5_spill] sm:$0xff] }
 0x1e6   :  { %v3280_v30 = vadd.f32 %v16225_v37, %v3266_v23  ;;  %13358 = vmatpush3.bf16.msra.mxu0 %v16803_v14  ;;  %13458 = vmatpush3.bf16.msra.mxu1 %v16803_v14  ;;  %2890 = vst.msk [vmem:[#allocation2 + $0x188] sm:$0xff] %vm404_vm2, %v2881_v40  ;;  %3292 = vst.msk [vmem:[#allocation2 + $0x1c8] sm:$0xff] %vm404_vm2, %v3283_v47  ;;  %v2876_v26 = vadd.f32 %v16225_v37, %v2850_v45  ;;  %v2856_v14 = vsel %vm404_vm2, %v2804_v9, -inf  ;;  %v18860_v16 = vld [vmem:[#allocation4_spill] sm:$0xff]  ;;  %v16973_v22 = vld [vmem:[#allocation2 + $0x178] sm:$0xff] }
 0x1e7   :  { %v3278_v39 = vadd.f32 %v16225_v37, %v3252_v48  ;;  %v2871_v21 = vmax.f32 %v16756_v61, %v2870_v15  ;;  %v3273_v33 = vmax.f32 %v16761_v1, %v3272_v56  ;;  %12505 = vmatmul.mubr.msk.f32.gmra.mrb[200].mxu0 %vm404_vm2, %v16313_v7  ;;  %v2886_v41 = vmax.f32 %v2878_v50, 0.0  ;;  %v16907_v61 = vld [vmem:[#allocation2 + $0x150] sm:$0xff]  ;;  %13360 = vmatprep.subr.bf16.mxu0 %v16855_v60  ;;  %v5621_v28 = vld [vmem:[#allocation2 + $0xc0] sm:$0xff]  ;;  %v10643_v58 = vld [vmem:[%s18835_s3 + $0x158] sm:$0xff] }
 0x1e8   :  { %v3288_v53 = vmax.f32 %v3280_v30, 0.0  ;;  %v3258_v42 = vsel %vm404_vm2, %v3206_v18, -inf  ;;  %12725 = vmatmul.mubr.msk.f32.gmra.mrb[200].mxu1 %vm404_vm2, %v16899_v19  ;;  %12507 = vmatprep.mubr.msk.f32.mxu0 %vm404_vm2, %v16323_v13  ;;  %v2884_v1 = vmax.f32 %v2876_v26, 0.0  ;;  %v2857_v27 = vmax.f32 %v16768_v25, %v2856_v14  ;;  %v16930_v25 = vld [vmem:[#allocation2 + $0x158] sm:$0xff]  ;;  %v10642_v31 = vld [vmem:[%s18835_s3 + $0x150] sm:$0xff]  ;;  %v5622_v9 = vld [vmem:[#allocation2 + $0xc8] sm:$0xff] }
 0x1e9   :  { %v3286_v46 = vmax.f32 %v3278_v39, 0.0  ;;  %v2879_v7 = vadd.f32 %v16225_v37, %v2871_v21  ;;  %v3281_v6 = vadd.f32 %v16225_v37, %v3273_v33  ;;  %12727 = vmatprep.mubr.msk.f32.mxu1 %vm404_vm2, %v16907_v61  ;;  %2895 = vst.msk [vmem:[#allocation2 + $0x1b0] sm:$0xff] %vm404_vm2, %v2886_v41  ;;  %v3259_v13 = vmax.f32 %v16773_v62, %v3258_v42  ;;  %v16918_v34 = vpop.f32.mrb[128].mxu0  ;;  %v16920_v44 = vpop.f32.mrb[128].mxu1  ;;  %v10644_v50 = vld [vmem:[%s18835_s3 + $0x160] sm:$0xff]  ;;  %v10645_v30 = vld [vmem:[%s18835_s3 + $0x168] sm:$0xff] }
 0x1ea   :  { %3297 = vst.msk [vmem:[#allocation2 + $0x1f0] sm:$0xff] %vm404_vm2, %v3288_v53  ;;  %13460 = vmatprep.subr.bf16.mxu1 %v16855_v60  ;;  %13362 = vmatpush3.bf16.msra.mxu0 %v16855_v60  ;;  %2893 = vst.msk [vmem:[#allocation2 + $0x1a0] sm:$0xff] %vm404_vm2, %v2884_v1  ;;  %v3493_v63 = vpop.f32.mrb[129].mxu0  ;;  %v16926_v52 = vpop.f32.mrb[129].mxu1  ;;  %v2877_v62 = vadd.f32 %v16225_v37, %v2857_v27  ;;  %v13367_v18 = vpack.c.bf16 %v10643_v58, %v10642_v31  ;;  %v5623_v15 = vld [vmem:[#allocation2 + $0xd0] sm:$0xff]  ;;  %v10647_v26 = vld [vmem:[%s18835_s3 + $0x178] sm:$0xff] }
 0x1eb   :  { %3295 = vst.msk [vmem:[#allocation2 + $0x1e0] sm:$0xff] %vm404_vm2, %v3286_v46  ;;  %v2887_v59 = vmax.f32 %v2879_v7, 0.0  ;;  %v3289_v2 = vmax.f32 %v3281_v6, 0.0  ;;  %12508 = vmatmul.mubr.msk.f32.gmra.mrb[202].mxu0 %vm404_vm2, %v16346_v17  ;;  %13462 = vmatpush3.bf16.msra.mxu1 %v16855_v60  ;;  %v3279_v54 = vadd.f32 %v16225_v37, %v3259_v13  ;;  %v12229_v51 = vpop.f32.mrb[130].mxu0  ;;  %v12271_v49 = vpop.f32.mrb[130].mxu1  ;;  %v10646_v56 = vld [vmem:[%s18835_s3 + $0x170] sm:$0xff]  ;;  %v17013_v39 = vpack.c.bf16 %v10645_v30, %v10644_v50 }
 0x1ec   :  { %12728 = vmatmul.mubr.msk.f32.gmra.mrb[202].mxu1 %vm404_vm2, %v16930_v25  ;;  %12510 = vmatprep.mubr.msk.f32.mxu0 %vm404_vm2, %v16357_v57  ;;  %v3496_v17 = vpop.f32.mrb[131].mxu0  ;;  %v16945_v60 = vpop.f32.mrb[131].mxu1  ;;  %v2885_v37 = vmax.f32 %v2877_v62, 0.0  ;;  %v16951_v57 = vld [vmem:[#allocation2 + $0x168] sm:$0xff]  ;;  %v17017_v21 = vsel %vm404_vm2, %v16918_v34, -inf  ;;  %v17021_v33 = vsel %vm404_vm2, %v16920_v44, -inf  ;;  %v17027_v1 = vpack.c.bf16 %v10647_v26, %v10646_v56 }
 0x1ed   :  { %2896 = vst.msk [vmem:[#allocation2 + $0x1b8] sm:$0xff] %vm404_vm2, %v2887_v59  ;;  %3298 = vst.msk [vmem:[#allocation2 + $0x1f8] sm:$0xff] %vm404_vm2, %v3289_v2  ;;  %12730 = vmatprep.mubr.msk.f32.mxu1 %vm404_vm2, %v16939_v35  ;;  %13364 = vmatprep.subr.bf16.mxu0 %v16857_v8  ;;  %v3287_v36 = vmax.f32 %v3279_v54, 0.0  ;;  %v17024_v41 = vsel %vm404_vm2, %v3493_v63, -inf  ;;  %v5624_v14 = vld [vmem:[#allocation2 + $0xd8] sm:$0xff]  ;;  %v5625_v42 = vld [vmem:[#allocation2 + $0xe0] sm:$0xff] }
 0x1ee   :  { %13464 = vmatprep.subr.bf16.mxu1 %v16857_v8  ;;  %2894 = vst.msk [vmem:[#allocation2 + $0x1a8] sm:$0xff] %vm404_vm2, %v2885_v37  ;;  %v17031_v46 = vsel %vm404_vm2, %v16926_v52, -inf  ;;  %v17034_v7 = vsel %vm404_vm2, %v12229_v51, -inf  ;;  %v17037_v6 = vsel %vm404_vm2, %v12271_v49, -inf  ;;  %v17044_v34 = vsel %vm404_vm2, %v3496_v17, -inf  ;;  %v5626_v58 = vld [vmem:[#allocation2 + $0xe8] sm:$0xff] }
 0x1ef   :  { %12511 = vmatmul.mubr.msk.f32.gmra.mrb[204].mxu0 %vm404_vm2, %v16369_v0  ;;  %3296 = vst.msk [vmem:[#allocation2 + $0x1e8] sm:$0xff] %vm404_vm2, %v3287_v36  ;;  %v10649_v50 = vld [vmem:[%s18835_s3 + $0x188] sm:$0xff]  ;;  %v17088_v30 = vsel %vm404_vm2, %v16945_v60, -inf  ;;  %v5627_v26 = vld [vmem:[#allocation2 + $0xf0] sm:$0xff] }
 0x1f0   :  { %12731 = vmatmul.mubr.msk.f32.gmra.mrb[204].mxu1 %vm404_vm2, %v16951_v57  ;;  %12513 = vmatprep.mubr.msk.f32.mxu0 %vm404_vm2, %v18860_v16  ;;  %v7400_v60 = vld [vmem:[%s18835_s3 + $0x8] sm:$0xff] }
 0x1f1   :  { %12733 = vmatprep.mubr.msk.f32.mxu1 %vm404_vm2, %v16959_v24  ;;  %v16963_v43 = vpop.f32.mrb[132].mxu0  ;;  %v16965_v0 = vpop.f32.mrb[132].mxu1 }
 0x1f2   :  { %v16967_v29 = vpop.f32.mrb[133].mxu0  ;;  %v16969_v23 = vpop.f32.mrb[133].mxu1 }
 0x1f3   :  { %12514 = vmatmul.mubr.msk.f32.gmra.mrb[206].mxu0 %vm404_vm2, %v18861_v5  ;;  %v16983_v40 = vpop.f32.mrb[134].mxu0  ;;  %v16985_v47 = vpop.f32.mrb[134].mxu1 }
 0x1f4   :  { %12734 = vmatmul.mubr.msk.f32.gmra.mrb[206].mxu1 %vm404_vm2, %v16973_v22  ;;  %12536 = vmatprep.mubr.msk.f32.mxu0 %vm404_vm2, %v5621_v28  ;;  %v16990_v45 = vpop.f32.mrb[135].mxu0  ;;  %v16992_v48 = vpop.f32.mrb[135].mxu1 }
 0x1f5   :  { %12756 = vmatprep.mubr.msk.f32.mxu1 %vm404_vm2, %v16878_v4 }
 0x1f7   :  { %12537 = vmatmul.mubr.msk.f32.vlgmr.msra.gmra.mrb[192].mxu0 %vm404_vm2, %v5622_v9  ;;  %v10648_v9 = vld [vmem:[%s18835_s3 + $0x180] sm:$0xff] }
 0x1f8   :  { %12757 = vmatmul.mubr.msk.f32.vlgmr.msra.gmra.mrb[192].mxu1 %vm404_vm2, %v16899_v19  ;;  %12539 = vmatprep.mubr.msk.f32.mxu0 %vm404_vm2, %v5623_v15 }
 0x1f9   :  { %13366 = vmatpush3.bf16.msra.mxu0 %v16857_v8  ;;  %12759 = vmatprep.mubr.msk.f32.mxu1 %vm404_vm2, %v16907_v61  ;;  %v12236_v53 = vpop.f32.mrb[136].mxu0 }
 0x1fa   :  { %13466 = vmatpush3.bf16.msra.mxu1 %v16857_v8  ;;  %13368 = vmatprep.subr.bf16.mxu0 %v13367_v18  ;;  %v17040_v27 = vsel %vm404_vm2, %v12236_v53, -inf  ;;  %v12278_v8 = vpop.f32.mrb[136].mxu1  ;;  %v3525_v13 = vpop.f32.mrb[137].mxu0  ;;  %v7399_v53 = vld [vmem:[%s18835_s3] sm:$0xff] }
 0x1fb   :  { %12540 = vmatmul.mubr.msk.f32.gmra.mrb[194].mxu0 %vm404_vm2, %v5624_v14  ;;  %13468 = vmatprep.subr.bf16.mxu1 %v13367_v18  ;;  %v3636_v44 = vmax.f32 %v17017_v21, %v17040_v27  ;;  %v17049_v59 = vsel %vm404_vm2, %v12278_v8, -inf  ;;  %v17052_v2 = vsel %vm404_vm2, %v3525_v13, -inf  ;;  %v3927_v63 = vpop.f32.mrb[137].mxu1  ;;  %v12237_v52 = vpop.f32.mrb[138].mxu0  ;;  %v17115_v8 = vsel %vm404_vm2, %v16963_v43, -inf }
 0x1fc   :  { %12760 = vmatmul.mubr.msk.f32.gmra.mrb[194].mxu1 %vm404_vm2, %v16930_v25  ;;  %12542 = vmatprep.mubr.msk.f32.mxu0 %vm404_vm2, %v5625_v42  ;;  %v4038_v62 = vmax.f32 %v17021_v33, %v17049_v59  ;;  %v3622_v54 = vmax.f32 %v17024_v41, %v17052_v2  ;;  %v17062_v51 = vsel %vm404_vm2, %v3927_v63, -inf  ;;  %v17065_v49 = vsel %vm404_vm2, %v12237_v52, -inf  ;;  %v12279_v17 = vpop.f32.mrb[138].mxu1  ;;  %v3528_v37 = vpop.f32.mrb[139].mxu0 }
 0x1fd   :  { %12762 = vmatprep.mubr.msk.f32.mxu1 %vm404_vm2, %v16939_v35  ;;  %13370 = vmatpush3.bf16.msra.mxu0 %v13367_v18  ;;  %v4024_v36 = vmax.f32 %v17031_v46, %v17062_v51  ;;  %v3643_v16 = vmax.f32 %v17034_v7, %v17065_v49  ;;  %v17074_v28 = vsel %vm404_vm2, %v12279_v17, -inf  ;;  %v17077_v5 = vsel %vm404_vm2, %v3528_v37, -inf  ;;  %v3930_v31 = vpop.f32.mrb[139].mxu1  ;;  %v5628_v17 = vld [vmem:[#allocation2 + $0xf8] sm:$0xff]  ;;  %v17272_v7 = vld [vmem:[#allocation2 + $0x1a8] sm:$0xff] }
 0x1fe   :  { %13470 = vmatpush3.bf16.msra.mxu1 %v13367_v18  ;;  %13372 = vmatprep.subr.bf16.mxu0 %v17013_v39  ;;  %v4045_v15 = vmax.f32 %v17037_v6, %v17074_v28  ;;  %v17095_v56 = vsel %vm404_vm2, %v3930_v31, -inf  ;;  %v13379_v42 = vpack.c.bf16 %v10649_v50, %v10648_v9  ;;  %v17119_v13 = vsel %vm404_vm2, %v16965_v0, -inf  ;;  %v17283_v6 = vld [vmem:[#allocation2 + $0x1b0] sm:$0xff] }
 0x1ff   :  { %12543 = vmatmul.mubr.msk.f32.gmra.mrb[196].mxu0 %vm404_vm2, %v5626_v58  ;;  %13472 = vmatprep.subr.bf16.mxu1 %v17013_v39  ;;  %v17123_v63 = vsel %vm404_vm2, %v16967_v29, -inf  ;;  %v17127_v37 = vpack.c.bf16 %v7400_v60, %v7399_v53  ;;  %v17131_v43 = vsel %vm404_vm2, %v16969_v23, -inf  ;;  %v17135_v0 = vsel %vm404_vm2, %v16983_v40, -inf  ;;  %v17162_v53 = vld [vmem:[#allocation2 + $0x180] sm:$0xff] }
 0x200   :  { %12763 = vmatmul.mubr.msk.f32.gmra.mrb[196].mxu1 %vm404_vm2, %v16951_v57  ;;  %12545 = vmatprep.mubr.msk.f32.mxu0 %vm404_vm2, %v5627_v26  ;;  %v17139_v29 = vsel %vm404_vm2, %v16985_v47, -inf  ;;  %v17148_v23 = vsel %vm404_vm2, %v16990_v45, -inf  ;;  %v17190_v40 = vsel %vm404_vm2, %v16992_v48, -inf  ;;  %v17209_v48 = vld [vmem:[#allocation2 + $0x190] sm:$0xff]  ;;  %v18862_v46 = vmax.f32 %v17044_v34, %v17077_v5  ;;  %v7402_v34 = vld [vmem:[%s18835_s3 + $0x18] sm:$0xff] }
 0x201   :  { %12765 = vmatprep.mubr.msk.f32.mxu1 %vm404_vm2, %v16959_v24  ;;  %13374 = vmatpush3.bf16.msra.mxu0 %v17013_v39  ;;  %v12240_v52 = vpop.f32.mrb[140].mxu0  ;;  %v18863_v49 = vmax.f32 %v17088_v30, %v17095_v56 }
 0x202   :  { %13474 = vmatpush3.bf16.msra.mxu1 %v17013_v39  ;;  %13376 = vmatprep.subr.bf16.mxu0 %v17027_v1  ;;  %v17142_v31 = vsel %vm404_vm2, %v12240_v52, -inf  ;;  %v12282_v39 = vpop.f32.mrb[140].mxu1  ;;  %v3541_v58 = vpop.f32.mrb[141].mxu0 }
 0x203   :  { %12546 = vmatmul.mubr.msk.f32.gmra.mrb[198].mxu0 %vm404_vm2, %v5628_v17  ;;  %13476 = vmatprep.subr.bf16.mxu1 %v17027_v1  ;;  %v17153_v9 = vsel %vm404_vm2, %v12282_v39, -inf  ;;  %v17156_v47 = vsel %vm404_vm2, %v3541_v58, -inf  ;;  %v3943_v50 = vpop.f32.mrb[141].mxu1  ;;  %v12241_v26 = vpop.f32.mrb[142].mxu0  ;;  %v18864_v56 = vmax.f32 %v17115_v8, %v17142_v31 }
 0x204   :  { %12766 = vmatmul.mubr.msk.f32.gmra.mrb[198].mxu1 %vm404_vm2, %v16973_v22  ;;  %12548 = vmatprep.mubr.msk.f32.mxu0 %vm404_vm2, %v16593_v10  ;;  %v17169_v52 = vsel %vm404_vm2, %v3943_v50, -inf  ;;  %v17172_v17 = vsel %vm404_vm2, %v12241_v26, -inf  ;;  %v12283_v39 = vpop.f32.mrb[142].mxu1  ;;  %v3544_v58 = vpop.f32.mrb[143].mxu0  ;;  %v17217_v10 = vld [vmem:[#allocation2 + $0x198] sm:$0xff]  ;;  %v18866_v31 = vmax.f32 %v17123_v63, %v17156_v47 }
 0x205   :  { %12768 = vmatprep.mubr.msk.f32.mxu1 %vm404_vm2, %v17162_v53  ;;  %13378 = vmatpush3.bf16.msra.mxu0 %v17027_v1  ;;  %v17182_v60 = vsel %vm404_vm2, %v12283_v39, -inf  ;;  %v17185_v50 = vsel %vm404_vm2, %v3544_v58, -inf  ;;  %v3946_v26 = vpop.f32.mrb[143].mxu1  ;;  %v17201_v58 = vld [vmem:[#allocation2 + $0x188] sm:$0xff] }
 0x206   :  { %13478 = vmatpush3.bf16.msra.mxu1 %v17027_v1  ;;  %13380 = vmatprep.subr.bf16.mxu0 %v13379_v42  ;;  %v17197_v39 = vsel %vm404_vm2, %v3946_v26, -inf }
 0x207   :  { %12549 = vmatmul.mubr.msk.f32.gmra.mrb[200].mxu0 %vm404_vm2, %v16625_v3  ;;  %13480 = vmatprep.subr.bf16.mxu1 %v13379_v42 }
 0x208   :  { %12769 = vmatmul.mubr.msk.f32.gmra.mrb[200].mxu1 %vm404_vm2, %v17201_v58  ;;  %12551 = vmatprep.mubr.msk.f32.mxu0 %vm404_vm2, %v16631_v20 }
 0x209   :  { %12771 = vmatprep.mubr.msk.f32.mxu1 %vm404_vm2, %v17209_v48  ;;  %13382 = vmatpush3.bf16.msra.mxu0 %v13379_v42  ;;  %v12244_v26 = vpop.f32.mrb[144].mxu0 }
 0x20a   :  { %13482 = vmatpush3.bf16.msra.mxu1 %v13379_v42  ;;  %13484 = vmatprep.subr.bf16.mxu0 %v17127_v37  ;;  %v3637_v3 = vsel %vm404_vm2, %v12244_v26, -inf  ;;  %v12286_v45 = vpop.f32.mrb[144].mxu1  ;;  %v3557_v1 = vpop.f32.mrb[145].mxu0 }
 0x20b   :  { %12552 = vmatmul.mubr.msk.f32.gmra.mrb[202].mxu0 %vm404_vm2, %v16640_v12  ;;  %13584 = vmatprep.subr.bf16.mxu1 %v17127_v37  ;;  %v17223_v20 = vmax.f32 %v3636_v44, %v3637_v3  ;;  %v4039_v42 = vsel %vm404_vm2, %v12286_v45, -inf  ;;  %v3623_v14 = vsel %vm404_vm2, %v3557_v1, -inf  ;;  %v3959_v18 = vpop.f32.mrb[145].mxu1  ;;  %v12245_v26 = vpop.f32.mrb[146].mxu0  ;;  %v17231_v12 = vld [vmem:[#allocation2 + $0x1a0] sm:$0xff] }
 0x20c   :  { %12772 = vmatmul.mubr.msk.f32.gmra.mrb[202].mxu1 %vm404_vm2, %v17217_v10  ;;  %12554 = vmatprep.mubr.msk.f32.mxu0 %vm404_vm2, %v16659_v32  ;;  %v17236_v21 = vmax.f32 %v4038_v62, %v4039_v42  ;;  %v17241_v27 = vmax.f32 %v3622_v54, %v3623_v14  ;;  %v4025_v44 = vsel %vm404_vm2, %v3959_v18, -inf  ;;  %v3644_v45 = vsel %vm404_vm2, %v12245_v26, -inf  ;;  %v12287_v1 = vpop.f32.mrb[146].mxu1  ;;  %v3560_v32 = vpop.f32.mrb[147].mxu0  ;;  %v17298_v18 = vld [vmem:[#allocation2 + $0x100] sm:$0xff] }
 0x20d   :  { %12774 = vmatprep.mubr.msk.f32.mxu1 %vm404_vm2, %v17231_v12  ;;  %v17250_v33 = vmax.f32 %v4024_v36, %v4025_v44  ;;  %v17255_v41 = vmax.f32 %v3643_v16, %v3644_v45  ;;  %v4046_v59 = vsel %vm404_vm2, %v12287_v1, -inf  ;;  %v3630_v2 = vsel %vm404_vm2, %v3560_v32, -inf  ;;  %v3962_v62 = vpop.f32.mrb[147].mxu1 }
 0x20e   :  { %v17262_v54 = vmax.f32 %v4045_v15, %v4046_v59  ;;  %v17267_v51 = vmax.f32 %v18862_v46, %v3630_v2  ;;  %v4032_v36 = vsel %vm404_vm2, %v3962_v62, -inf  ;;  %v18865_v45 = vmax.f32 %v17119_v13, %v17153_v9 }
 0x20f   :  { %12555 = vmatmul.mubr.msk.f32.gmra.mrb[204].mxu0 %vm404_vm2, %v16699_v38  ;;  %v17277_v16 = vmax.f32 %v18863_v49, %v4032_v36  ;;  %v7401_v38 = vld [vmem:[%s18835_s3 + $0x10] sm:$0xff]  ;;  %v18867_v46 = vmax.f32 %v17131_v43, %v17169_v52  ;;  %v18868_v9 = vmax.f32 %v17135_v0, %v17172_v17  ;;  %v18870_v43 = vmax.f32 %v17148_v23, %v17185_v50 }
 0x210   :  { %12775 = vmatmul.mubr.msk.f32.gmra.mrb[204].mxu1 %vm404_vm2, %v17272_v7  ;;  %12557 = vmatprep.mubr.msk.f32.mxu0 %vm404_vm2, %v16705_v11  ;;  %v17296_v11 = vld [vmem:[#allocation2 + $0x1b8] sm:$0xff]  ;;  %v17354_v17 = vld [vmem:[#allocation2 + $0x110] sm:$0xff]  ;;  %v18871_v23 = vmax.f32 %v17190_v40, %v17197_v39  ;;  %v7407_v40 = vld [vmem:[%s18835_s3 + $0x40] sm:$0xff] }
 0x211   :  { %12777 = vmatprep.mubr.msk.f32.mxu1 %vm404_vm2, %v17283_v6  ;;  %v12248_v28 = vpop.f32.mrb[148].mxu0  ;;  %v7405_v50 = vld [vmem:[%s18835_s3 + $0x30] sm:$0xff]  ;;  %v7408_v39 = vld [vmem:[%s18835_s3 + $0x48] sm:$0xff] }
 0x212   :  { %v3665_v5 = vsel %vm404_vm2, %v12248_v28, -inf  ;;  %v12290_v30 = vpop.f32.mrb[148].mxu1  ;;  %v3573_v15 = vpop.f32.mrb[149].mxu0 }
 0x213   :  { %12558 = vmatmul.mubr.msk.f32.gmra.mrb[206].mxu0 %vm404_vm2, %v16719_v55  ;;  %v17303_v14 = vmax.f32 %v18864_v56, %v3665_v5  ;;  %v4067_v3 = vsel %vm404_vm2, %v12290_v30, -inf  ;;  %v3651_v42 = vsel %vm404_vm2, %v3573_v15, -inf  ;;  %v3975_v26 = vpop.f32.mrb[149].mxu1  ;;  %v12249_v44 = vpop.f32.mrb[150].mxu0  ;;  %v17311_v55 = vpack.c.bf16 %v7402_v34, %v7401_v38  ;;  %v17339_v38 = vld [vmem:[#allocation2 + $0x108] sm:$0xff]  ;;  %v7403_v5 = vld [vmem:[%s18835_s3 + $0x20] sm:$0xff] }
 0x214   :  { %12778 = vmatmul.mubr.msk.f32.gmra.mrb[206].mxu1 %vm404_vm2, %v17296_v11  ;;  %12580 = vmatprep.mubr.msk.f32.mxu0 %vm404_vm2, %v17298_v18  ;;  %v17316_v8 = vmax.f32 %v18865_v45, %v4067_v3  ;;  %v17321_v1 = vmax.f32 %v18866_v31, %v3651_v42  ;;  %v4053_v32 = vsel %vm404_vm2, %v3975_v26, -inf  ;;  %v3672_v59 = vsel %vm404_vm2, %v12249_v44, -inf  ;;  %v12291_v2 = vpop.f32.mrb[150].mxu1  ;;  %v3576_v62 = vpop.f32.mrb[151].mxu0  ;;  %v7406_v30 = vld [vmem:[%s18835_s3 + $0x38] sm:$0xff]  ;;  %v17393_v45 = vld [vmem:[#allocation2 + $0x120] sm:$0xff] }
 0x215   :  { %12800 = vmatprep.mubr.msk.f32.mxu1 %vm404_vm2, %v17162_v53  ;;  %v17330_v13 = vmax.f32 %v18867_v46, %v4053_v32  ;;  %v17335_v63 = vmax.f32 %v18868_v9, %v3672_v59  ;;  %v4074_v47 = vsel %vm404_vm2, %v12291_v2, -inf  ;;  %v3658_v36 = vsel %vm404_vm2, %v3576_v62, -inf  ;;  %v3978_v49 = vpop.f32.mrb[151].mxu1  ;;  %v17387_v56 = vld [vmem:[#allocation2 + $0x118] sm:$0xff] }
 0x216   :  { %v18869_v34 = vmax.f32 %v17139_v29, %v17182_v60  ;;  %v17349_v52 = vmax.f32 %v18870_v43, %v3658_v36  ;;  %v4060_v0 = vsel %vm404_vm2, %v3978_v49, -inf  ;;  %v7404_v29 = vld [vmem:[%s18835_s3 + $0x28] sm:$0xff]  ;;  %v17396_v31 = vpack.c.bf16 %v7406_v30, %v7405_v50  ;;  %v17417_v43 = vld [vmem:[%s18834_s2] ss:$0 sm:$0xff] }
 0x217   :  { %12581 = vmatmul.mubr.msk.f32.vlgmr.msra.gmra.mrb[192].mxu0 %vm404_vm2, %v17339_v38  ;;  %v17365_v60 = vmax.f32 %v18871_v23, %v4060_v0  ;;  %v13491_v3 = vpack.c.bf16 %v7404_v29, %v7403_v5  ;;  %v17405_v46 = vpack.c.bf16 %v7408_v39, %v7407_v40  ;;  %v17423_v23 = vld [vmem:[#allocation2 + $0x128] sm:$0xff] }
 0x218   :  { %v17344_v28 = vmax.f32 %v18869_v34, %v4074_v47  ;;  %12801 = vmatmul.mubr.msk.f32.vlgmr.msra.gmra.mrb[192].mxu1 %vm404_vm2, %v17201_v58  ;;  %12583 = vmatprep.mubr.msk.f32.mxu0 %vm404_vm2, %v17354_v17 }
 0x219   :  { %12803 = vmatprep.mubr.msk.f32.mxu1 %vm404_vm2, %v17209_v48  ;;  %13486 = vmatpush3.bf16.msra.mxu0 %v17127_v37  ;;  %v12252_v15 = vpop.f32.mrb[152].mxu0 }
 0x21a   :  { %13586 = vmatpush3.bf16.msra.mxu1 %v17127_v37  ;;  %13488 = vmatprep.subr.bf16.mxu0 %v17311_v55  ;;  %v3639_v42 = vsel %vm404_vm2, %v12252_v15, -inf  ;;  %v12294_v26 = vpop.f32.mrb[152].mxu1  ;;  %v3589_v44 = vpop.f32.mrb[153].mxu0 }
 0x21b   :  { %12584 = vmatmul.mubr.msk.f32.gmra.mrb[194].mxu0 %vm404_vm2, %v17387_v56  ;;  %13588 = vmatprep.subr.bf16.mxu1 %v17311_v55  ;;  %v3640_v37 = vmax.f32 %v17223_v20, %v3639_v42  ;;  %v4041_v32 = vsel %vm404_vm2, %v12294_v26, -inf  ;;  %v3625_v59 = vsel %vm404_vm2, %v3589_v44, -inf  ;;  %v3991_v2 = vpop.f32.mrb[153].mxu1  ;;  %v12253_v62 = vpop.f32.mrb[154].mxu0  ;;  %v10803_v26 = vld [vmem:[%s18835_s3 + $0x58] sm:$0xff] }
 0x21c   :  { %12804 = vmatmul.mubr.msk.f32.gmra.mrb[194].mxu1 %vm404_vm2, %v17217_v10  ;;  %12586 = vmatprep.mubr.msk.f32.mxu0 %vm404_vm2, %v17393_v45  ;;  %v4042_v9 = vmax.f32 %v17236_v21, %v4041_v32  ;;  %v3626_v47 = vmax.f32 %v17241_v27, %v3625_v59  ;;  %v4027_v20 = vsel %vm404_vm2, %v3991_v2, -inf  ;;  %v3646_v36 = vsel %vm404_vm2, %v12253_v62, -inf  ;;  %v12295_v49 = vpop.f32.mrb[154].mxu1  ;;  %v3592_v34 = vpop.f32.mrb[155].mxu0 }
 0x21d   :  { %12806 = vmatprep.mubr.msk.f32.mxu1 %vm404_vm2, %v17231_v12  ;;  %13490 = vmatpush3.bf16.msra.mxu0 %v17311_v55  ;;  %v3678_v21 = vadd.f32 %v17417_v43, %v3640_v37  ;;  %v4028_v27 = vmax.f32 %v17250_v33, %v4027_v20  ;;  %v3647_v0 = vmax.f32 %v17255_v41, %v3646_v36  ;;  %v4048_v5 = vsel %vm404_vm2, %v12295_v49, -inf  ;;  %v3994_v29 = vpop.f32.mrb[155].mxu1  ;;  %v17432_v33 = vld [vmem:[#allocation2 + $0x130] sm:$0xff]  ;;  %v17454_v20 = vld [vmem:[#allocation2 + $0x138] sm:$0xff] }
 0x21e   :  { %13590 = vmatpush3.bf16.msra.mxu1 %v17311_v55  ;;  %13492 = vmatprep.subr.bf16.mxu0 %v13491_v3  ;;  %v4080_v50 = vadd.f32 %v17417_v43, %v4042_v9  ;;  %v3676_v30 = vadd.f32 %v17417_v43, %v3626_v47  ;;  %v4049_v40 = vmax.f32 %v17262_v54, %v4048_v5  ;;  %v3632_v39 = vsel %vm404_vm2, %v3592_v34, -inf  ;;  %v10802_v54 = vld [vmem:[%s18835_s3 + $0x50] sm:$0xff] }
 0x21f   :  { %12587 = vmatmul.mubr.msk.f32.gmra.mrb[196].mxu0 %vm404_vm2, %v17423_v23  ;;  %13592 = vmatprep.subr.bf16.mxu1 %v13491_v3  ;;  %v3686_v41 = vmax.f32 %v3678_v21, 0.0  ;;  %v4078_v15 = vadd.f32 %v17417_v43, %v4028_v27  ;;  %v3679_v55 = vadd.f32 %v17417_v43, %v3647_v0  ;;  %v3633_v42 = vmax.f32 %v17267_v51, %v3632_v39 }
 0x220   :  { %12807 = vmatmul.mubr.msk.f32.gmra.mrb[196].mxu1 %vm404_vm2, %v17272_v7  ;;  %12589 = vmatprep.mubr.msk.f32.mxu0 %vm404_vm2, %v17432_v33  ;;  %v4088_v44 = vmax.f32 %v4080_v50, 0.0  ;;  %v3684_v37 = vmax.f32 %v3676_v30, 0.0  ;;  %v4081_v32 = vadd.f32 %v17417_v43, %v4049_v40  ;;  %v4034_v51 = vsel %vm404_vm2, %v3994_v29, -inf  ;;  %v17474_v30 = vld [vmem:[#allocation2 + $0x1c0] sm:$0xff] }
 0x221   :  { %12809 = vmatprep.mubr.msk.f32.mxu1 %vm404_vm2, %v17283_v6  ;;  %13494 = vmatpush3.bf16.msra.mxu0 %v13491_v3  ;;  %3695 = vst.msk [vmem:[#allocation2 + $0x210] sm:$0xff] %vm404_vm2, %v3686_v41  ;;  %v4086_v59 = vmax.f32 %v4078_v15, 0.0  ;;  %v3687_v2 = vmax.f32 %v3679_v55, 0.0  ;;  %v3677_v62 = vadd.f32 %v17417_v43, %v3633_v42  ;;  %v4035_v9 = vmax.f32 %v17277_v16, %v4034_v51  ;;  %v12256_v47 = vpop.f32.mrb[156].mxu0 }
 0x222   :  { %13594 = vmatpush3.bf16.msra.mxu1 %v13491_v3  ;;  %13496 = vmatprep.subr.bf16.mxu0 %v17396_v31  ;;  %4097 = vst.msk [vmem:[#allocation2 + $0x250] sm:$0xff] %vm404_vm2, %v4088_v44  ;;  %3693 = vst.msk [vmem:[#allocation2 + $0x200] sm:$0xff] %vm404_vm2, %v3684_v37  ;;  %v4089_v36 = vmax.f32 %v4081_v32, 0.0  ;;  %v3667_v49 = vsel %vm404_vm2, %v12256_v47, -inf  ;;  %v12298_v34 = vpop.f32.mrb[156].mxu1  ;;  %v3605_v21 = vpop.f32.mrb[157].mxu0  ;;  %v17463_v16 = vpack.c.bf16 %v10803_v26, %v10802_v54 }
 0x223   :  { %12590 = vmatmul.mubr.msk.f32.gmra.mrb[198].mxu0 %vm404_vm2, %v17454_v20  ;;  %13596 = vmatprep.subr.bf16.mxu1 %v17396_v31  ;;  %4095 = vst.msk [vmem:[#allocation2 + $0x240] sm:$0xff] %vm404_vm2, %v4086_v59  ;;  %3696 = vst.msk [vmem:[#allocation2 + $0x218] sm:$0xff] %vm404_vm2, %v3687_v2  ;;  %v3685_v3 = vmax.f32 %v3677_v62, 0.0  ;;  %v4079_v27 = vadd.f32 %v17417_v43, %v4035_v9  ;;  %v3668_v0 = vmax.f32 %v17303_v14, %v3667_v49  ;;  %v4007_v29 = vpop.f32.mrb[157].mxu1  ;;  %v12257_v50 = vpop.f32.mrb[158].mxu0  ;;  %v17496_v59 = vld [vmem:[#allocation2 + $0x1c8] sm:$0xff] }
 0x224   :  { %v4069_v5 = vsel %vm404_vm2, %v12298_v34, -inf  ;;  %12810 = vmatmul.mubr.msk.f32.gmra.mrb[198].mxu1 %vm404_vm2, %v17296_v11  ;;  %12592 = vmatprep.mubr.msk.f32.mxu0 %vm404_vm2, %v16878_v4  ;;  %4098 = vst.msk [vmem:[#allocation2 + $0x258] sm:$0xff] %vm404_vm2, %v4089_v36  ;;  %v3653_v39 = vsel %vm404_vm2, %v3605_v21, -inf  ;;  %v4055_v14 = vsel %vm404_vm2, %v4007_v29, -inf  ;;  %v3674_v41 = vsel %vm404_vm2, %v12257_v50, -inf  ;;  %v12299_v15 = vpop.f32.mrb[158].mxu1 }
 0x225   :  { %v4070_v40 = vmax.f32 %v17316_v8, %v4069_v5  ;;  %12812 = vmatprep.mubr.msk.f32.mxu1 %vm404_vm2, %v17474_v30  ;;  %v3608_v55 = vpop.f32.mrb[159].mxu0  ;;  %13498 = vmatpush3.bf16.msra.mxu0 %v17396_v31  ;;  %3694 = vst.msk [vmem:[#allocation2 + $0x208] sm:$0xff] %vm404_vm2, %v3685_v3  ;;  %v4087_v4 = vmax.f32 %v4079_v27, 0.0  ;;  %v3682_v42 = vadd.f32 %v17417_v43, %v3668_v0  ;;  %v4010_v26 = vpop.f32.mrb[159].mxu1  ;;  %v4076_v32 = vsel %vm404_vm2, %v12299_v15, -inf  ;;  %v17524_v0 = vld [vmem:[#allocation2 + $0x1d8] sm:$0xff] }
 0x226   :  { %v3654_v8 = vmax.f32 %v17321_v1, %v3653_v39  ;;  %v4056_v54 = vmax.f32 %v17330_v13, %v4055_v14  ;;  %13598 = vmatpush3.bf16.msra.mxu1 %v17396_v31  ;;  %13500 = vmatprep.subr.bf16.mxu0 %v17405_v46  ;;  %v3675_v37 = vmax.f32 %v17335_v63, %v3674_v41  ;;  %v3660_v51 = vsel %vm404_vm2, %v3608_v55, -inf  ;;  %v17552_v15 = vld [vmem:[#allocation2 + $0x1f0] sm:$0xff] }
 0x227   :  { %v4084_v44 = vadd.f32 %v17417_v43, %v4070_v40  ;;  %12593 = vmatmul.mubr.msk.f32.gmra.mrb[200].mxu0 %vm404_vm2, %v16899_v19  ;;  %13600 = vmatprep.subr.bf16.mxu1 %v17405_v46  ;;  %4096 = vst.msk [vmem:[#allocation2 + $0x248] sm:$0xff] %vm404_vm2, %v4087_v4  ;;  %v3690_v1 = vmax.f32 %v3682_v42, 0.0  ;;  %v4077_v63 = vmax.f32 %v17344_v28, %v4076_v32  ;;  %v17507_v19 = vld [vmem:[#allocation2 + $0x1d0] sm:$0xff]  ;;  %v4062_v47 = vsel %vm404_vm2, %v4010_v26, -inf  ;;  %v17564_v42 = vld [vmem:[#allocation2 + $0x1f8] sm:$0xff] }
 0x228   :  { %v3680_v13 = vadd.f32 %v17417_v43, %v3654_v8  ;;  %v4082_v31 = vadd.f32 %v17417_v43, %v4056_v54  ;;  %12813 = vmatmul.mubr.msk.f32.gmra.mrb[200].mxu1 %vm404_vm2, %v17496_v59  ;;  %12595 = vmatprep.mubr.msk.f32.mxu0 %vm404_vm2, %v16907_v61  ;;  %v3683_v62 = vadd.f32 %v17417_v43, %v3675_v37  ;;  %v10805_v8 = vld [vmem:[%s18835_s3 + $0x68] sm:$0xff] }
 0x229   :  { %v4092_v2 = vmax.f32 %v4084_v44, 0.0  ;;  %v3661_v9 = vmax.f32 %v17349_v52, %v3660_v51  ;;  %12815 = vmatprep.mubr.msk.f32.mxu1 %vm404_vm2, %v17507_v19  ;;  %13502 = vmatpush3.bf16.msra.mxu0 %v17405_v46  ;;  %3699 = vst.msk [vmem:[#allocation2 + $0x230] sm:$0xff] %vm404_vm2, %v3690_v1  ;;  %v4085_v61 = vadd.f32 %v17417_v43, %v4077_v63  ;;  %v12312_v34 = vpop.f32.mrb[160].mxu0  ;;  %v10806_v51 = vld [vmem:[%s18835_s3 + $0x70] sm:$0xff]  ;;  %v10807_v1 = vld [vmem:[%s18835_s3 + $0x78] sm:$0xff] }
 0x22a   :  { %v3688_v28 = vmax.f32 %v3680_v13, 0.0  ;;  %v4090_v36 = vmax.f32 %v4082_v31, 0.0  ;;  %v4063_v49 = vmax.f32 %v17365_v60, %v4062_v47  ;;  %13602 = vmatpush3.bf16.msra.mxu1 %v17405_v46  ;;  %13504 = vmatprep.subr.bf16.mxu0 %v17463_v16  ;;  %v3691_v52 = vmax.f32 %v3683_v62, 0.0  ;;  %v12354_v3 = vpop.f32.mrb[160].mxu1  ;;  %v4297_v27 = vpop.f32.mrb[161].mxu0 }
 0x22b   :  { %4101 = vst.msk [vmem:[#allocation2 + $0x270] sm:$0xff] %vm404_vm2, %v4092_v2  ;;  %v3681_v21 = vadd.f32 %v17417_v43, %v3661_v9  ;;  %12596 = vmatmul.mubr.msk.f32.gmra.mrb[202].mxu0 %vm404_vm2, %v16930_v25  ;;  %13604 = vmatprep.subr.bf16.mxu1 %v17463_v16  ;;  %v4093_v60 = vmax.f32 %v4085_v61, 0.0  ;;  %v4699_v5 = vpop.f32.mrb[161].mxu1  ;;  %v12313_v29 = vpop.f32.mrb[162].mxu0  ;;  %v17534_v25 = vld [vmem:[#allocation2 + $0x1e0] sm:$0xff]  ;;  %v17610_v13 = vsel %vm404_vm2, %v12312_v34, -inf }
 0x22c   :  { %3697 = vst.msk [vmem:[#allocation2 + $0x220] sm:$0xff] %vm404_vm2, %v3688_v28  ;;  %4099 = vst.msk [vmem:[#allocation2 + $0x260] sm:$0xff] %vm404_vm2, %v4090_v36  ;;  %v4083_v46 = vadd.f32 %v17417_v43, %v4063_v49  ;;  %12816 = vmatmul.mubr.msk.f32.gmra.mrb[202].mxu1 %vm404_vm2, %v17524_v0  ;;  %12598 = vmatprep.mubr.msk.f32.mxu0 %vm404_vm2, %v16939_v35  ;;  %v12355_v40 = vpop.f32.mrb[162].mxu1  ;;  %v4300_v39 = vpop.f32.mrb[163].mxu0  ;;  %v17545_v35 = vld [vmem:[#allocation2 + $0x1e8] sm:$0xff]  ;;  %v17613_v31 = vsel %vm404_vm2, %v12354_v3, -inf }
 0x22d   :  { %3700 = vst.msk [vmem:[#allocation2 + $0x238] sm:$0xff] %vm404_vm2, %v3691_v52  ;;  %v3689_v50 = vmax.f32 %v3681_v21, 0.0  ;;  %12818 = vmatprep.mubr.msk.f32.mxu1 %vm404_vm2, %v17534_v25  ;;  %4102 = vst.msk [vmem:[#allocation2 + $0x278] sm:$0xff] %vm404_vm2, %v4093_v60  ;;  %v17540_v41 = vpop.f32.mrb[163].mxu1  ;;  %v17616_v63 = vsel %vm404_vm2, %v4297_v27, -inf  ;;  %v17622_v2 = vsel %vm404_vm2, %v4699_v5, -inf }
 0x22e   :  { %v4091_v14 = vmax.f32 %v4083_v46, 0.0  ;;  %v17628_v62 = vsel %vm404_vm2, %v12355_v40, -inf  ;;  %v10811_v40 = vld [vmem:[%s18835_s3 + $0x98] sm:$0xff] }
 0x22f   :  { %3698 = vst.msk [vmem:[#allocation2 + $0x228] sm:$0xff] %vm404_vm2, %v3689_v50  ;;  %12599 = vmatmul.mubr.msk.f32.gmra.mrb[204].mxu0 %vm404_vm2, %v16951_v57 }
 0x230   :  { %4100 = vst.msk [vmem:[#allocation2 + $0x268] sm:$0xff] %vm404_vm2, %v4091_v14  ;;  %12819 = vmatmul.mubr.msk.f32.gmra.mrb[204].mxu1 %vm404_vm2, %v17545_v35  ;;  %12601 = vmatprep.mubr.msk.f32.mxu0 %vm404_vm2, %v16959_v24  ;;  %v10804_v24 = vld [vmem:[%s18835_s3 + $0x60] sm:$0xff] }
 0x231   :  { %12821 = vmatprep.mubr.msk.f32.mxu1 %vm404_vm2, %v17552_v15  ;;  %v17556_v55 = vpop.f32.mrb[164].mxu0  ;;  %v13507_v32 = vpack.c.bf16 %v10805_v8, %v10804_v24 }
 0x232   :  { %v17558_v4 = vpop.f32.mrb[164].mxu1  ;;  %v17560_v57 = vpop.f32.mrb[165].mxu0 }
 0x233   :  { %12602 = vmatmul.mubr.msk.f32.gmra.mrb[206].mxu0 %vm404_vm2, %v16973_v22  ;;  %v17572_v54 = vpop.f32.mrb[165].mxu1  ;;  %v17576_v26 = vpop.f32.mrb[166].mxu0 }
 0x234   :  { %12822 = vmatmul.mubr.msk.f32.gmra.mrb[206].mxu1 %vm404_vm2, %v17564_v42  ;;  %12844 = vmatprep.mubr.msk.f32.mxu0 %vm404_vm2, %v17298_v18  ;;  %v17580_v22 = vpop.f32.mrb[166].mxu1  ;;  %v17584_v44 = vpop.f32.mrb[167].mxu0  ;;  %v10809_v18 = vld [vmem:[%s18835_s3 + $0x88] sm:$0xff] }
 0x235   :  { %13064 = vmatprep.mubr.msk.f32.mxu1 %vm404_vm2, %v17162_v53  ;;  %v17586_v37 = vpop.f32.mrb[167].mxu1  ;;  %v10808_v53 = vld [vmem:[%s18835_s3 + $0x80] sm:$0xff] }
 0x237   :  { %12845 = vmatmul.mubr.msk.f32.vlgmr.msra.gmra.mrb[208].mxu0 %vm404_vm2, %v17339_v38  ;;  %v13511_v38 = vpack.c.bf16 %v10807_v1, %v10806_v51  ;;  %v17707_v1 = vsel %vm404_vm2, %v17556_v55, -inf  ;;  %v17728_v55 = vsel %vm404_vm2, %v17576_v26, -inf }
 0x238   :  { %13065 = vmatmul.mubr.msk.f32.vlgmr.msra.gmra.mrb[208].mxu1 %vm404_vm2, %v17201_v58  ;;  %12847 = vmatprep.mubr.msk.f32.mxu0 %vm404_vm2, %v17354_v17  ;;  %v17619_v17 = vpack.c.bf16 %v10809_v18, %v10808_v53  ;;  %v17711_v53 = vsel %vm404_vm2, %v17558_v4, -inf  ;;  %v17715_v18 = vsel %vm404_vm2, %v17560_v57, -inf  ;;  %v17732_v4 = vsel %vm404_vm2, %v17580_v22, -inf }
 0x239   :  { %13506 = vmatpush3.bf16.msra.mxu0 %v17463_v16  ;;  %13067 = vmatprep.mubr.msk.f32.mxu1 %vm404_vm2, %v17209_v48  ;;  %v12320_v58 = vpop.f32.mrb[168].mxu0  ;;  %v17625_v48 = vsel %vm404_vm2, %v12313_v29, -inf }
 0x23a   :  { %13606 = vmatpush3.bf16.msra.mxu1 %v17463_v16  ;;  %13508 = vmatprep.subr.bf16.mxu0 %v13507_v32  ;;  %v17631_v9 = vsel %vm404_vm2, %v12320_v58, -inf  ;;  %v12362_v47 = vpop.f32.mrb[168].mxu1  ;;  %v4329_v28 = vpop.f32.mrb[169].mxu0  ;;  %v17636_v16 = vsel %vm404_vm2, %v4300_v39, -inf  ;;  %v17680_v39 = vsel %vm404_vm2, %v17540_v41, -inf  ;;  %v10829_v41 = vld [vmem:[%s18835_s3 + $0xa8] sm:$0xff] }
 0x23b   :  { %12848 = vmatmul.mubr.msk.f32.gmra.mrb[210].mxu0 %vm404_vm2, %v17387_v56  ;;  %13608 = vmatprep.subr.bf16.mxu1 %v13507_v32  ;;  %v4440_v36 = vmax.f32 %v17610_v13, %v17631_v9  ;;  %v17641_v61 = vsel %vm404_vm2, %v12362_v47, -inf  ;;  %v17644_v49 = vsel %vm404_vm2, %v4329_v28, -inf  ;;  %v4731_v34 = vpop.f32.mrb[169].mxu1  ;;  %v12321_v52 = vpop.f32.mrb[170].mxu0  ;;  %v17717_v58 = vld [vmem:[#allocation2 + $0x140] sm:$0xff] }
 0x23c   :  { %13068 = vmatmul.mubr.msk.f32.gmra.mrb[210].mxu1 %vm404_vm2, %v17217_v10  ;;  %12850 = vmatprep.mubr.msk.f32.mxu0 %vm404_vm2, %v17393_v45  ;;  %v4842_v56 = vmax.f32 %v17613_v31, %v17641_v61  ;;  %v4426_v21 = vmax.f32 %v17616_v63, %v17644_v49  ;;  %v17655_v3 = vsel %vm404_vm2, %v4731_v34, -inf  ;;  %v17658_v27 = vsel %vm404_vm2, %v12321_v52, -inf  ;;  %v12363_v60 = vpop.f32.mrb[170].mxu1  ;;  %v4332_v10 = vpop.f32.mrb[171].mxu0 }
 0x23d   :  { %13070 = vmatprep.mubr.msk.f32.mxu1 %vm404_vm2, %v17231_v12  ;;  %13510 = vmatpush3.bf16.msra.mxu0 %v13507_v32  ;;  %v4828_v45 = vmax.f32 %v17622_v2, %v17655_v3  ;;  %v4447_v46 = vmax.f32 %v17625_v48, %v17658_v27  ;;  %v17667_v5 = vsel %vm404_vm2, %v12363_v60, -inf  ;;  %v17670_v29 = vsel %vm404_vm2, %v4332_v10, -inf  ;;  %v4734_v50 = vpop.f32.mrb[171].mxu1  ;;  %v10810_v12 = vld [vmem:[%s18835_s3 + $0x90] sm:$0xff] }
 0x23e   :  { %13610 = vmatpush3.bf16.msra.mxu1 %v13507_v32  ;;  %13512 = vmatprep.subr.bf16.mxu0 %v13511_v38  ;;  %v4849_v14 = vmax.f32 %v17628_v62, %v17667_v5  ;;  %v4433_v24 = vmax.f32 %v17636_v16, %v17670_v29  ;;  %v17687_v8 = vsel %vm404_vm2, %v4734_v50, -inf  ;;  %v10828_v32 = vld [vmem:[%s18835_s3 + $0xa0] sm:$0xff]  ;;  %v17866_v3 = vld [vmem:[#allocation2 + $0x170] sm:$0xff]  ;;  %v10831_v16 = vld [vmem:[%s18835_s3 + $0xb8] sm:$0xff] }
 0x23f   :  { %12851 = vmatmul.mubr.msk.f32.gmra.mrb[212].mxu0 %vm404_vm2, %v17423_v23  ;;  %13612 = vmatprep.subr.bf16.mxu1 %v13511_v38  ;;  %v4835_v51 = vmax.f32 %v17680_v39, %v17687_v8  ;;  %v13519_v23 = vpack.c.bf16 %v10811_v40, %v10810_v12  ;;  %v17811_v40 = vld [vmem:[#allocation2 + $0x160] sm:$0xff]  ;;  %v10830_v62 = vld [vmem:[%s18835_s3 + $0xb0] sm:$0xff] }
 0x240   :  { %13071 = vmatmul.mubr.msk.f32.gmra.mrb[212].mxu1 %vm404_vm2, %v17272_v7  ;;  %12853 = vmatprep.mubr.msk.f32.mxu0 %vm404_vm2, %v17432_v33  ;;  %v17724_v33 = vsel %vm404_vm2, %v17572_v54, -inf  ;;  %v17742_v54 = vsel %vm404_vm2, %v17584_v44, -inf }
 0x241   :  { %13073 = vmatprep.mubr.msk.f32.mxu1 %vm404_vm2, %v17283_v6  ;;  %13514 = vmatpush3.bf16.msra.mxu0 %v13511_v38  ;;  %v12324_v7 = vpop.f32.mrb[172].mxu0  ;;  %v17720_v6 = vpack.c.bf16 %v10829_v41, %v10828_v32 }
 0x242   :  { %13614 = vmatpush3.bf16.msra.mxu1 %v13511_v38  ;;  %13516 = vmatprep.subr.bf16.mxu0 %v17619_v17  ;;  %v17735_v57 = vsel %vm404_vm2, %v12324_v7, -inf  ;;  %v12366_v38 = vpop.f32.mrb[172].mxu1  ;;  %v4345_v47 = vpop.f32.mrb[173].mxu0 }
 0x243   :  { %12854 = vmatmul.mubr.msk.f32.gmra.mrb[214].mxu0 %vm404_vm2, %v17454_v20  ;;  %13616 = vmatprep.subr.bf16.mxu1 %v17619_v17  ;;  %v17747_v22 = vsel %vm404_vm2, %v12366_v38, -inf  ;;  %v17750_v28 = vsel %vm404_vm2, %v4345_v47, -inf  ;;  %v4747_v34 = vpop.f32.mrb[173].mxu1  ;;  %v12325_v20 = vpop.f32.mrb[174].mxu0  ;;  %v17779_v38 = vld [vmem:[#allocation2 + $0x148] sm:$0xff]  ;;  %v17784_v47 = vsel %vm404_vm2, %v17586_v37, -inf }
 0x244   :  { %13074 = vmatmul.mubr.msk.f32.gmra.mrb[214].mxu1 %vm404_vm2, %v17296_v11  ;;  %12856 = vmatprep.mubr.msk.f32.mxu0 %vm404_vm2, %v17717_v58  ;;  %v17761_v60 = vsel %vm404_vm2, %v4747_v34, -inf  ;;  %v17764_v10 = vsel %vm404_vm2, %v12325_v20, -inf  ;;  %v12367_v50 = vpop.f32.mrb[174].mxu1  ;;  %v4348_v11 = vpop.f32.mrb[175].mxu0 }
 0x245   :  { %13076 = vmatprep.mubr.msk.f32.mxu1 %vm404_vm2, %v17474_v30  ;;  %13518 = vmatpush3.bf16.msra.mxu0 %v17619_v17  ;;  %v17774_v32 = vsel %vm404_vm2, %v12367_v50, -inf  ;;  %v17777_v41 = vsel %vm404_vm2, %v4348_v11, -inf  ;;  %v4750_v7 = vpop.f32.mrb[175].mxu1  ;;  %v17795_v11 = vld [vmem:[#allocation2 + $0x150] sm:$0xff] }
 0x246   :  { %13618 = vmatpush3.bf16.msra.mxu1 %v17619_v17  ;;  %13520 = vmatprep.subr.bf16.mxu0 %v13519_v23  ;;  %v17791_v50 = vsel %vm404_vm2, %v4750_v7, -inf  ;;  %v17805_v7 = vld [vmem:[#allocation2 + $0x158] sm:$0xff] }
 0x247   :  { %12857 = vmatmul.mubr.msk.f32.gmra.mrb[216].mxu0 %vm404_vm2, %v17779_v38  ;;  %13620 = vmatprep.subr.bf16.mxu1 %v13519_v23 }
 0x248   :  { %13077 = vmatmul.mubr.msk.f32.gmra.mrb[216].mxu1 %vm404_vm2, %v17496_v59  ;;  %12859 = vmatprep.mubr.msk.f32.mxu0 %vm404_vm2, %v17795_v11 }
 0x249   :  { %13079 = vmatprep.mubr.msk.f32.mxu1 %vm404_vm2, %v17507_v19  ;;  %13522 = vmatpush3.bf16.msra.mxu0 %v13519_v23  ;;  %v12328_v37 = vpop.f32.mrb[176].mxu0 }
 0x24a   :  { %13622 = vmatpush3.bf16.msra.mxu1 %v13519_v23  ;;  %13524 = vmatprep.subr.bf16.mxu0 %v17720_v6  ;;  %v4441_v20 = vsel %vm404_vm2, %v12328_v37, -inf  ;;  %v12370_v34 = vpop.f32.mrb[176].mxu1  ;;  %v4361_v17 = vpop.f32.mrb[177].mxu0 }
 0x24b   :  { %12860 = vmatmul.mubr.msk.f32.gmra.mrb[218].mxu0 %vm404_vm2, %v17805_v7  ;;  %13624 = vmatprep.subr.bf16.mxu1 %v17720_v6  ;;  %v17817_v12 = vmax.f32 %v4440_v36, %v4441_v20  ;;  %v4843_v23 = vsel %vm404_vm2, %v12370_v34, -inf  ;;  %v4427_v52 = vsel %vm404_vm2, %v4361_v17, -inf  ;;  %v4763_v44 = vpop.f32.mrb[177].mxu1  ;;  %v12329_v37 = vpop.f32.mrb[178].mxu0 }
 0x24c   :  { %13080 = vmatmul.mubr.msk.f32.gmra.mrb[218].mxu1 %vm404_vm2, %v17524_v0  ;;  %12862 = vmatprep.mubr.msk.f32.mxu0 %vm404_vm2, %v17811_v40  ;;  %v17828_v26 = vmax.f32 %v4842_v56, %v4843_v23  ;;  %v17833_v13 = vmax.f32 %v4426_v21, %v4427_v52  ;;  %v4829_v9 = vsel %vm404_vm2, %v4763_v44, -inf  ;;  %v4448_v36 = vsel %vm404_vm2, %v12329_v37, -inf  ;;  %v12371_v34 = vpop.f32.mrb[178].mxu1  ;;  %v4364_v20 = vpop.f32.mrb[179].mxu0  ;;  %v17851_v21 = vld [vmem:[#allocation2 + $0x168] sm:$0xff] }
 0x24d   :  { %13082 = vmatprep.mubr.msk.f32.mxu1 %vm404_vm2, %v17534_v25  ;;  %v17842_v31 = vmax.f32 %v4828_v45, %v4829_v9  ;;  %v17847_v63 = vmax.f32 %v4447_v46, %v4448_v36  ;;  %v4850_v61 = vsel %vm404_vm2, %v12371_v34, -inf  ;;  %v4434_v49 = vsel %vm404_vm2, %v4364_v20, -inf  ;;  %v4766_v56 = vpop.f32.mrb[179].mxu1  ;;  %v17885_v46 = vld [vmem:[#allocation2 + $0x178] sm:$0xff] }
 0x24e   :  { %v17856_v44 = vmax.f32 %v4849_v14, %v4850_v61  ;;  %v17861_v2 = vmax.f32 %v4433_v24, %v4434_v49  ;;  %v4836_v48 = vsel %vm404_vm2, %v4766_v56, -inf  ;;  %v18872_v14 = vmax.f32 %v17707_v1, %v17735_v57 }
 0x24f   :  { %12863 = vmatmul.mubr.msk.f32.gmra.mrb[220].mxu0 %vm404_vm2, %v17851_v21  ;;  %v17871_v27 = vmax.f32 %v4835_v51, %v4836_v48  ;;  %v13527_v23 = vpack.c.bf16 %v10831_v16, %v10830_v62  ;;  %v18873_v37 = vmax.f32 %v17711_v53, %v17747_v22  ;;  %v18874_v1 = vmax.f32 %v17715_v18, %v17750_v28 }
 0x250   :  { %13083 = vmatmul.mubr.msk.f32.gmra.mrb[220].mxu1 %vm404_vm2, %v17545_v35  ;;  %12865 = vmatprep.mubr.msk.f32.mxu0 %vm404_vm2, %v17866_v3  ;;  %v18875_v61 = vmax.f32 %v17724_v33, %v17761_v60  ;;  %v18876_v22 = vmax.f32 %v17728_v55, %v17764_v10  ;;  %v18877_v48 = vmax.f32 %v17732_v4, %v17774_v32  ;;  %v10832_v55 = vld [vmem:[%s18835_s3 + $0xc0] sm:$0xff]  ;;  %v10833_v4 = vld [vmem:[%s18835_s3 + $0xc8] sm:$0xff] }
 0x251   :  { %13085 = vmatprep.mubr.msk.f32.mxu1 %vm404_vm2, %v17552_v15  ;;  %v12332_v45 = vpop.f32.mrb[180].mxu0  ;;  %v18878_v33 = vmax.f32 %v17742_v54, %v17777_v41  ;;  %v18879_v10 = vmax.f32 %v17784_v47, %v17791_v50  ;;  %v10834_v54 = vld [vmem:[%s18835_s3 + $0xd0] sm:$0xff]  ;;  %v10835_v41 = vld [vmem:[%s18835_s3 + $0xd8] sm:$0xff]  ;;  %v13531_v50 = vpack.c.bf16 %v10833_v4, %v10832_v55  ;;  %v18027_v4 = vld [vmem:[#allocation2 + $0x180] sm:$0xff] }
 0x252   :  { %v4469_v5 = vsel %vm404_vm2, %v12332_v45, -inf  ;;  %v12374_v29 = vpop.f32.mrb[180].mxu1  ;;  %v4377_v39 = vpop.f32.mrb[181].mxu0 }
 0x253   :  { %12866 = vmatmul.mubr.msk.f32.gmra.mrb[222].mxu0 %vm404_vm2, %v17885_v46  ;;  %v17893_v24 = vmax.f32 %v18872_v14, %v4469_v5  ;;  %v4871_v8 = vsel %vm404_vm2, %v12374_v29, -inf  ;;  %v4455_v51 = vsel %vm404_vm2, %v4377_v39, -inf  ;;  %v4779_v52 = vpop.f32.mrb[181].mxu1  ;;  %v12333_v17 = vpop.f32.mrb[182].mxu0 }
 0x254   :  { %13086 = vmatmul.mubr.msk.f32.gmra.mrb[222].mxu1 %vm404_vm2, %v17564_v42  ;;  %12888 = vmatprep.mubr.msk.f32.mxu0 %vm404_vm2, %v17717_v58  ;;  %v17904_v9 = vmax.f32 %v18873_v37, %v4871_v8  ;;  %v17909_v57 = vmax.f32 %v18874_v1, %v4455_v51  ;;  %v4857_v36 = vsel %vm404_vm2, %v4779_v52, -inf  ;;  %v4476_v34 = vsel %vm404_vm2, %v12333_v17, -inf  ;;  %v12375_v20 = vpop.f32.mrb[182].mxu1  ;;  %v4380_v58 = vpop.f32.mrb[183].mxu0 }
 0x255   :  { %13108 = vmatprep.mubr.msk.f32.mxu1 %vm404_vm2, %v17474_v30  ;;  %v17918_v53 = vmax.f32 %v18875_v61, %v4857_v36  ;;  %v17923_v18 = vmax.f32 %v18876_v22, %v4476_v34  ;;  %v4878_v28 = vsel %vm404_vm2, %v12375_v20, -inf  ;;  %v4462_v49 = vsel %vm404_vm2, %v4380_v58, -inf  ;;  %v4782_v56 = vpop.f32.mrb[183].mxu1 }
 0x256   :  { %v17930_v30 = vmax.f32 %v18877_v48, %v4878_v28  ;;  %v17935_v60 = vmax.f32 %v18878_v33, %v4462_v49  ;;  %v4864_v62 = vsel %vm404_vm2, %v4782_v56, -inf }
 0x257   :  { %12889 = vmatmul.mubr.msk.f32.vlgmr.msra.gmra.mrb[208].mxu0 %vm404_vm2, %v17779_v38  ;;  %v17949_v32 = vmax.f32 %v18879_v10, %v4864_v62  ;;  %v10837_v38 = vld [vmem:[%s18835_s3 + $0xe8] sm:$0xff] }
 0x258   :  { %13109 = vmatmul.mubr.msk.f32.vlgmr.msra.gmra.mrb[208].mxu1 %vm404_vm2, %v17496_v59  ;;  %12891 = vmatprep.mubr.msk.f32.mxu0 %vm404_vm2, %v17795_v11  ;;  %v10836_v59 = vld [vmem:[%s18835_s3 + $0xe0] sm:$0xff] }
 0x259   :  { %13526 = vmatpush3.bf16.msra.mxu0 %v17720_v6  ;;  %13111 = vmatprep.mubr.msk.f32.mxu1 %vm404_vm2, %v17507_v19  ;;  %v12336_v47 = vpop.f32.mrb[184].mxu0  ;;  %v17974_v19 = vpack.c.bf16 %v10835_v41, %v10834_v54  ;;  %v17983_v8 = vpack.c.bf16 %v10837_v38, %v10836_v59 }
 0x25a   :  { %13626 = vmatpush3.bf16.msra.mxu1 %v17720_v6  ;;  %13528 = vmatprep.subr.bf16.mxu0 %v13527_v23  ;;  %v4443_v11 = vsel %vm404_vm2, %v12336_v47, -inf  ;;  %v12378_v16 = vpop.f32.mrb[184].mxu1  ;;  %v4393_v45 = vpop.f32.mrb[185].mxu0  ;;  %v18041_v47 = vld [vmem:[#allocation2 + $0x200] sm:$0xff] }
 0x25b   :  { %12892 = vmatmul.mubr.msk.f32.gmra.mrb[210].mxu0 %vm404_vm2, %v17805_v7  ;;  %13628 = vmatprep.subr.bf16.mxu1 %v13527_v23  ;;  %v4444_v5 = vmax.f32 %v17817_v12, %v4443_v11  ;;  %v4845_v29 = vsel %vm404_vm2, %v12378_v16, -inf  ;;  %v4429_v39 = vsel %vm404_vm2, %v4393_v45, -inf  ;;  %v4795_v6 = vpop.f32.mrb[185].mxu1  ;;  %v12337_v14 = vpop.f32.mrb[186].mxu0 }
 0x25c   :  { %13112 = vmatmul.mubr.msk.f32.gmra.mrb[210].mxu1 %vm404_vm2, %v17524_v0  ;;  %12894 = vmatprep.mubr.msk.f32.mxu0 %vm404_vm2, %v17811_v40  ;;  %v4846_v7 = vmax.f32 %v17828_v26, %v4845_v29  ;;  %v4430_v51 = vmax.f32 %v17833_v13, %v4429_v39  ;;  %v4831_v12 = vsel %vm404_vm2, %v4795_v6, -inf  ;;  %v4450_v52 = vsel %vm404_vm2, %v12337_v14, -inf  ;;  %v12379_v17 = vpop.f32.mrb[186].mxu1  ;;  %v4396_v37 = vpop.f32.mrb[187].mxu0  ;;  %v18055_v14 = vld [vmem:[#allocation2 + $0x188] sm:$0xff] }
 0x25d   :  { %13114 = vmatprep.mubr.msk.f32.mxu1 %vm404_vm2, %v17534_v25  ;;  %13530 = vmatpush3.bf16.msra.mxu0 %v13527_v23  ;;  %v4482_v0 = vadd.f32 %v17417_v43, %v4444_v5  ;;  %v4832_v40 = vmax.f32 %v17842_v31, %v4831_v12  ;;  %v4451_v1 = vmax.f32 %v17847_v63, %v4450_v52  ;;  %v4852_v26 = vsel %vm404_vm2, %v12379_v17, -inf  ;;  %v4798_v36 = vpop.f32.mrb[187].mxu1 }
 0x25e   :  { %13630 = vmatpush3.bf16.msra.mxu1 %v13527_v23  ;;  %13532 = vmatprep.subr.bf16.mxu0 %v13531_v50  ;;  %v4884_v13 = vadd.f32 %v17417_v43, %v4846_v7  ;;  %v4480_v34 = vadd.f32 %v17417_v43, %v4430_v51  ;;  %v4853_v20 = vmax.f32 %v17856_v44, %v4852_v26  ;;  %v4436_v25 = vsel %vm404_vm2, %v4396_v37, -inf  ;;  %v10854_v44 = vld [vmem:[%s18835_s3 + $0xf0] sm:$0xff] }
 0x25f   :  { %12895 = vmatmul.mubr.msk.f32.gmra.mrb[212].mxu0 %vm404_vm2, %v17851_v21  ;;  %13632 = vmatprep.subr.bf16.mxu1 %v13531_v50  ;;  %v4490_v31 = vmax.f32 %v4482_v0, 0.0  ;;  %v4882_v63 = vadd.f32 %v17417_v43, %v4832_v40  ;;  %v4483_v58 = vadd.f32 %v17417_v43, %v4451_v1  ;;  %v4437_v23 = vmax.f32 %v17861_v2, %v4436_v25  ;;  %v10855_v21 = vld [vmem:[%s18835_s3 + $0xf8] sm:$0xff]  ;;  %v18078_v0 = vld [vmem:[#allocation2 + $0x210] sm:$0xff] }
 0x260   :  { %13115 = vmatmul.mubr.msk.f32.gmra.mrb[212].mxu1 %vm404_vm2, %v17545_v35  ;;  %12897 = vmatprep.mubr.msk.f32.mxu0 %vm404_vm2, %v17866_v3  ;;  %v4892_v61 = vmax.f32 %v4884_v13, 0.0  ;;  %v4488_v22 = vmax.f32 %v4480_v34, 0.0  ;;  %v4885_v28 = vadd.f32 %v17417_v43, %v4853_v20  ;;  %v4838_v2 = vsel %vm404_vm2, %v4798_v36, -inf  ;;  %v7629_v25 = vld [vmem:[#allocation2 + $0x198] sm:$0xff] }
 0x261   :  { %13117 = vmatprep.mubr.msk.f32.mxu1 %vm404_vm2, %v17552_v15  ;;  %13534 = vmatpush3.bf16.msra.mxu0 %v13531_v50  ;;  %4499 = vst.msk [vmem:[#allocation2 + $0x290] sm:$0xff] %vm404_vm2, %v4490_v31  ;;  %v4890_v35 = vmax.f32 %v4882_v63, 0.0  ;;  %v4491_v3 = vmax.f32 %v4483_v58, 0.0  ;;  %v4481_v49 = vadd.f32 %v17417_v43, %v4437_v23  ;;  %v4839_v56 = vmax.f32 %v17871_v27, %v4838_v2  ;;  %v12340_v48 = vpop.f32.mrb[188].mxu0  ;;  %v18094_v63 = vld [vmem:[#allocation2 + $0x218] sm:$0xff]  ;;  %v7630_v58 = vld [vmem:[#allocation2 + $0x1a0] sm:$0xff] }
 0x262   :  { %13634 = vmatpush3.bf16.msra.mxu1 %v13531_v50  ;;  %13536 = vmatprep.subr.bf16.mxu0 %v17974_v19  ;;  %4901 = vst.msk [vmem:[#allocation2 + $0x2d0] sm:$0xff] %vm404_vm2, %v4892_v61  ;;  %4497 = vst.msk [vmem:[#allocation2 + $0x280] sm:$0xff] %vm404_vm2, %v4488_v22  ;;  %v4893_v33 = vmax.f32 %v4885_v28, 0.0  ;;  %v4471_v15 = vsel %vm404_vm2, %v12340_v48, -inf  ;;  %v12382_v62 = vpop.f32.mrb[188].mxu1  ;;  %v4409_v55 = vpop.f32.mrb[189].mxu0  ;;  %v18030_v27 = vpack.c.bf16 %v10855_v21, %v10854_v44 }
 0x263   :  { %12898 = vmatmul.mubr.msk.f32.gmra.mrb[214].mxu0 %vm404_vm2, %v17885_v46  ;;  %13636 = vmatprep.subr.bf16.mxu1 %v17974_v19  ;;  %4899 = vst.msk [vmem:[#allocation2 + $0x2c0] sm:$0xff] %vm404_vm2, %v4890_v35  ;;  %4500 = vst.msk [vmem:[#allocation2 + $0x298] sm:$0xff] %vm404_vm2, %v4491_v3  ;;  %v4489_v10 = vmax.f32 %v4481_v49, 0.0  ;;  %v4883_v54 = vadd.f32 %v17417_v43, %v4839_v56  ;;  %v4472_v41 = vmax.f32 %v17893_v24, %v4471_v15  ;;  %v4811_v38 = vpop.f32.mrb[189].mxu1  ;;  %v12341_v46 = vpop.f32.mrb[190].mxu0  ;;  %v18103_v23 = vld [vmem:[#allocation2 + $0x220] sm:$0xff] }
 0x264   :  { %v4873_v59 = vsel %vm404_vm2, %v12382_v62, -inf  ;;  %13118 = vmatmul.mubr.msk.f32.gmra.mrb[214].mxu1 %vm404_vm2, %v17564_v42  ;;  %12900 = vmatprep.mubr.msk.f32.mxu0 %vm404_vm2, %v18027_v4  ;;  %4902 = vst.msk [vmem:[#allocation2 + $0x2d8] sm:$0xff] %vm404_vm2, %v4893_v33  ;;  %v4457_v11 = vsel %vm404_vm2, %v4409_v55, -inf  ;;  %v4859_v24 = vsel %vm404_vm2, %v4811_v38, -inf  ;;  %v4478_v16 = vsel %vm404_vm2, %v12341_v46, -inf  ;;  %v12383_v45 = vpop.f32.mrb[190].mxu1 }
 0x265   :  { %v4874_v50 = vmax.f32 %v17904_v9, %v4873_v59  ;;  %13120 = vmatprep.mubr.msk.f32.mxu1 %vm404_vm2, %v18041_v47  ;;  %v4412_v42 = vpop.f32.mrb[191].mxu0  ;;  %13538 = vmatpush3.bf16.msra.mxu0 %v17974_v19  ;;  %4498 = vst.msk [vmem:[#allocation2 + $0x288] sm:$0xff] %vm404_vm2, %v4489_v10  ;;  %v4891_v5 = vmax.f32 %v4883_v54, 0.0  ;;  %v4486_v29 = vadd.f32 %v17417_v43, %v4472_v41  ;;  %v4814_v6 = vpop.f32.mrb[191].mxu1  ;;  %v4880_v12 = vsel %vm404_vm2, %v12383_v45, -inf  ;;  %v7631_v61 = vld [vmem:[#allocation2 + $0x1a8] sm:$0xff] }
 0x266   :  { %v4458_v9 = vmax.f32 %v17909_v57, %v4457_v11  ;;  %v4860_v39 = vmax.f32 %v17918_v53, %v4859_v24  ;;  %13638 = vmatpush3.bf16.msra.mxu1 %v17974_v19  ;;  %13540 = vmatprep.subr.bf16.mxu0 %v17983_v8  ;;  %v4479_v51 = vmax.f32 %v17923_v18, %v4478_v16  ;;  %v4464_v52 = vsel %vm404_vm2, %v4412_v42, -inf  ;;  %v18065_v57 = vld [vmem:[#allocation2 + $0x208] sm:$0xff]  ;;  %v18067_v53 = vld [vmem:[#allocation2 + $0x190] sm:$0xff]  ;;  %v7633_v2 = vld [vmem:[#allocation2 + $0x1b8] sm:$0xff] }
 0x267   :  { %v4888_v7 = vadd.f32 %v17417_v43, %v4874_v50  ;;  %12901 = vmatmul.mubr.msk.f32.gmra.mrb[216].mxu0 %vm404_vm2, %v18055_v14  ;;  %13640 = vmatprep.subr.bf16.mxu1 %v17983_v8  ;;  %4900 = vst.msk [vmem:[#allocation2 + $0x2c8] sm:$0xff] %vm404_vm2, %v4891_v5  ;;  %v4494_v19 = vmax.f32 %v4486_v29, 0.0  ;;  %v4881_v37 = vmax.f32 %v17930_v30, %v4880_v12  ;;  %v4866_v36 = vsel %vm404_vm2, %v4814_v6, -inf  ;;  %v7632_v22 = vld [vmem:[#allocation2 + $0x1b0] sm:$0xff]  ;;  %v18122_v35 = vld [vmem:[#allocation2 + $0x238] sm:$0xff]  ;;  %v10856_v3 = vld [vmem:[%s18835_s3 + $0x100] sm:$0xff] }
 0x268   :  { %v4484_v17 = vadd.f32 %v17417_v43, %v4458_v9  ;;  %v4886_v18 = vadd.f32 %v17417_v43, %v4860_v39  ;;  %13121 = vmatmul.mubr.msk.f32.gmra.mrb[216].mxu1 %vm404_vm2, %v18065_v57  ;;  %12903 = vmatprep.mubr.msk.f32.mxu0 %vm404_vm2, %v18067_v53  ;;  %v4487_v1 = vadd.f32 %v17417_v43, %v4479_v51  ;;  %v18117_v28 = vld [vmem:[#allocation2 + $0x230] sm:$0xff]  ;;  %v10857_v49 = vld [vmem:[%s18835_s3 + $0x108] sm:$0xff]  ;;  %v10859_v33 = vld [vmem:[%s18835_s3 + $0x118] sm:$0xff] }
 0x269   :  { %v4896_v40 = vmax.f32 %v4888_v7, 0.0  ;;  %v4465_v26 = vmax.f32 %v17935_v60, %v4464_v52  ;;  %13123 = vmatprep.mubr.msk.f32.mxu1 %vm404_vm2, %v18078_v0  ;;  %13542 = vmatpush3.bf16.msra.mxu0 %v17983_v8  ;;  %4503 = vst.msk [vmem:[#allocation2 + $0x2b0] sm:$0xff] %vm404_vm2, %v4494_v19  ;;  %v4889_v34 = vadd.f32 %v17417_v43, %v4881_v37  ;;  %v10858_v48 = vld [vmem:[%s18835_s3 + $0x110] sm:$0xff]  ;;  %v10860_v62 = vld [vmem:[%s18835_s3 + $0x120] sm:$0xff]  ;;  %v10861_v55 = vld [vmem:[%s18835_s3 + $0x128] sm:$0xff] }
 0x26a   :  { %v4492_v30 = vmax.f32 %v4484_v17, 0.0  ;;  %v4894_v13 = vmax.f32 %v4886_v18, 0.0  ;;  %v4867_v20 = vmax.f32 %v17949_v32, %v4866_v36  ;;  %13642 = vmatpush3.bf16.msra.mxu1 %v17983_v8  ;;  %13544 = vmatprep.subr.bf16.mxu0 %v18030_v27  ;;  %v4495_v60 = vmax.f32 %v4487_v1, 0.0  ;;  %v10863_v10 = vld [vmem:[%s18835_s3 + $0x138] sm:$0xff]  ;;  %v7861_v41 = vld [vmem:[#allocation2 + $0x1c0] sm:$0xff]  ;;  %v10881_v38 = vld [vmem:[%s18835_s3 + $0x148] sm:$0xff] }
 0x26b   :  { %4905 = vst.msk [vmem:[#allocation2 + $0x2f0] sm:$0xff] %vm404_vm2, %v4896_v40  ;;  %v4485_v31 = vadd.f32 %v17417_v43, %v4465_v26  ;;  %12904 = vmatmul.mubr.msk.f32.gmra.mrb[218].mxu0 %vm404_vm2, %v7629_v25  ;;  %13644 = vmatprep.subr.bf16.mxu1 %v18030_v27  ;;  %v4897_v32 = vmax.f32 %v4889_v34, 0.0  ;;  %v13547_v56 = vpack.c.bf16 %v10857_v49, %v10856_v3  ;;  %v10880_v59 = vld [vmem:[%s18835_s3 + $0x140] sm:$0xff]  ;;  %v7862_v50 = vld [vmem:[#allocation2 + $0x1c8] sm:$0xff]  ;;  %v7863_v16 = vld [vmem:[#allocation2 + $0x1d0] sm:$0xff] }
 0x26c   :  { %4501 = vst.msk [vmem:[#allocation2 + $0x2a0] sm:$0xff] %vm404_vm2, %v4492_v30  ;;  %4903 = vst.msk [vmem:[#allocation2 + $0x2e0] sm:$0xff] %vm404_vm2, %v4894_v13  ;;  %v4887_v8 = vadd.f32 %v17417_v43, %v4867_v20  ;;  %13124 = vmatmul.mubr.msk.f32.gmra.mrb[218].mxu1 %vm404_vm2, %v18094_v63  ;;  %12906 = vmatprep.mubr.msk.f32.mxu0 %vm404_vm2, %v7630_v58  ;;  %v18111_v43 = vld [vmem:[#allocation2 + $0x228] sm:$0xff]  ;;  %v13551_v15 = vpack.c.bf16 %v10859_v33, %v10858_v48  ;;  %v18186_v46 = vld [vmem:[#allocation2 + $0x240] sm:$0xff] }
 0x26d   :  { %4504 = vst.msk [vmem:[#allocation2 + $0x2b8] sm:$0xff] %vm404_vm2, %v4495_v60  ;;  %v4493_v44 = vmax.f32 %v4485_v31, 0.0  ;;  %13126 = vmatprep.mubr.msk.f32.mxu1 %vm404_vm2, %v18103_v23  ;;  %4906 = vst.msk [vmem:[#allocation2 + $0x2f8] sm:$0xff] %vm404_vm2, %v4897_v32  ;;  %v13563_v11 = vpack.c.bf16 %v10881_v38, %v10880_v59  ;;  %v18191_v24 = vld [vmem:[#allocation2 + $0x248] sm:$0xff]  ;;  %v18196_v45 = vld [vmem:[#allocation2 + $0x250] sm:$0xff] }
 0x26e   :  { %v4895_v21 = vmax.f32 %v4887_v8, 0.0  ;;  %v7864_v42 = vld [vmem:[#allocation2 + $0x1d8] sm:$0xff]  ;;  %v7865_v29 = vld [vmem:[#allocation2 + $0x1e0] sm:$0xff]  ;;  %v7866_v39 = vld [vmem:[#allocation2 + $0x1e8] sm:$0xff] }
 0x26f   :  { %4502 = vst.msk [vmem:[#allocation2 + $0x2a8] sm:$0xff] %vm404_vm2, %v4493_v44  ;;  %12907 = vmatmul.mubr.msk.f32.gmra.mrb[220].mxu0 %vm404_vm2, %v7631_v61  ;;  %v18201_v5 = vld [vmem:[#allocation2 + $0x258] sm:$0xff]  ;;  %v18206_v9 = vld [vmem:[#allocation2 + $0x260] sm:$0xff]  ;;  %v18211_v6 = vld [vmem:[#allocation2 + $0x268] sm:$0xff] }
 0x270   :  { %4904 = vst.msk [vmem:[#allocation2 + $0x2e8] sm:$0xff] %vm404_vm2, %v4895_v21  ;;  %13127 = vmatmul.mubr.msk.f32.gmra.mrb[220].mxu1 %vm404_vm2, %v18111_v43  ;;  %12909 = vmatprep.mubr.msk.f32.mxu0 %vm404_vm2, %v7632_v22  ;;  %v18216_v7 = vld [vmem:[#allocation2 + $0x270] sm:$0xff]  ;;  %v7868_v51 = vld [vmem:[#allocation2 + $0x1f8] sm:$0xff]  ;;  %v10884_v17 = vld [vmem:[%s18835_s3 + $0x160] sm:$0xff] }
 0x271   :  { %13129 = vmatprep.mubr.msk.f32.mxu1 %vm404_vm2, %v18117_v28  ;;  %v18221_v12 = vld [vmem:[#allocation2 + $0x278] sm:$0xff]  ;;  %v10882_v52 = vld [vmem:[%s18835_s3 + $0x150] sm:$0xff]  ;;  %v10885_v18 = vld [vmem:[%s18835_s3 + $0x168] sm:$0xff] }
 0x272   :  { %v13571_v37 = vpack.c.bf16 %v10885_v18, %v10884_v17  ;;  %v10886_v40 = vld [vmem:[%s18835_s3 + $0x170] sm:$0xff]  ;;  %v10887_v1 = vld [vmem:[%s18835_s3 + $0x178] sm:$0xff]  ;;  %v10888_v36 = vld [vmem:[%s18835_s3 + $0x180] sm:$0xff] }
 0x273   :  { %12910 = vmatmul.mubr.msk.f32.gmra.mrb[222].mxu0 %vm404_vm2, %v7633_v2  ;;  %v13575_v26 = vpack.c.bf16 %v10887_v1, %v10886_v40  ;;  %v10889_v30 = vld [vmem:[%s18835_s3 + $0x188] sm:$0xff]  ;;  %v9865_v34 = vld [vmem:[%s18836_s5 + $0x80] sm:$0xff]  ;;  %v9330_v32 = vld [vmem:[#allocation2 + $0x298] sm:$0xff] }
 0x274   :  { %13130 = vmatmul.mubr.msk.f32.gmra.mrb[222].mxu1 %vm404_vm2, %v18122_v35  ;;  %12932 = vmatprep.mubr.msk.f32.mxu0 %vm404_vm2, %v18027_v4  ;;  %v13555_v4 = vpack.c.bf16 %v10861_v55, %v10860_v62  ;;  %v13579_v13 = vpack.c.bf16 %v10889_v30, %v10888_v36  ;;  %v9866_v20 = vld [vmem:[%s18836_s5 + $0x88] sm:$0xff]  ;;  %v9331_v8 = vld [vmem:[#allocation2 + $0x2a0] sm:$0xff]  ;;  %v9333_v21 = vld [vmem:[#allocation2 + $0x2b0] sm:$0xff] }
 0x275   :  { %13152 = vmatprep.mubr.msk.f32.mxu1 %vm404_vm2, %v18041_v47  ;;  %v13683_v60 = vpack.c.bf16 %v9866_v20, %v9865_v34  ;;  %v9328_v31 = vld [vmem:[#allocation2 + $0x288] sm:$0xff]  ;;  %v9867_v3 = vld [vmem:[%s18836_s5 + $0x90] sm:$0xff]  ;;  %v9868_v49 = vld [vmem:[%s18836_s5 + $0x98] sm:$0xff] }
 0x276   :  { %v9332_v44 = vld [vmem:[#allocation2 + $0x2a8] sm:$0xff]  ;;  %v13687_v48 = vpack.c.bf16 %v9868_v49, %v9867_v3  ;;  %v9851_v33 = vld [vmem:[%s18836_s5 + $0x10] sm:$0xff]  ;;  %v9869_v62 = vld [vmem:[%s18836_s5 + $0xa0] sm:$0xff] }
 0x277   :  { %12933 = vmatmul.mubr.msk.f32.vlgmr.msra.gmra.mrb[208].mxu0 %vm404_vm2, %v18055_v14  ;;  %v7867_v14 = vld [vmem:[#allocation2 + $0x1f0] sm:$0xff]  ;;  %v9856_v59 = vld [vmem:[%s18836_s5 + $0x38] sm:$0xff]  ;;  %v9874_v38 = vld [vmem:[%s18836_s5 + $0xc8] sm:$0xff] }
 0x278   :  { %13153 = vmatmul.mubr.msk.f32.vlgmr.msra.gmra.mrb[208].mxu1 %vm404_vm2, %v18065_v57  ;;  %12935 = vmatprep.mubr.msk.f32.mxu0 %vm404_vm2, %v18067_v53  ;;  %v10883_v53 = vld [vmem:[%s18835_s3 + $0x158] sm:$0xff] }
 0x279   :  { %13546 = vmatpush3.bf16.msra.mxu0 %v18030_v27  ;;  %13155 = vmatprep.mubr.msk.f32.mxu1 %vm404_vm2, %v18078_v0  ;;  %v13567_v19 = vpack.c.bf16 %v10883_v53, %v10882_v52 }
 0x27a   :  { %13646 = vmatpush3.bf16.msra.mxu1 %v18030_v27  ;;  %13548 = vmatprep.subr.bf16.mxu0 %v13547_v56  ;;  %v10862_v27 = vld [vmem:[%s18835_s3 + $0x130] sm:$0xff] }
 0x27b   :  { %12936 = vmatmul.mubr.msk.f32.gmra.mrb[210].mxu0 %vm404_vm2, %v7629_v25  ;;  %13648 = vmatprep.subr.bf16.mxu1 %v13547_v56  ;;  %v13559_v54 = vpack.c.bf16 %v10863_v10, %v10862_v27  ;;  %v9327_v25 = vld [vmem:[#allocation2 + $0x280] sm:$0xff]  ;;  %v9854_v27 = vld [vmem:[%s18836_s5 + $0x28] sm:$0xff]  ;;  %v9872_v10 = vld [vmem:[%s18836_s5 + $0xb8] sm:$0xff] }
 0x27c   :  { %13156 = vmatmul.mubr.msk.f32.gmra.mrb[210].mxu1 %vm404_vm2, %v18094_v63  ;;  %12938 = vmatprep.mubr.msk.f32.mxu0 %vm404_vm2, %v7630_v58  ;;  %v9329_v58 = vld [vmem:[#allocation2 + $0x290] sm:$0xff] }
 0x27d   :  { %13158 = vmatprep.mubr.msk.f32.mxu1 %vm404_vm2, %v18103_v23  ;;  %13550 = vmatpush3.bf16.msra.mxu0 %v13547_v56 }
 0x27e   :  { %13650 = vmatpush3.bf16.msra.mxu1 %v13547_v56  ;;  %13552 = vmatprep.subr.bf16.mxu0 %v13551_v15 }
 0x27f   :  { %12939 = vmatmul.mubr.msk.f32.gmra.mrb[212].mxu0 %vm404_vm2, %v7631_v61  ;;  %13652 = vmatprep.subr.bf16.mxu1 %v13551_v15  ;;  %v9849_v61 = vld [vmem:[%s18836_s5] sm:$0xff] }
 0x280   :  { %13159 = vmatmul.mubr.msk.f32.gmra.mrb[212].mxu1 %vm404_vm2, %v18111_v43  ;;  %12941 = vmatprep.mubr.msk.f32.mxu0 %vm404_vm2, %v7632_v22  ;;  %v9850_v22 = vld [vmem:[%s18836_s5 + $0x8] sm:$0xff] }
 0x281   :  { %13161 = vmatprep.mubr.msk.f32.mxu1 %vm404_vm2, %v18117_v28  ;;  %13554 = vmatpush3.bf16.msra.mxu0 %v13551_v15  ;;  %v13685_v56 = vpack.c.bf16 %v9850_v22, %v9849_v61 }
 0x282   :  { %13654 = vmatpush3.bf16.msra.mxu1 %v13551_v15  ;;  %13556 = vmatprep.subr.bf16.mxu0 %v13555_v4  ;;  %v9852_v15 = vld [vmem:[%s18836_s5 + $0x18] sm:$0xff] }
 0x283   :  { %12942 = vmatmul.mubr.msk.f32.gmra.mrb[214].mxu0 %vm404_vm2, %v7633_v2  ;;  %13656 = vmatprep.subr.bf16.mxu1 %v13555_v4  ;;  %v9334_v2 = vld [vmem:[#allocation2 + $0x2b8] sm:$0xff]  ;;  %v13689_v55 = vpack.c.bf16 %v9852_v15, %v9851_v33 }
 0x284   :  { %13162 = vmatmul.mubr.msk.f32.gmra.mrb[214].mxu1 %vm404_vm2, %v18122_v35  ;;  %12944 = vmatprep.mubr.msk.f32.mxu0 %vm404_vm2, %v7861_v41 }
 0x285   :  { %13164 = vmatprep.mubr.msk.f32.mxu1 %vm404_vm2, %v18186_v46  ;;  %13558 = vmatpush3.bf16.msra.mxu0 %v13555_v4 }
 0x286   :  { %13658 = vmatpush3.bf16.msra.mxu1 %v13555_v4  ;;  %13560 = vmatprep.subr.bf16.mxu0 %v13559_v54 }
 0x287   :  { %12945 = vmatmul.mubr.msk.f32.gmra.mrb[216].mxu0 %vm404_vm2, %v7862_v50  ;;  %13660 = vmatprep.subr.bf16.mxu1 %v13559_v54 }
 0x288   :  { %13165 = vmatmul.mubr.msk.f32.gmra.mrb[216].mxu1 %vm404_vm2, %v18191_v24  ;;  %12947 = vmatprep.mubr.msk.f32.mxu0 %vm404_vm2, %v7863_v16 }
 0x289   :  { %13167 = vmatprep.mubr.msk.f32.mxu1 %vm404_vm2, %v18196_v45  ;;  %13562 = vmatpush3.bf16.msra.mxu0 %v13559_v54 }
 0x28a   :  { %13662 = vmatpush3.bf16.msra.mxu1 %v13559_v54  ;;  %13564 = vmatprep.subr.bf16.mxu0 %v13563_v11 }
 0x28b   :  { %12948 = vmatmul.mubr.msk.f32.gmra.mrb[218].mxu0 %vm404_vm2, %v7864_v42  ;;  %13664 = vmatprep.subr.bf16.mxu1 %v13563_v11 }
 0x28c   :  { %13168 = vmatmul.mubr.msk.f32.gmra.mrb[218].mxu1 %vm404_vm2, %v18201_v5  ;;  %12950 = vmatprep.mubr.msk.f32.mxu0 %vm404_vm2, %v7865_v29 }
 0x28d   :  { %13170 = vmatprep.mubr.msk.f32.mxu1 %vm404_vm2, %v18206_v9 }
 0x28f   :  { %12951 = vmatmul.mubr.msk.f32.gmra.mrb[220].mxu0 %vm404_vm2, %v7866_v39 }
 0x290   :  { %13171 = vmatmul.mubr.msk.f32.gmra.mrb[220].mxu1 %vm404_vm2, %v18211_v6  ;;  %12953 = vmatprep.mubr.msk.f32.mxu0 %vm404_vm2, %v7867_v14 }
 0x291   :  { %13173 = vmatprep.mubr.msk.f32.mxu1 %vm404_vm2, %v18216_v7 }
 0x293   :  { %12954 = vmatmul.mubr.msk.f32.gmra.mrb[222].mxu0 %vm404_vm2, %v7868_v51 }
 0x294   :  { %13174 = vmatmul.mubr.msk.f32.gmra.mrb[222].mxu1 %vm404_vm2, %v18221_v12  ;;  %12976 = vmatprep.mubr.msk.f32.mxu0 %vm404_vm2, %v7861_v41 }
 0x295   :  { %13196 = vmatprep.mubr.msk.f32.mxu1 %vm404_vm2, %v18186_v46 }
 0x297   :  { %12977 = vmatmul.mubr.msk.f32.vlgmr.msra.gmra.mrb[208].mxu0 %vm404_vm2, %v7862_v50 }
 0x298   :  { %13197 = vmatmul.mubr.msk.f32.vlgmr.msra.gmra.mrb[208].mxu1 %vm404_vm2, %v18191_v24  ;;  %12979 = vmatprep.mubr.msk.f32.mxu0 %vm404_vm2, %v7863_v16  ;;  %v9858_v16 = vld [vmem:[%s18836_s5 + $0x48] sm:$0xff] }
 0x299   :  { %13566 = vmatpush3.bf16.msra.mxu0 %v13563_v11  ;;  %13199 = vmatprep.mubr.msk.f32.mxu1 %vm404_vm2, %v18196_v45 }
 0x29a   :  { %13666 = vmatpush3.bf16.msra.mxu1 %v13563_v11  ;;  %13568 = vmatprep.subr.bf16.mxu0 %v13567_v19 }
 0x29b   :  { %12980 = vmatmul.mubr.msk.f32.gmra.mrb[210].mxu0 %vm404_vm2, %v7864_v42  ;;  %13668 = vmatprep.subr.bf16.mxu1 %v13567_v19 }
 0x29c   :  { %13200 = vmatmul.mubr.msk.f32.gmra.mrb[210].mxu1 %vm404_vm2, %v18201_v5  ;;  %12982 = vmatprep.mubr.msk.f32.mxu0 %vm404_vm2, %v7865_v29  ;;  %v9563_v29 = vld [vmem:[#allocation2 + $0x2c8] sm:$0xff] }
 0x29d   :  { %13202 = vmatprep.mubr.msk.f32.mxu1 %vm404_vm2, %v18206_v9  ;;  %13570 = vmatpush3.bf16.msra.mxu0 %v13567_v19 }
 0x29e   :  { %13670 = vmatpush3.bf16.msra.mxu1 %v13567_v19  ;;  %13572 = vmatprep.subr.bf16.mxu0 %v13571_v37 }
 0x29f   :  { %12983 = vmatmul.mubr.msk.f32.gmra.mrb[212].mxu0 %vm404_vm2, %v7866_v39  ;;  %13672 = vmatprep.subr.bf16.mxu1 %v13571_v37  ;;  %v9568_v39 = vld [vmem:[#allocation2 + $0x2f0] sm:$0xff] }
 0x2a0   :  { %13203 = vmatmul.mubr.msk.f32.gmra.mrb[212].mxu1 %vm404_vm2, %v18211_v6  ;;  %12985 = vmatprep.mubr.msk.f32.mxu0 %vm404_vm2, %v7867_v14 }
 0x2a1   :  { %13205 = vmatprep.mubr.msk.f32.mxu1 %vm404_vm2, %v18216_v7  ;;  %13574 = vmatpush3.bf16.msra.mxu0 %v13571_v37 }
 0x2a2   :  { %13674 = vmatpush3.bf16.msra.mxu1 %v13571_v37  ;;  %13576 = vmatprep.subr.bf16.mxu0 %v13575_v26 }
 0x2a3   :  { %12986 = vmatmul.mubr.msk.f32.gmra.mrb[214].mxu0 %vm404_vm2, %v7868_v51  ;;  %13676 = vmatprep.subr.bf16.mxu1 %v13575_v26 }
 0x2a4   :  { %13206 = vmatmul.mubr.msk.f32.gmra.mrb[214].mxu1 %vm404_vm2, %v18221_v12  ;;  %12988 = vmatprep.mubr.msk.f32.mxu0 %vm404_vm2, %v18041_v47 }
 0x2a5   :  { %13208 = vmatprep.mubr.msk.f32.mxu1 %vm404_vm2, %v9327_v25  ;;  %13578 = vmatpush3.bf16.msra.mxu0 %v13575_v26 }
 0x2a6   :  { %13678 = vmatpush3.bf16.msra.mxu1 %v13575_v26  ;;  %13580 = vmatprep.subr.bf16.mxu0 %v13579_v13 }
 0x2a7   :  { %12989 = vmatmul.mubr.msk.f32.gmra.mrb[216].mxu0 %vm404_vm2, %v18065_v57  ;;  %13680 = vmatprep.subr.bf16.mxu1 %v13579_v13 }
 0x2a8   :  { %13209 = vmatmul.mubr.msk.f32.gmra.mrb[216].mxu1 %vm404_vm2, %v9328_v31  ;;  %12991 = vmatprep.mubr.msk.f32.mxu0 %vm404_vm2, %v18078_v0 }
 0x2a9   :  { %13211 = vmatprep.mubr.msk.f32.mxu1 %vm404_vm2, %v9329_v58  ;;  %13582 = vmatpush3.bf16.msra.mxu0 %v13579_v13 }
 0x2aa   :  { %13682 = vmatpush3.bf16.msra.mxu1 %v13579_v13  ;;  %13684 = vmatprep.subr.bf16.mxu0 %v13683_v60 }
 0x2ab   :  { %12992 = vmatmul.mubr.msk.f32.gmra.mrb[218].mxu0 %vm404_vm2, %v18094_v63 }
 0x2ac   :  { %13212 = vmatmul.mubr.msk.f32.gmra.mrb[218].mxu1 %vm404_vm2, %v9330_v32  ;;  %12994 = vmatprep.mubr.msk.f32.mxu0 %vm404_vm2, %v18103_v23 }
 0x2ad   :  { %13214 = vmatprep.mubr.msk.f32.mxu1 %vm404_vm2, %v9331_v8 }
 0x2af   :  { %12995 = vmatmul.mubr.msk.f32.gmra.mrb[220].mxu0 %vm404_vm2, %v18111_v43 }
 0x2b0   :  { %13215 = vmatmul.mubr.msk.f32.gmra.mrb[220].mxu1 %vm404_vm2, %v9332_v44  ;;  %12997 = vmatprep.mubr.msk.f32.mxu0 %vm404_vm2, %v18117_v28 }
 0x2b1   :  { %13217 = vmatprep.mubr.msk.f32.mxu1 %vm404_vm2, %v9333_v21 }
 0x2b3   :  { %12998 = vmatmul.mubr.msk.f32.gmra.mrb[222].mxu0 %vm404_vm2, %v18122_v35 }
 0x2b4   :  { %13218 = vmatmul.mubr.msk.f32.gmra.mrb[222].mxu1 %vm404_vm2, %v9334_v2  ;;  %13020 = vmatprep.mubr.msk.f32.mxu0 %vm404_vm2, %v18041_v47  ;;  %v9870_v47 = vld [vmem:[%s18836_s5 + $0xa8] sm:$0xff] }
 0x2b5   :  { %13240 = vmatprep.mubr.msk.f32.mxu1 %vm404_vm2, %v9327_v25  ;;  %v13691_v4 = vpack.c.bf16 %v9870_v47, %v9869_v62 }
 0x2b7   :  { %13021 = vmatmul.mubr.msk.f32.vlgmr.msra.gmra.mrb[208].mxu0 %vm404_vm2, %v18065_v57  ;;  %v9853_v57 = vld [vmem:[%s18836_s5 + $0x20] sm:$0xff] }
 0x2b8   :  { %13241 = vmatmul.mubr.msk.f32.vlgmr.msra.gmra.mrb[208].mxu1 %vm404_vm2, %v9328_v31  ;;  %13023 = vmatprep.mubr.msk.f32.mxu0 %vm404_vm2, %v18078_v0  ;;  %v9871_v0 = vld [vmem:[%s18836_s5 + $0xb0] sm:$0xff]  ;;  %v13693_v54 = vpack.c.bf16 %v9854_v27, %v9853_v57 }
 0x2b9   :  { %13243 = vmatprep.mubr.msk.f32.mxu1 %vm404_vm2, %v9329_v58  ;;  %13686 = vmatpush3.bf16.msra.mxu0 %v13685_v56  ;;  %v13695_v41 = vpack.c.bf16 %v9872_v10, %v9871_v0 }
 0x2ba   :  { %13688 = vmatprep.subr.bf16.mxu0 %v13687_v48 }
 0x2bb   :  { %13024 = vmatmul.mubr.msk.f32.gmra.mrb[210].mxu0 %vm404_vm2, %v18094_v63  ;;  %v9855_v63 = vld [vmem:[%s18836_s5 + $0x30] sm:$0xff] }
 0x2bc   :  { %13244 = vmatmul.mubr.msk.f32.gmra.mrb[210].mxu1 %vm404_vm2, %v9330_v32  ;;  %13026 = vmatprep.mubr.msk.f32.mxu0 %vm404_vm2, %v18103_v23  ;;  %v9873_v23 = vld [vmem:[%s18836_s5 + $0xc0] sm:$0xff]  ;;  %v13697_v50 = vpack.c.bf16 %v9856_v59, %v9855_v63 }
 0x2bd   :  { %13246 = vmatprep.mubr.msk.f32.mxu1 %vm404_vm2, %v9331_v8  ;;  %13690 = vmatpush3.bf16.msra.mxu0 %v13689_v55  ;;  %v13699_v11 = vpack.c.bf16 %v9874_v38, %v9873_v23 }
 0x2be   :  { %13692 = vmatprep.subr.bf16.mxu0 %v13691_v4 }
 0x2bf   :  { %13027 = vmatmul.mubr.msk.f32.gmra.mrb[212].mxu0 %vm404_vm2, %v18111_v43  ;;  %v9857_v43 = vld [vmem:[%s18836_s5 + $0x40] sm:$0xff] }
 0x2c0   :  { %13247 = vmatmul.mubr.msk.f32.gmra.mrb[212].mxu1 %vm404_vm2, %v9332_v44  ;;  %13029 = vmatprep.mubr.msk.f32.mxu0 %vm404_vm2, %v18117_v28  ;;  %v9562_v28 = vld [vmem:[#allocation2 + $0x2c0] sm:$0xff]  ;;  %v13701_v42 = vpack.c.bf16 %v9858_v16, %v9857_v43 }
 0x2c1   :  { %13249 = vmatprep.mubr.msk.f32.mxu1 %vm404_vm2, %v9333_v21  ;;  %13694 = vmatpush3.bf16.msra.mxu0 %v13693_v54 }
 0x2c2   :  { %13696 = vmatprep.subr.bf16.mxu0 %v13695_v41 }
 0x2c3   :  { %13030 = vmatmul.mubr.msk.f32.gmra.mrb[214].mxu0 %vm404_vm2, %v18122_v35  ;;  %v9564_v35 = vld [vmem:[#allocation2 + $0x2d0] sm:$0xff] }
 0x2c4   :  { %13250 = vmatmul.mubr.msk.f32.gmra.mrb[214].mxu1 %vm404_vm2, %v9334_v2  ;;  %13032 = vmatprep.mubr.msk.f32.mxu0 %vm404_vm2, %v18186_v46  ;;  %v9565_v46 = vld [vmem:[#allocation2 + $0x2d8] sm:$0xff] }
 0x2c5   :  { %13252 = vmatprep.mubr.msk.f32.mxu1 %vm404_vm2, %v9562_v28  ;;  %13698 = vmatpush3.bf16.msra.mxu0 %v13697_v50 }
 0x2c6   :  { %13700 = vmatprep.subr.bf16.mxu0 %v13699_v11 }
 0x2c7   :  { %13033 = vmatmul.mubr.msk.f32.gmra.mrb[216].mxu0 %vm404_vm2, %v18191_v24  ;;  %v9566_v24 = vld [vmem:[#allocation2 + $0x2e0] sm:$0xff] }
 0x2c8   :  { %13253 = vmatmul.mubr.msk.f32.gmra.mrb[216].mxu1 %vm404_vm2, %v9563_v29  ;;  %13035 = vmatprep.mubr.msk.f32.mxu0 %vm404_vm2, %v18196_v45  ;;  %v9567_v45 = vld [vmem:[#allocation2 + $0x2e8] sm:$0xff] }
 0x2c9   :  { %13255 = vmatprep.mubr.msk.f32.mxu1 %vm404_vm2, %v9564_v35  ;;  %13702 = vmatpush3.bf16.msra.mxu0 %v13701_v42 }
 0x2cb   :  { %13036 = vmatmul.mubr.msk.f32.gmra.mrb[218].mxu0 %vm404_vm2, %v18201_v5  ;;  %v9569_v5 = vld [vmem:[#allocation2 + $0x2f8] sm:$0xff] }
 0x2cc   :  { %13256 = vmatmul.mubr.msk.f32.gmra.mrb[218].mxu1 %vm404_vm2, %v9565_v46  ;;  %13038 = vmatprep.mubr.msk.f32.mxu0 %vm404_vm2, %v18206_v9  ;;  %v18408_v9 = vld [vmem:[%s18837_s4] ss:$0 sm:$0xff]  ;;  %s14322_s4 = smov 96  }
 0x2cd   :  { %13258 = vmatprep.mubr.msk.f32.mxu1 %vm404_vm2, %v9566_v24 }
 0x2cf   :  { %13039 = vmatmul.mubr.msk.f32.gmra.mrb[220].mxu0 %vm404_vm2, %v18211_v6 }
 0x2d0   :  { %13259 = vmatmul.mubr.msk.f32.gmra.mrb[220].mxu1 %vm404_vm2, %v9567_v45  ;;  %13041 = vmatprep.mubr.msk.f32.mxu0 %vm404_vm2, %v18216_v7 }
 0x2d1   :  { %13261 = vmatprep.mubr.msk.f32.mxu1 %vm404_vm2, %v9568_v39 }
 0x2d3   :  { %13042 = vmatmul.mubr.msk.f32.gmra.mrb[222].mxu0 %vm404_vm2, %v18221_v12 }
 0x2d4   :  { %13262 = vmatmul.mubr.msk.f32.gmra.mrb[222].mxu1 %vm404_vm2, %v9569_v5 }
 0x2ea   :  { %v12582_v6 = vpop.f32.mrb[192].mxu0 }
 0x2eb   :  { %v13759_v14 = vadd.f32 %v12582_v6, %v18408_v9  ;;  %v12802_v51 = vpop.f32.mrb[192].mxu1  ;;  %v5998_v7 = vpop.f32.mrb[193].mxu0 }
 0x2ec   :  { %v13775_v52 = vadd.f32 %v12802_v51, %v18408_v9  ;;  %v13760_v53 = vadd.f32 %v18408_v9, %v5998_v7  ;;  %v7232_v19 = vpop.f32.mrb[193].mxu1 }
 0x2ed   :  { %v6095_v12 = vsel %vm6093_vm3, %v13759_v14, -inf  ;;  %v13776_v17 = vadd.f32 %v18408_v9, %v7232_v19 }
 0x2ee   :  { %v7328_v18 = vsel %vm6093_vm3, %v13775_v52, -inf  ;;  %v6094_v37 = vsel %vm6093_vm3, %v13760_v53, -inf  ;;  %v12585_v40 = vpop.f32.mrb[194].mxu0 }
 0x2ef   :  { %v6096_v1 = vmax.f32 %v6094_v37, %v6095_v12  ;;  %v7327_v26 = vsel %vm6093_vm3, %v13776_v17, -inf  ;;  %v13761_v36 = vadd.f32 %v12585_v40, %v18408_v9  ;;  %v12805_v30 = vpop.f32.mrb[194].mxu1  ;;  %v6008_v13 = vpop.f32.mrb[195].mxu0 }
 0x2f0   :  { %v7329_v34 = vmax.f32 %v7327_v26, %v7328_v18  ;;  %v13777_v20 = vadd.f32 %v12805_v30, %v18408_v9  ;;  %v13762_v25 = vadd.f32 %v18408_v9, %v6008_v13  ;;  %v7242_v60 = vpop.f32.mrb[195].mxu1 }
 0x2f1   :  { %v6098_v31 = vsel %vm6093_vm3, %v13761_v36, -inf  ;;  %v13778_v58 = vadd.f32 %v18408_v9, %v7242_v60  ;;  %v18463_v51 = vsel %vm6093_vm3, %v6096_v1, -inf }
 0x2f2   :  { %v7331_v32 = vsel %vm6093_vm3, %v13777_v20, -inf  ;;  %v6097_v8 = vsel %vm6093_vm3, %v13762_v25, -inf  ;;  %v12588_v44 = vpop.f32.mrb[196].mxu0  ;;  %v18468_v19 = vsel %vm6093_vm3, %v7329_v34, -inf }
 0x2f3   :  { %v6099_v21 = vmax.f32 %v6097_v8, %v6098_v31  ;;  %v7330_v61 = vsel %vm6093_vm3, %v13778_v58, -inf  ;;  %v13763_v22 = vadd.f32 %v12588_v44, %v18408_v9  ;;  %v12808_v2 = vpop.f32.mrb[196].mxu1  ;;  %v6018_v3 = vpop.f32.mrb[197].mxu0 }
 0x2f4   :  { %v7332_v49 = vmax.f32 %v7330_v61, %v7331_v32  ;;  %v13779_v56 = vadd.f32 %v12808_v2, %v18408_v9  ;;  %v13764_v48 = vadd.f32 %v18408_v9, %v6018_v3  ;;  %v7252_v33 = vpop.f32.mrb[197].mxu1 }
 0x2f5   :  { %v6101_v15 = vsel %vm6093_vm3, %v13763_v22, -inf  ;;  %v13780_v62 = vadd.f32 %v18408_v9, %v7252_v33  ;;  %v6121_v13 = vsel %vm6093_vm3, %v6099_v21, -inf }
 0x2f6   :  { %v18432_v47 = vsel %vm6093_vm3, %v13779_v56, -inf  ;;  %v6100_v55 = vsel %vm6093_vm3, %v13764_v48, -inf  ;;  %v12591_v4 = vpop.f32.mrb[198].mxu0  ;;  %v7354_v60 = vsel %vm6093_vm3, %v7332_v49, -inf }
 0x2f7   :  { %v6102_v57 = vmax.f32 %v6100_v55, %v6101_v15  ;;  %v7333_v27 = vsel %vm6093_vm3, %v13780_v62, -inf  ;;  %v13765_v0 = vadd.f32 %v12591_v4, %v18408_v9  ;;  %v12811_v10 = vpop.f32.mrb[198].mxu1  ;;  %v6028_v54 = vpop.f32.mrb[199].mxu0 }
 0x2f8   :  { %v7335_v41 = vmax.f32 %v7333_v27, %v18432_v47  ;;  %v13781_v63 = vadd.f32 %v12811_v10, %v18408_v9  ;;  %v13766_v59 = vadd.f32 %v18408_v9, %v6028_v54  ;;  %v7262_v23 = vpop.f32.mrb[199].mxu1 }
 0x2f9   :  { %v18441_v38 = vsel %vm6093_vm3, %v13765_v0, -inf  ;;  %v13782_v50 = vadd.f32 %v18408_v9, %v7262_v23  ;;  %v6124_v56 = vsel %vm6093_vm3, %v6102_v57, -inf }
 0x2fa   :  { %v18445_v11 = vsel %vm6093_vm3, %v13781_v63, -inf  ;;  %v18448_v43 = vsel %vm6093_vm3, %v13766_v59, -inf  ;;  %v12594_v16 = vpop.f32.mrb[200].mxu0  ;;  %v7357_v47 = vsel %vm6093_vm3, %v7335_v41, -inf }
 0x2fb   :  { %v6105_v28 = vmax.f32 %v18448_v43, %v18441_v38  ;;  %v18453_v42 = vsel %vm6093_vm3, %v13782_v50, -inf  ;;  %v13767_v29 = vadd.f32 %v12594_v16, %v18408_v9  ;;  %v12814_v35 = vpop.f32.mrb[200].mxu1  ;;  %v6038_v46 = vpop.f32.mrb[201].mxu0 }
 0x2fc   :  { %v7338_v24 = vmax.f32 %v18453_v42, %v18445_v11  ;;  %v13783_v45 = vadd.f32 %v12814_v35, %v18408_v9  ;;  %v13768_v39 = vadd.f32 %v18408_v9, %v6038_v46  ;;  %v7272_v5 = vpop.f32.mrb[201].mxu1  ;;  %v9864_v11 = vld [vmem:[%s18836_s5 + $0x78] sm:$0xff] }
 0x2fd   :  { %v6107_v6 = vsel %vm6093_vm3, %v13767_v29, -inf  ;;  %v13784_v14 = vadd.f32 %v18408_v9, %v7272_v5 }
 0x2fe   :  { %v7340_v7 = vsel %vm6093_vm3, %v13783_v45, -inf  ;;  %v6106_v52 = vsel %vm6093_vm3, %v13768_v39, -inf  ;;  %v12597_v53 = vpop.f32.mrb[202].mxu0 }
 0x2ff   :  { %v6108_v12 = vmax.f32 %v6106_v52, %v6107_v6  ;;  %v7339_v17 = vsel %vm6093_vm3, %v13784_v14, -inf  ;;  %v13769_v18 = vadd.f32 %v12597_v53, %v18408_v9  ;;  %v12817_v37 = vpop.f32.mrb[202].mxu1  ;;  %v6048_v40 = vpop.f32.mrb[203].mxu0  ;;  %v9875_v6 = vld [vmem:[%s18836_s5 + $0xd0] sm:$0xff] }
 0x300   :  { %v7341_v26 = vmax.f32 %v7339_v17, %v7340_v7  ;;  %v13785_v36 = vadd.f32 %v12817_v37, %v18408_v9  ;;  %v13770_v1 = vadd.f32 %v18408_v9, %v6048_v40  ;;  %v7282_v30 = vpop.f32.mrb[203].mxu1  ;;  %v9859_v17 = vld [vmem:[%s18836_s5 + $0x50] sm:$0xff] }
 0x301   :  { %v18476_v20 = vsel %vm6093_vm3, %v6108_v12, -inf  ;;  %v6110_v34 = vsel %vm6093_vm3, %v13769_v18, -inf  ;;  %v13786_v25 = vadd.f32 %v18408_v9, %v7282_v30  ;;  %v9876_v12 = vld [vmem:[%s18836_s5 + $0xd8] sm:$0xff]  ;;  %v9878_v30 = vld [vmem:[%s18836_s5 + $0xe8] sm:$0xff] }
 0x302   :  { %v6120_v31 = vmax.f32 %v18463_v51, %v18476_v20  ;;  %v18484_v58 = vsel %vm6093_vm3, %v7341_v26, -inf  ;;  %v7343_v32 = vsel %vm6093_vm3, %v13785_v36, -inf  ;;  %v6109_v8 = vsel %vm6093_vm3, %v13770_v1, -inf  ;;  %v12600_v44 = vpop.f32.mrb[204].mxu0  ;;  %v9860_v18 = vld [vmem:[%s18836_s5 + $0x58] sm:$0xff]  ;;  %v9877_v1 = vld [vmem:[%s18836_s5 + $0xe0] sm:$0xff] }
 0x303   :  { %v7353_v21 = vmax.f32 %v18468_v19, %v18484_v58  ;;  %v6111_v61 = vmax.f32 %v6109_v8, %v6110_v34  ;;  %v7342_v22 = vsel %vm6093_vm3, %v13786_v25, -inf  ;;  %v13771_v2 = vadd.f32 %v12600_v44, %v18408_v9  ;;  %v12820_v3 = vpop.f32.mrb[204].mxu1  ;;  %v6058_v49 = vpop.f32.mrb[205].mxu0 }
 0x304   :  { %v7344_v48 = vmax.f32 %v7342_v22, %v7343_v32  ;;  %v13787_v33 = vadd.f32 %v12820_v3, %v18408_v9  ;;  %v13772_v15 = vadd.f32 %v18408_v9, %v6058_v49  ;;  %v7292_v62 = vpop.f32.mrb[205].mxu1  ;;  %v13703_v44 = vpack.c.bf16 %v9876_v12, %v9875_v6  ;;  %v9861_v22 = vld [vmem:[%s18836_s5 + $0x60] sm:$0xff] }
 0x305   :  { %v6113_v55 = vsel %vm6093_vm3, %v13771_v2, -inf  ;;  %v13788_v4 = vadd.f32 %v18408_v9, %v7292_v62  ;;  %v6122_v27 = vsel %vm6093_vm3, %v6111_v61, -inf  ;;  %v13705_v61 = vpack.c.bf16 %v9860_v18, %v9859_v17  ;;  %v9862_v2 = vld [vmem:[%s18836_s5 + $0x68] sm:$0xff]  ;;  %v9887_v18 = vld [vmem:[%s18836_s5 + $0x130] sm:$0xff] }
 0x306   :  { %v7346_v0 = vsel %vm6093_vm3, %v13787_v33, -inf  ;;  %v6112_v10 = vsel %vm6093_vm3, %v13772_v15, -inf  ;;  %v12603_v54 = vpop.f32.mrb[206].mxu0  ;;  %v6123_v57 = vmax.f32 %v6121_v13, %v6122_v27  ;;  %v7355_v63 = vsel %vm6093_vm3, %v7344_v48, -inf  ;;  %v9879_v33 = vld [vmem:[%s18836_s5 + $0xf0] sm:$0xff]  ;;  %v9880_v15 = vld [vmem:[%s18836_s5 + $0xf8] sm:$0xff]  ;;  %13704 = vmatprep.subr.bf16.mxu0 %v13703_v44 }
 0x307   :  { %v6114_v59 = vmax.f32 %v6112_v10, %v6113_v55  ;;  %v7345_v23 = vsel %vm6093_vm3, %v13788_v4, -inf  ;;  %v13773_v50 = vadd.f32 %v12603_v54, %v18408_v9  ;;  %v12823_v41 = vpop.f32.mrb[206].mxu1  ;;  %v6068_v16 = vpop.f32.mrb[207].mxu0  ;;  %v7356_v29 = vmax.f32 %v7354_v60, %v7355_v63  ;;  %13706 = vmatpush3.bf16.msra.mxu0 %v13705_v61  ;;  %v9897_v54 = vld [vmem:[%s18836_s5 + $0x180] sm:$0xff] }
 0x308   :  { %v7347_v35 = vmax.f32 %v7345_v23, %v7346_v0  ;;  %v13789_v46 = vadd.f32 %v12823_v41, %v18408_v9  ;;  %v13774_v45 = vadd.f32 %v18408_v9, %v6068_v16  ;;  %v7302_v39 = vpop.f32.mrb[207].mxu1  ;;  %v6131_v5 = vmax.f32 %v6123_v57, 0.0  ;;  %v9863_v0 = vld [vmem:[%s18836_s5 + $0x70] sm:$0xff]  ;;  %v9898_v57 = vld [vmem:[%s18836_s5 + $0x188] sm:$0xff]  ;;  %v9881_v63 = vld [vmem:[%s18836_s5 + $0x100] sm:$0xff] }
 0x309   :  { %v6125_v14 = vsel %vm6093_vm3, %v6114_v59, -inf  ;;  %v6116_v7 = vsel %vm6093_vm3, %v13773_v50, -inf  ;;  %v13790_v52 = vadd.f32 %v18408_v9, %v7302_v39  ;;  %v7364_v53 = vmax.f32 %v7356_v29, 0.0  ;;  %v9882_v23 = vld [vmem:[%s18836_s5 + $0x108] sm:$0xff]  ;;  %v9899_v50 = vld [vmem:[%s18836_s5 + $0x190] sm:$0xff]  ;;  %v9900_v41 = vld [vmem:[%s18836_s5 + $0x198] sm:$0xff] }
 0x30a   :  { %v7358_v37 = vsel %vm6093_vm3, %v7347_v35, -inf  ;;  %v7349_v40 = vsel %vm6093_vm3, %v13789_v46, -inf  ;;  %v6115_v26 = vsel %vm6093_vm3, %v13774_v45, -inf  ;;  %v6126_v36 = vmax.f32 %v6124_v56, %v6125_v14  ;;  %v9883_v35 = vld [vmem:[%s18836_s5 + $0x110] sm:$0xff]  ;;  %v9884_v46 = vld [vmem:[%s18836_s5 + $0x118] sm:$0xff]  ;;  %v9901_v45 = vld [vmem:[%s18836_s5 + $0x1a0] sm:$0xff] }
 0x30b   :  { %v6117_v13 = vmax.f32 %v6115_v26, %v6116_v7  ;;  %v7348_v34 = vsel %vm6093_vm3, %v13790_v52, -inf  ;;  %v14086_v25 = vpack.i.bf16 %v6131_v5, %v7364_v53  ;;  %v7359_v60 = vmax.f32 %v7357_v47, %v7358_v37  ;;  %v9902_v39 = vld [vmem:[%s18836_s5 + $0x1a8] sm:$0xff]  ;;  %v9885_v14 = vld [vmem:[%s18836_s5 + $0x120] sm:$0xff]  ;;  %v9903_v52 = vld [vmem:[%s18836_s5 + $0x1b0] sm:$0xff] }
 0x30c   :  { %v7350_v32 = vmax.f32 %v7348_v34, %v7349_v40  ;;  %v6132_v8 = vmax.f32 %v6126_v36, 0.0  ;;  %v6127_v49 = vsel %vm6093_vm3, %v6105_v28, -inf  ;;  %v13707_v48 = vpack.c.bf16 %v9878_v30, %v9877_v1  ;;  %v9886_v7 = vld [vmem:[%s18836_s5 + $0x128] sm:$0xff]  ;;  %v9904_v53 = vld [vmem:[%s18836_s5 + $0x1b8] sm:$0xff]  ;;  %v9905_v40 = vld [vmem:[%s18836_s5 + $0x1c0] sm:$0xff] }
 0x30d   :  { %14087 = vrot.lane.b32.xlu0 %v14086_v25, %s14320_s24  ;;  %v7365_v3 = vmax.f32 %v7359_v60, 0.0  ;;  %v6128_v56 = vsel %vm6093_vm3, %v6117_v13, -inf  ;;  %v7360_v47 = vsel %vm6093_vm3, %v7338_v24, -inf  ;;  %v13709_v55 = vpack.c.bf16 %v9862_v2, %v9861_v22  ;;  %v9888_v37 = vld [vmem:[%s18836_s5 + $0x138] sm:$0xff]  ;;  %v9906_v26 = vld [vmem:[%s18836_s5 + $0x1c8] sm:$0xff]  ;;  %v9889_v30 = vld [vmem:[%s18836_s5 + $0x140] sm:$0xff] }
 0x30e   :  { %v6129_v62 = vmax.f32 %v6127_v49, %v6128_v56  ;;  %v7361_v38 = vsel %vm6093_vm3, %v7350_v32, -inf  ;;  %13708 = vmatprep.subr.bf16.mxu0 %v13707_v48  ;;  %v13711_v27 = vpack.c.bf16 %v9880_v15, %v9879_v33  ;;  %v13713_v10 = vpack.c.bf16 %v9864_v11, %v9863_v0  ;;  %v9890_v13 = vld [vmem:[%s18836_s5 + $0x148] sm:$0xff] }
 0x30f   :  { %v14091_v43 = vpack.i.bf16 %v6132_v8, %v7365_v3  ;;  %v7362_v28 = vmax.f32 %v7360_v47, %v7361_v38  ;;  %13710 = vmatpush3.bf16.msra.mxu0 %v13709_v55  ;;  %v13715_v59 = vpack.c.bf16 %v9898_v57, %v9897_v54  ;;  %v13717_v16 = vpack.c.bf16 %v9882_v23, %v9881_v63 }
 0x310   :  { %v6133_v4 = vmax.f32 %v6129_v62, 0.0  ;;  %13712 = vmatprep.subr.bf16.mxu0 %v13711_v27  ;;  %v13719_v29 = vpack.c.bf16 %v9900_v41, %v9899_v50  ;;  %v13721_v5 = vpack.c.bf16 %v9884_v46, %v9883_v35  ;;  %v13723_v6 = vpack.c.bf16 %v9902_v39, %v9901_v45 }
 0x311   :  { %14092 = vrot.lane.b32.xlu0 %v14091_v43, %s14321_s11  ;;  %v7366_v42 = vmax.f32 %v7362_v28, 0.0  ;;  %13716 = vmatprep.subr.bf16.mxu1 %v13715_v59  ;;  %v13725_v12 = vpack.c.bf16 %v9886_v7, %v9885_v14  ;;  %v13727_v17 = vpack.c.bf16 %v9904_v53, %v9903_v52  ;;  %v13729_v36 = vpack.c.bf16 %v9888_v37, %v9887_v18 }
 0x312   :  { %13718 = vmatpush3.bf16.msra.mxu1 %v13717_v16  ;;  %v13731_v1 = vpack.c.bf16 %v9906_v26, %v9905_v40  ;;  %v13733_v34 = vpack.c.bf16 %v9890_v13, %v9889_v30  ;;  %v6130_v22 = vmax.f32 %v6120_v31, 0.0  ;;  %v7363_v2 = vmax.f32 %v7353_v21, 0.0 }
 0x313   :  { %v14096_v24 = vpack.i.bf16 %v6133_v4, %v7366_v42  ;;  %13714 = vmatpush3.bf16.msra.mxu0 %v13713_v10  ;;  %13720 = vmatprep.subr.bf16.mxu1 %v13719_v29 }
 0x315   :  { %14097 = vrot.lane.b32.xlu1 %v14096_v24, %s14322_s4 }
 0x316   :  { %13722 = vmatpush3.bf16.msra.mxu1 %v13721_v5 }
 0x317   :  { %13724 = vmatprep.subr.bf16.mxu1 %v13723_v6 }
 0x31a   :  { %13726 = vmatpush3.bf16.msra.mxu1 %v13725_v12 }
 0x31b   :  { %13728 = vmatprep.subr.bf16.mxu1 %v13727_v17 }
 0x31e   :  { %13730 = vmatpush3.bf16.msra.mxu1 %v13729_v36 }
 0x31f   :  { %13732 = vmatprep.subr.bf16.mxu1 %v13731_v1 }
 0x322   :  { %13734 = vmatpush3.bf16.msra.mxu1 %v13733_v34 }
 0x37f   :  { %v14088_v25 = vpop.permute.xlu0 %14087 }
 0x380   :  { %v14090_v32 = vunpack.i.h.bf16 %v14088_v25  ;;  %v14089_v8 = vunpack.i.l.bf16 %v14088_v25 }
 0x382   :  { %v6146_v49 = vsel %vm6093_vm3, %v6130_v22, %v14090_v32  ;;  %v7379_v33 = vsel %vm6093_vm3, %v7363_v2, %v14089_v8 }
 0x383   :  { %v14093_v60 = vpop.permute.xlu0 %14092 }
 0x384   :  { %v14095_v44 = vunpack.i.h.bf16 %v14093_v60  ;;  %v14094_v61 = vunpack.i.l.bf16 %v14093_v60 }
 0x386   :  { %v6148_v15 = vsel %vm6147_vm4, %v6146_v49, %v14095_v44  ;;  %v7380_v62 = vsel %vm6147_vm4, %v7379_v33, %v14094_v61 }
 0x387   :  { %v14098_v3 = vpop.permute.xlu1 %14097 }
 0x388   :  { %v14100_v56 = vunpack.i.h.bf16 %v14098_v3  ;;  %v14099_v48 = vunpack.i.l.bf16 %v14098_v3 }
 0x38a   :  { %v13022_v47 = vpop.f32.mrb[208].mxu0  ;;  %v7381_v51 = vsel %vm6149_vm5, %v7380_v62, %v14099_v48  ;;  %v6150_v20 = vsel %vm6149_vm5, %v6148_v15, %v14100_v56 }
 0x38b   :  { %v13791_v19 = vadd.f32 %v13022_v47, %v18408_v9  ;;  %v13242_v31 = vpop.f32.mrb[208].mxu1  ;;  %9984 = vmatprep.mubr.f32.mxu0 %v7381_v51  ;;  %v8463_v58 = vpop.f32.mrb[209].mxu0 }
 0x38c   :  { %v13807_v21 = vadd.f32 %v13242_v31, %v18408_v9  ;;  %v13792_v38 = vadd.f32 %v18408_v9, %v8463_v58  ;;  %v9694_v43 = vpop.f32.mrb[209].mxu1  ;;  %9985 = vmatmul.mubr.f32.vlgmr.msra.gmra.mrb[224].mxu0 %v6150_v20 }
 0x38d   :  { %v8559_v28 = vsel %vm6093_vm3, %v13791_v19, -inf  ;;  %v13808_v55 = vadd.f32 %v18408_v9, %v9694_v43 }
 0x38e   :  { %v9790_v4 = vsel %vm6093_vm3, %v13807_v21, -inf  ;;  %v8558_v27 = vsel %vm6093_vm3, %v13792_v38, -inf  ;;  %v13025_v0 = vpop.f32.mrb[210].mxu0 }
 0x38f   :  { %v8560_v11 = vmax.f32 %v8558_v27, %v8559_v28  ;;  %v9789_v42 = vsel %vm6093_vm3, %v13808_v55, -inf  ;;  %v13793_v24 = vadd.f32 %v13025_v0, %v18408_v9  ;;  %v13245_v10 = vpop.f32.mrb[210].mxu1  ;;  %v8473_v54 = vpop.f32.mrb[211].mxu0 }
 0x390   :  { %v9791_v57 = vmax.f32 %v9789_v42, %v9790_v4  ;;  %v13809_v63 = vadd.f32 %v13245_v10, %v18408_v9  ;;  %v13794_v59 = vadd.f32 %v18408_v9, %v8473_v54  ;;  %v9704_v23 = vpop.f32.mrb[211].mxu1 }
 0x391   :  { %v8562_v50 = vsel %vm6093_vm3, %v13793_v24, -inf  ;;  %v13810_v41 = vadd.f32 %v18408_v9, %v9704_v23  ;;  %v18687_v31 = vsel %vm6093_vm3, %v8560_v11, -inf }
 0x392   :  { %v9793_v16 = vsel %vm6093_vm3, %v13809_v63, -inf  ;;  %v8561_v29 = vsel %vm6093_vm3, %v13794_v59, -inf  ;;  %v13028_v35 = vpop.f32.mrb[212].mxu0  ;;  %v18692_v43 = vsel %vm6093_vm3, %v9791_v57, -inf }
 0x393   :  { %v8563_v46 = vmax.f32 %v8561_v29, %v8562_v50  ;;  %v9792_v45 = vsel %vm6093_vm3, %v13810_v41, -inf  ;;  %v13795_v39 = vadd.f32 %v13028_v35, %v18408_v9  ;;  %v13248_v5 = vpop.f32.mrb[212].mxu1  ;;  %v8483_v6 = vpop.f32.mrb[213].mxu0 }
 0x394   :  { %v9794_v14 = vmax.f32 %v9792_v45, %v9793_v16  ;;  %v13811_v7 = vadd.f32 %v13248_v5, %v18408_v9  ;;  %v13796_v52 = vadd.f32 %v18408_v9, %v8483_v6  ;;  %v9714_v53 = vpop.f32.mrb[213].mxu1 }
 0x395   :  { %v8565_v12 = vsel %vm6093_vm3, %v13795_v39, -inf  ;;  %v13812_v17 = vadd.f32 %v18408_v9, %v9714_v53  ;;  %v8585_v42 = vsel %vm6093_vm3, %v8563_v46, -inf }
 0x396   :  { %v18656_v18 = vsel %vm6093_vm3, %v13811_v7, -inf  ;;  %v8564_v37 = vsel %vm6093_vm3, %v13796_v52, -inf  ;;  %v13031_v40 = vpop.f32.mrb[214].mxu0  ;;  %v9816_v63 = vsel %vm6093_vm3, %v9794_v14, -inf }
 0x397   :  { %v8566_v26 = vmax.f32 %v8564_v37, %v8565_v12  ;;  %v9795_v36 = vsel %vm6093_vm3, %v13812_v17, -inf  ;;  %v13797_v1 = vadd.f32 %v13031_v40, %v18408_v9  ;;  %v13251_v30 = vpop.f32.mrb[214].mxu1  ;;  %v8493_v13 = vpop.f32.mrb[215].mxu0 }
 0x398   :  { %v9797_v34 = vmax.f32 %v9795_v36, %v18656_v18  ;;  %v13813_v25 = vadd.f32 %v13251_v30, %v18408_v9  ;;  %v13798_v60 = vadd.f32 %v18408_v9, %v8493_v13  ;;  %v9724_v32 = vpop.f32.mrb[215].mxu1 }
 0x399   :  { %v18665_v8 = vsel %vm6093_vm3, %v13797_v1, -inf  ;;  %v13814_v44 = vadd.f32 %v18408_v9, %v9724_v32  ;;  %v8588_v7 = vsel %vm6093_vm3, %v8566_v26, -inf }
 0x39a   :  { %v18669_v61 = vsel %vm6093_vm3, %v13813_v25, -inf  ;;  %v18672_v22 = vsel %vm6093_vm3, %v13798_v60, -inf  ;;  %v13034_v2 = vpop.f32.mrb[216].mxu0  ;;  %v9819_v18 = vsel %vm6093_vm3, %v9797_v34, -inf }
 0x39b   :  { %v8569_v3 = vmax.f32 %v18672_v22, %v18665_v8  ;;  %v18677_v49 = vsel %vm6093_vm3, %v13814_v44, -inf  ;;  %v13799_v56 = vadd.f32 %v13034_v2, %v18408_v9  ;;  %v13254_v48 = vpop.f32.mrb[216].mxu1  ;;  %v8503_v33 = vpop.f32.mrb[217].mxu0 }
 0x39c   :  { %v9800_v15 = vmax.f32 %v18677_v49, %v18669_v61  ;;  %v13815_v62 = vadd.f32 %v13254_v48, %v18408_v9  ;;  %v13800_v47 = vadd.f32 %v18408_v9, %v8503_v33  ;;  %v9734_v51 = vpop.f32.mrb[217].mxu1  ;;  %v9896_v61 = vld [vmem:[%s18836_s5 + $0x178] sm:$0xff] }
 0x39d   :  { %v8571_v20 = vsel %vm6093_vm3, %v13799_v56, -inf  ;;  %v13816_v19 = vadd.f32 %v18408_v9, %v9734_v51 }
 0x39e   :  { %v9802_v58 = vsel %vm6093_vm3, %v13815_v62, -inf  ;;  %v8570_v21 = vsel %vm6093_vm3, %v13800_v47, -inf  ;;  %v13037_v38 = vpop.f32.mrb[218].mxu0  ;;  %v9822_v8 = vsel %vm6093_vm3, %v9800_v15, -inf }
 0x39f   :  { %v8572_v28 = vmax.f32 %v8570_v21, %v8571_v20  ;;  %v9801_v55 = vsel %vm6093_vm3, %v13816_v19, -inf  ;;  %v13801_v4 = vadd.f32 %v13037_v38, %v18408_v9  ;;  %v13257_v27 = vpop.f32.mrb[218].mxu1  ;;  %v8513_v0 = vpop.f32.mrb[219].mxu0  ;;  %v9907_v20 = vld [vmem:[%s18836_s5 + $0x1d0] sm:$0xff] }
 0x3a0   :  { %v9803_v24 = vmax.f32 %v9801_v55, %v9802_v58  ;;  %v13817_v11 = vadd.f32 %v13257_v27, %v18408_v9  ;;  %v13802_v10 = vadd.f32 %v18408_v9, %v8513_v0  ;;  %v9744_v54 = vpop.f32.mrb[219].mxu1  ;;  %v9891_v55 = vld [vmem:[%s18836_s5 + $0x150] sm:$0xff] }
 0x3a1   :  { %v18701_v57 = vsel %vm6093_vm3, %v8572_v28, -inf  ;;  %v8574_v59 = vsel %vm6093_vm3, %v13801_v4, -inf  ;;  %v13818_v23 = vadd.f32 %v18408_v9, %v9744_v54  ;;  %v9908_v28 = vld [vmem:[%s18836_s5 + $0x1d8] sm:$0xff] }
 0x3a2   :  { %v8584_v50 = vmax.f32 %v18687_v31, %v18701_v57  ;;  %v18708_v41 = vsel %vm6093_vm3, %v9803_v24, -inf  ;;  %v9805_v16 = vsel %vm6093_vm3, %v13817_v11, -inf  ;;  %v8573_v29 = vsel %vm6093_vm3, %v13802_v10, -inf  ;;  %v13040_v35 = vpop.f32.mrb[220].mxu0  ;;  %v9892_v4 = vld [vmem:[%s18836_s5 + $0x158] sm:$0xff]  ;;  %v9909_v24 = vld [vmem:[%s18836_s5 + $0x1e0] sm:$0xff] }
 0x3a3   :  { %v9815_v46 = vmax.f32 %v18692_v43, %v18708_v41  ;;  %v8575_v45 = vmax.f32 %v8573_v29, %v8574_v59  ;;  %v9804_v39 = vsel %vm6093_vm3, %v13818_v23, -inf  ;;  %v13803_v5 = vadd.f32 %v13040_v35, %v18408_v9  ;;  %v13260_v6 = vpop.f32.mrb[220].mxu1  ;;  %v8523_v14 = vpop.f32.mrb[221].mxu0  ;;  %v9910_v11 = vld [vmem:[%s18836_s5 + $0x1e8] sm:$0xff]  ;;  %v10065_v41 = vld [vmem:[%s18838_s7 + $0x20] sm:$0xff] }
 0x3a4   :  { %v9806_v52 = vmax.f32 %v9804_v39, %v9805_v16  ;;  %v13819_v53 = vadd.f32 %v13260_v6, %v18408_v9  ;;  %v13804_v12 = vadd.f32 %v18408_v9, %v8523_v14  ;;  %v9754_v17 = vpop.f32.mrb[221].mxu1  ;;  %v13735_v29 = vpack.c.bf16 %v9908_v28, %v9907_v20  ;;  %v9894_v39 = vld [vmem:[%s18836_s5 + $0x168] sm:$0xff] }
 0x3a5   :  { %v8586_v37 = vsel %vm6093_vm3, %v8575_v45, -inf  ;;  %v8577_v40 = vsel %vm6093_vm3, %v13803_v5, -inf  ;;  %v13820_v36 = vadd.f32 %v18408_v9, %v9754_v17  ;;  %v13737_v35 = vpack.c.bf16 %v9892_v4, %v9891_v55  ;;  %v9893_v45 = vld [vmem:[%s18836_s5 + $0x160] sm:$0xff] }
 0x3a6   :  { %v9817_v1 = vsel %vm6093_vm3, %v9806_v52, -inf  ;;  %v9808_v30 = vsel %vm6093_vm3, %v13819_v53, -inf  ;;  %v8576_v26 = vsel %vm6093_vm3, %v13804_v12, -inf  ;;  %v13043_v13 = vpop.f32.mrb[222].mxu0  ;;  %v8587_v25 = vmax.f32 %v8585_v42, %v8586_v37  ;;  %v9911_v52 = vld [vmem:[%s18836_s5 + $0x1f0] sm:$0xff]  ;;  %v9912_v53 = vld [vmem:[%s18836_s5 + $0x1f8] sm:$0xff]  ;;  %13736 = vmatprep.subr.bf16.mxu1 %v13735_v29 }
 0x3a7   :  { %v8578_v60 = vmax.f32 %v8576_v26, %v8577_v40  ;;  %v9807_v32 = vsel %vm6093_vm3, %v13820_v36, -inf  ;;  %v13805_v44 = vadd.f32 %v13043_v13, %v18408_v9  ;;  %v13263_v34 = vpop.f32.mrb[222].mxu1  ;;  %v8533_v2 = vpop.f32.mrb[223].mxu0  ;;  %v9818_v56 = vmax.f32 %v9816_v63, %v9817_v1  ;;  %13738 = vmatpush3.bf16.msra.mxu1 %v13737_v35  ;;  %v9895_v36 = vld [vmem:[%s18836_s5 + $0x170] sm:$0xff]  ;;  %v10061_v26 = vld [vmem:[%s18838_s7] sm:$0xff]  ;;  %v10062_v13 = vld [vmem:[%s18838_s7 + $0x8] sm:$0xff] }
 0x3a8   :  { %v9809_v48 = vmax.f32 %v9807_v32, %v9808_v30  ;;  %v13821_v33 = vadd.f32 %v13263_v34, %v18408_v9  ;;  %v13806_v62 = vadd.f32 %v18408_v9, %v8533_v2  ;;  %v9764_v47 = vpop.f32.mrb[223].mxu1  ;;  %v8595_v51 = vmax.f32 %v8587_v25, 0.0  ;;  %v10063_v25 = vld [vmem:[%s18838_s7 + $0x10] sm:$0xff]  ;;  %v10064_v32 = vld [vmem:[%s18838_s7 + $0x18] sm:$0xff]  ;;  %v11027_v29 = vld [vmem:[%s18840_s8] ss:$0 sm:$0xff] }
 0x3a9   :  { %v8589_v19 = vsel %vm6093_vm3, %v8578_v60, -inf  ;;  %v8580_v58 = vsel %vm6093_vm3, %v13805_v44, -inf  ;;  %v13822_v21 = vadd.f32 %v18408_v9, %v9764_v47  ;;  %v9826_v38 = vmax.f32 %v9818_v56, 0.0 }
 0x3aa   :  { %v9820_v27 = vsel %vm6093_vm3, %v9809_v48, -inf  ;;  %v9811_v0 = vsel %vm6093_vm3, %v13821_v33, -inf  ;;  %v8579_v42 = vsel %vm6093_vm3, %v13806_v62, -inf  ;;  %v8590_v9 = vmax.f32 %v8588_v7, %v8589_v19 }
 0x3ab   :  { %v8581_v10 = vmax.f32 %v8579_v42, %v8580_v58  ;;  %v9810_v54 = vsel %vm6093_vm3, %v13822_v21, -inf  ;;  %v14101_v63 = vpack.i.bf16 %v8595_v51, %v9826_v38  ;;  %v9821_v59 = vmax.f32 %v9819_v18, %v9820_v27  ;;  %v10067_v27 = vld [vmem:[%s18838_s7 + $0x30] sm:$0xff]  ;;  %v10068_v42 = vld [vmem:[%s18838_s7 + $0x38] sm:$0xff] }
 0x3ac   :  { %v9812_v23 = vmax.f32 %v9810_v54, %v9811_v0  ;;  %v8596_v16 = vmax.f32 %v8590_v9, 0.0  ;;  %v8591_v5 = vsel %vm6093_vm3, %v8569_v3, -inf  ;;  %v13739_v7 = vpack.c.bf16 %v9910_v11, %v9909_v24  ;;  %v11026_v11 = vld [vmem:[%s18839_s6] ss:$0 sm:$0xff] }
 0x3ad   :  { %v8592_v6 = vsel %vm6093_vm3, %v8581_v10, -inf  ;;  %14102 = vrot.lane.b32.xlu1 %v14101_v63, %s14320_s24  ;;  %v9827_v14 = vmax.f32 %v9821_v59, 0.0  ;;  %v13741_v18 = vpack.c.bf16 %v9894_v39, %v9893_v45  ;;  %v13743_v40 = vpack.c.bf16 %v9912_v53, %v9911_v52 }
 0x3ae   :  { %v9823_v22 = vsel %vm6093_vm3, %v9812_v23, -inf  ;;  %v8593_v3 = vmax.f32 %v8591_v5, %v8592_v6  ;;  %13740 = vmatprep.subr.bf16.mxu1 %v13739_v7  ;;  %v13745_v1 = vpack.c.bf16 %v9896_v61, %v9895_v36  ;;  %v14323_v30 = vmov 0.0|0.0  }
 0x3af   :  { %v14106_v12 = vpack.i.bf16 %v8596_v16, %v9827_v14  ;;  %v9824_v17 = vmax.f32 %v9822_v8, %v9823_v22  ;;  %13742 = vmatpush3.bf16.msra.mxu1 %v13741_v18  ;;  %13747 = vmatprep.subr.bf16.mxu0 %v14323_v30  ;;  %v13748_v60 = vpack.c.bf16 %v10062_v13, %v10061_v26  ;;  %v8594_v47 = vmax.f32 %v8584_v50, 0.0 }
 0x3b0   :  { %v8597_v37 = vmax.f32 %v8593_v3, 0.0  ;;  %13744 = vmatprep.subr.bf16.mxu1 %v13743_v40  ;;  %v13751_v44 = vpack.c.bf16 %v10064_v32, %v10063_v25  ;;  %v9825_v51 = vmax.f32 %v9815_v46, 0.0  ;;  %v10066_v46 = vld [vmem:[%s18838_s7 + $0x28] sm:$0xff]  ;;  %v14325_v9 = vmov 0.0  }
 0x3b1   :  { %14107 = vrot.lane.b32.xlu0 %v14106_v12, %s14321_s11  ;;  %v9828_v49 = vmax.f32 %v9824_v17, 0.0  ;;  %13749 = vmatpush3.bf16.msra.mxu0 %v13748_v60  ;;  %v13754_v0 = vpack.c.bf16 %v10066_v46, %v10065_v41  ;;  %v13757_v24 = vpack.c.bf16 %v10068_v42, %v10067_v27 }
 0x3b2   :  { %13750 = vmatprep.subr.bf16.mxu0 %v14323_v30  ;;  %13280 = vmatprep.mubr.msk.f32.mxu0 %vm14324_vm6, %v14325_v9 }
 0x3b3   :  { %v14111_v15 = vpack.i.bf16 %v8597_v37, %v9828_v49  ;;  %13746 = vmatpush3.bf16.msra.mxu1 %v13745_v1 }
 0x3b5   :  { %14112 = vrot.lane.b32.xlu1 %v14111_v15, %s14322_s4  ;;  %13752 = vmatpush3.bf16.msra.mxu0 %v13751_v44 }
 0x3b6   :  { %13753 = vmatprep.subr.bf16.mxu0 %v14323_v30 }
 0x3b9   :  { %13755 = vmatpush3.bf16.msra.mxu0 %v13754_v0 }
 0x3ba   :  { %13756 = vmatprep.subr.bf16.mxu0 %v14323_v30 }
 0x3bd   :  { %13758 = vmatpush3.bf16.msra.mxu0 %v13757_v24 }
 0x41f   :  { %v14103_v34 = vpop.permute.xlu1 %14102 }
 0x420   :  { %v14105_v56 = vunpack.i.h.bf16 %v14103_v34  ;;  %v14104_v48 = vunpack.i.l.bf16 %v14103_v34 }
 0x422   :  { %v8610_v19 = vsel %vm6093_vm3, %v8594_v47, %v14105_v56  ;;  %v9841_v38 = vsel %vm6093_vm3, %v9825_v51, %v14104_v48 }
 0x423   :  { %v14108_v2 = vpop.permute.xlu0 %14107 }
 0x424   :  { %v14110_v33 = vunpack.i.h.bf16 %v14108_v2  ;;  %v14109_v62 = vunpack.i.l.bf16 %v14108_v2 }
 0x426   :  { %v8611_v28 = vsel %vm6147_vm4, %v8610_v19, %v14110_v33  ;;  %v9842_v55 = vsel %vm6147_vm4, %v9841_v38, %v14109_v62 }
 0x427   :  { %v14113_v20 = vpop.permute.xlu1 %14112 }
 0x428   :  { %v14115_v58 = vunpack.i.h.bf16 %v14113_v20  ;;  %v14114_v21 = vunpack.i.l.bf16 %v14113_v20 }
 0x42a   :  { %v8612_v4 = vsel %vm6149_vm5, %v8611_v28, %v14115_v58  ;;  %v9843_v31 = vsel %vm6149_vm5, %v9842_v55, %v14114_v21 }
 0x42b   :  { %10054 = vmatprep.mubr.f32.mxu1 %v9843_v31 }
 0x42c   :  { %10055 = vmatmul.mubr.f32.vlgmr.msra.gmra.mrb[224].mxu1 %v8612_v4 }
 0x45f   :  { %v11833_v57 = vpop.f32.mrb[224].mxu0 }
 0x460   :  { %v11834_v43 = vpop.f32.mrb[225].mxu0 }
 0x461   :  { %v11835_v50 = vadd.f32 %v11834_v43, %v11833_v57 }
 0x463   :  { %v9987_v63 = vadd.f32 %v11835_v50, %v11026_v11 }
 0x4ff   :  { %v11868_v10 = vpop.f32.mrb[224].mxu1 }
 0x500   :  { %v11869_v54 = vpop.f32.mrb[225].mxu1 }
 0x501   :  { %v11870_v59 = vadd.f32 %v11869_v54, %v11868_v10 }
 0x503   :  { %v10057_v23 = vadd.f32 %v11870_v59, %v9987_v63 }
 0x505   :  { %v10060_v16 = vmax.f32 %v10057_v23, 0.0 }
 0x507   :  { %13281 = vmatmul.mubr.msk.f32.vlgmr.msra.gmra.mrb[226].mxu0 %vm6147_vm4, %v10060_v16 }
 0x5da   :  { %v10145_v35 = vpop.f32.mrb[226].mxu0 }
 0x5db   :  { %v10146_v45 = vadd.f32 %v11027_v29, %v10145_v35  ;;  %v13282_v39 = vpop.f32.mrb[227].mxu0 }
 0x5dd   :  { %v10149_v5 = vmax.f32 %v10146_v45, 0.0 }
 0x5df   :  { %10150 = vst [vmem:[%s18841_s9] sm:$0xff] %v10149_v5 }

</bundles_post_ra>
